<compile_context>
chip_gen: v7x
topology: tpu7x:2x2x1
jax: 0.10.0
libtpu: 0.0.40
codegen_flags: <defaults>
</compile_context>

<pallas_src>
import functools

import jax
import jax.numpy as jnp
import numpy as np
from jax.experimental import pallas as pl
from jax.experimental.pallas import tpu as pltpu

BN_EPS = 1e-5


# --------------------------------------------------------------------------- #
# Pallas kernel
# --------------------------------------------------------------------------- #
def gsb_kernel(x_ref, w1a_ref, b1a_ref, wdwa_ref, bdwa_ref,
               w2_ref, b2_ref, wdw2_ref, bdw2_ref, ws_ref, bs_ref,
               out_ref, *, H, W):
    """One batch element.  All tensors are (channels, H*W) with pixels in lanes."""
    HW = H * W
    x = x_ref[0]                                        # (C1, HW), f32
    ch1 = wdwa_ref.shape[1]                             # GSConv1 half width

    # Lane-aligned pixel coordinates (float math; avoids integer div/mod).
    col = jax.lax.broadcasted_iota(jnp.int32, (1, HW), 1).astype(jnp.float32)
    row = jnp.floor(col / float(W))                     # y coordinate
    cw = col - row * float(W)                           # x coordinate

    def shift2d(a, oy, ox):
        """out[:, y*W+x] = a[:, (y+oy)*W + (x+ox)], zero outside the image."""
        off = oy * W + ox
        r = a if off == 0 else pltpu.roll(a, (-off) % HW, axis=1)
        conds = []
        if oy < 0:
            conds.append(row >= float(-oy))
        elif oy > 0:
            conds.append(row < float(H - oy))
        if ox < 0:
            conds.append(cw >= float(-ox))
        elif ox > 0:
            conds.append(cw < float(W - ox))
        if conds:
            m = conds[0]
            for c in conds[1:]:
                m = jnp.logical_and(m, c)
            r = jnp.where(m, r, 0.0)
        return r

    def mish(v):
        # x * tanh(softplus(x)), numerically-stable softplus (exp/log/tanh -> EUP).
        sp = jnp.maximum(v, 0.0) + jnp.log(1.0 + jnp.exp(-jnp.abs(v)))
        return v * jnp.tanh(sp)

    def dw5x5(a, w_ref, b_ref):
        """Depthwise 5x5 conv (pad 2), BN folded into w/b."""
        wts = w_ref[...]                                # (25, C, 1), tap-major
        acc = jnp.zeros_like(a)
        t = 0
        for oy in range(-2, 3):
            for ox in range(-2, 3):
                acc = acc + wts[t] * shift2d(a, oy, ox)
                t += 1
        return acc + b_ref[...]

    # ---- GSConv1: 1x1 conv + BN + Mish, then depthwise 5x5 + BN + Mish ----
    x1a = mish(jnp.dot(w1a_ref[...], x, preferred_element_type=jnp.float32)
               + b1a_ref[...])[:ch1]                    # (ch1, HW)
    dwa = mish(dw5x5(x1a, wdwa_ref, bdwa_ref))          # (ch1, HW)
    # Pre-shuffle concat; GSConv1's channel shuffle is folded into w2's
    # input-channel permutation (done in the wrapper).
    g1 = jnp.concatenate([x1a, dwa], axis=0)            # (2*ch1, HW)

    # ---- GSConv2.cv1: 3x3 conv + BN (no act) as ONE fused 9-tap matmul ----
    taps = [shift2d(g1, oy, ox) for oy in (-1, 0, 1) for ox in (-1, 0, 1)]
    slab = jnp.concatenate(taps, axis=0)                # (9*2*ch1, HW)
    y1 = jnp.dot(w2_ref[...], slab,
                 preferred_element_type=jnp.float32) + b2_ref[...]     # (ch2, HW)

    # ---- GSConv2.cv2: depthwise 5x5 + BN (no act) ----
    dw2 = dw5x5(y1, wdw2_ref, bdw2_ref)                 # (ch2, HW)

    # ---- shortcut: 1x1 conv + BN (no act) ----
    sc = jnp.dot(ws_ref[...], x,
                 preferred_element_type=jnp.float32) + bs_ref[...]     # (C2, HW)

    # ---- GSConv2 channel shuffle (weights pre-permuted with sigma, so the
    # shuffle collapses to 4 contiguous blocks) + residual add ----
    q = y1.shape[0] // 2
    gs2 = jnp.concatenate([y1[:q], dw2[:q], y1[q:], dw2[q:]], axis=0)  # (C2, HW)
    out_ref[0] = (gs2 + sc).astype(out_ref.dtype)


# --------------------------------------------------------------------------- #
# Wrapper: BN folding, shuffle-as-weight-permutation, pallas_call
# --------------------------------------------------------------------------- #
def _fold_bn(w, bn):
    """Fold eval-mode BatchNorm into conv weight (OIHW) / bias."""
    g, b, m, v = [a.astype(jnp.float32) for a in bn]
    scale = g / jnp.sqrt(v + BN_EPS)
    w_f = w.astype(jnp.float32) * scale.reshape((-1,) + (1,) * (w.ndim - 1))
    b_f = b - m * scale
    return w_f, b_f


@jax.jit
def gsbottleneck_forward(x, p):
    """x: (B, C1, H, W) NCHW; p: raw PyTorch-layout parameters."""
    f32 = jnp.float32
    B, C1, H, W = x.shape
    HW = H * W

    ch1 = p["g1_cv1_w"].shape[0]          # GSConv1 half width
    c_ = p["g2_cv1_w"].shape[1]           # GSConv2 input width (= 2*ch1)
    ch2 = p["g2_cv1_w"].shape[0]          # GSConv2 half width
    C2 = p["sc_w"].shape[0]               # output channels (= 2*ch2)
    assert c_ == 2 * ch1 and C2 == 2 * ch2 and ch2 % 2 == 0

    # GSConv1.cv1 (1x1): pad output rows to a sublane multiple for the MXU.
    w, b = _fold_bn(p["g1_cv1_w"], p["g1_cv1_bn"])
    m1 = max(8, ((ch1 + 7) // 8) * 8)
    w1a = jnp.zeros((m1, C1), f32).at[:ch1].set(w[:, :, 0, 0])
    b1a = jnp.zeros((m1, 1), f32).at[:ch1, 0].set(b)

    # GSConv1.cv2 (depthwise 5x5): (25, ch1, 1), tap-major (ky, kx).
    w, b = _fold_bn(p["g1_cv2_w"], p["g1_cv2_bn"])
    wdwa = jnp.transpose(w[:, 0].reshape(ch1, 25), (1, 0))[:, :, None]
    bdwa = b[:, None]

    # Channel-shuffle permutations folded into GSConv2 weights:
    #  * perm1     : GSConv1's output shuffle -> input-channel perm of cv1_2
    #  * sigma     : even/odd split of cv1_2 / cv2_2 channels so GSConv2's output
    #                shuffle becomes 4 contiguous blocks in the kernel.
    perm1 = np.concatenate([np.arange(0, c_, 2), np.arange(1, c_, 2)])
    perm1_inv = np.argsort(perm1)
    sigma = np.concatenate([np.arange(0, ch2, 2), np.arange(1, ch2, 2)])

    # GSConv2.cv1 (3x3): fused-tap weight (ch2, 9*c_), (ky, kx, cin) minor order.
    w, b = _fold_bn(p["g2_cv1_w"], p["g2_cv1_bn"])
    w = w[sigma][:, perm1_inv]                                  # (ch2, c_, 3, 3)
    w2f = jnp.transpose(w, (0, 2, 3, 1)).reshape(ch2, 9 * c_)
    b2 = b[sigma][:, None]

    # GSConv2.cv2 (depthwise 5x5), sigma-permuted.
    w, b = _fold_bn(p["g2_cv2_w"], p["g2_cv2_bn"])
    wdw2 = jnp.transpose(w[sigma, 0].reshape(ch2, 25), (1, 0))[:, :, None]
    bdw2 = b[sigma][:, None]

    # Shortcut (1x1).
    w, b = _fold_bn(p["sc_w"], p["sc_bn"])
    ws = w[:, :, 0, 0]
    bs = b[:, None]

    xf = x.reshape(B, C1, HW).astype(f32)                       # free reshape
    kern = functools.partial(gsb_kernel, H=H, W=W)
    full = lambda *s: pl.BlockSpec(s, lambda b: (0,) * len(s))

    out = pl.pallas_call(
        kern,
        out_shape=jax.ShapeDtypeStruct((B, C2, HW), f32),
        grid_spec=pltpu.PrefetchScalarGridSpec(
            num_scalar_prefetch=0,
            grid=(B,),
            in_specs=[
                pl.BlockSpec((1, C1, HW), lambda b: (b, 0, 0)),   # x (per batch)
                full(m1, C1), full(m1, 1),                        # GSConv1.cv1
                full(25, ch1, 1), full(ch1, 1),                   # GSConv1.cv2
                full(ch2, 9 * c_), full(ch2, 1),                  # GSConv2.cv1
                full(25, ch2, 1), full(ch2, 1),                   # GSConv2.cv2
                full(C2, C1), full(C2, 1),                        # shortcut
            ],
            out_specs=pl.BlockSpec((1, C2, HW), lambda b: (b, 0, 0)),
        ),
        compiler_params=pltpu.CompilerParams(
            dimension_semantics=("parallel",)),   # batch is independent
    )(xf, w1a, b1a, wdwa, bdwa, w2f, b2, wdw2, bdw2, ws, bs)

    return out.reshape(B, C2, H, W)


# --------------------------------------------------------------------------- #
# Pure-JAX reference (literal translation of the PyTorch module, eval mode)
# --------------------------------------------------------------------------- #
def _bn_eval(y, bn):
    g, b, m, v = bn
    s = g / jnp.sqrt(v + BN_EPS)
    return (y - m[None, :, None, None]) * s[None, :, None, None] \
        + b[None, :, None, None]


def _conv_mish_ref(x, w, bn, pad, groups, act):
    y = jax.lax.conv_general_dilated(
        x, w, (1, 1), [(pad, pad), (pad, pad)],
        dimension_numbers=("NCHW", "OIHW", "NCHW"),
        feature_group_count=groups,
        precision=jax.lax.Precision.HIGHEST)
    y = _bn_eval(y, bn)
    return y * jnp.tanh(jax.nn.softplus(y)) if act else y


def _gsconv_ref(x, w1, bn1, w2, bn2, k, act):
    x1 = _conv_mish_ref(x, w1, bn1, k // 2, 1, act)
    x2 = jnp.concatenate(
        [x1, _conv_mish_ref(x1, w2, bn2, 2, x1.shape[1], act)], axis=1)
    b, n, h, w = x2.shape
    y = x2.reshape(b * n // 2, 2, h * w)
    y = jnp.transpose(y, (1, 0, 2))
    y = y.reshape(2, -1, n // 2, h, w)
    return jnp.concatenate([y[0], y[1]], axis=1)


def gsbottleneck_ref(x, p):
    g1 = _gsconv_ref(x, p["g1_cv1_w"], p["g1_cv1_bn"],
                     p["g1_cv2_w"], p["g1_cv2_bn"], 1, True)
    g2 = _gsconv_ref(g1, p["g2_cv1_w"], p["g2_cv1_bn"],
                     p["g2_cv2_w"], p["g2_cv2_bn"], 3, False)
    sc = _conv_mish_ref(x, p["sc_w"], p["sc_bn"], 0, 1, False)
    return g2 + sc


# --------------------------------------------------------------------------- #
# Deterministic parameters + self-check
# --------------------------------------------------------------------------- #
def make_params(key, c1, c2, e=0.5):
    c_ = int(c2 * e)
    ch1 = c_ // 2
    ch2 = c2 // 2
    ks = iter(jax.random.split(key, 32))
    n = lambda shape, s=0.2: s * jax.random.normal(next(ks), shape, jnp.float32)
    bn = lambda c: (1.0 + 0.1 * jax.random.normal(next(ks), (c,), jnp.float32),
                    n((c,)),                       # beta
                    n((c,)),                       # running mean
                    1.0 + jnp.abs(n((c,))))        # running var
    return {
        "g1_cv1_w": n((ch1, c1, 1, 1)), "g1_cv1_bn": bn(ch1),
        "g1_cv2_w": n((ch1, 1, 5, 5)),  "g1_cv2_bn": bn(ch1),
        "g2_cv1_w": n((ch2, c_, 3, 3)), "g2_cv1_bn": bn(ch2),
        "g2_cv2_w": n((ch2, 1, 5, 5)),  "g2_cv2_bn": bn(ch2),
        "sc_w":     n((c2, c1, 1, 1)),  "sc_bn": bn(c2),
    }


if __name__ == "__main__":
    key = jax.random.PRNGKey(0)
    kx, kp = jax.random.split(key)

    B, C1, C2, H, W = 2, 16, 16, 16, 16
    x = jax.random.normal(kx, (B, C1, H, W), jnp.float32)
    p = make_params(kp, C1, C2)

    out = jax.block_until_ready(gsbottleneck_forward(x, p))
    ref = jax.block_until_ready(gsbottleneck_ref(x, p))
    np.testing.assert_allclose(np.asarray(out), np.asarray(ref),
                               rtol=1e-2, atol=1e-2)
    print("KERNEL_OK")
</pallas_src>

<mosaic_0001>
module attributes {stable_mosaic.version = 11 : i64} {
  func.func @gsb_kernel(%arg0: i32, %arg1: memref<1x16x256xf32, #tpu.memory_space<vmem>>, %arg2: memref<8x16xf32, #tpu.memory_space<vmem>>, %arg3: memref<8x1xf32, #tpu.memory_space<vmem>>, %arg4: memref<25x4x1xf32, #tpu.memory_space<vmem>>, %arg5: memref<4x1xf32, #tpu.memory_space<vmem>>, %arg6: memref<8x72xf32, #tpu.memory_space<vmem>>, %arg7: memref<8x1xf32, #tpu.memory_space<vmem>>, %arg8: memref<25x8x1xf32, #tpu.memory_space<vmem>>, %arg9: memref<8x1xf32, #tpu.memory_space<vmem>>, %arg10: memref<16x16xf32, #tpu.memory_space<vmem>>, %arg11: memref<16x1xf32, #tpu.memory_space<vmem>>, %arg12: memref<1x16x256xf32, #tpu.memory_space<vmem>>) attributes {dimension_semantics = [#tpu.dimension_semantics<parallel>], iteration_bounds = array<i64: 2>, scalar_prefetch = 0 : i64, scratch_operands = 0 : i64, tpu.core_type = #tpu.core_type<tc>, window_params = [{transform_indices = @transform_0, window_bounds = array<i64: 1, 16, 256>}, {pipeline_mode = #tpu.pipeline_mode<synchronous>, transform_indices = @transform_1, window_bounds = array<i64: 8, 16>}, {pipeline_mode = #tpu.pipeline_mode<synchronous>, transform_indices = @transform_2, window_bounds = array<i64: 8, 1>}, {pipeline_mode = #tpu.pipeline_mode<synchronous>, transform_indices = @transform_3, window_bounds = array<i64: 25, 4, 1>}, {pipeline_mode = #tpu.pipeline_mode<synchronous>, transform_indices = @transform_4, window_bounds = array<i64: 4, 1>}, {pipeline_mode = #tpu.pipeline_mode<synchronous>, transform_indices = @transform_5, window_bounds = array<i64: 8, 72>}, {pipeline_mode = #tpu.pipeline_mode<synchronous>, transform_indices = @transform_6, window_bounds = array<i64: 8, 1>}, {pipeline_mode = #tpu.pipeline_mode<synchronous>, transform_indices = @transform_7, window_bounds = array<i64: 25, 8, 1>}, {pipeline_mode = #tpu.pipeline_mode<synchronous>, transform_indices = @transform_8, window_bounds = array<i64: 8, 1>}, {pipeline_mode = #tpu.pipeline_mode<synchronous>, transform_indices = @transform_9, window_bounds = array<i64: 16, 16>}, {pipeline_mode = #tpu.pipeline_mode<synchronous>, transform_indices = @transform_10, window_bounds = array<i64: 16, 1>}, {transform_indices = @transform_11, window_bounds = array<i64: 1, 16, 256>}]} {
    %c0 = arith.constant 0 : index
    %c0_0 = arith.constant 0 : index
    %c0_1 = arith.constant 0 : index
    %0 = vector.load %arg1[%c0, %c0_0, %c0_1] : memref<1x16x256xf32, #tpu.memory_space<vmem>>, vector<1x16x256xf32>
    %1 = vector.shape_cast %0 : vector<1x16x256xf32> to vector<16x256xf32>
    %2 = tpu.iota {dimensions = array<i32: 1>} : vector<1x256xi32>
    %3 = arith.sitofp %2 : vector<1x256xi32> to vector<1x256xf32>
    %cst = arith.constant 1.600000e+01 : f32
    %4 = vector.broadcast %cst : f32 to vector<1x256xf32>
    %5 = arith.divf %3, %4 : vector<1x256xf32>
    %6 = math.floor %5 : vector<1x256xf32>
    %cst_2 = arith.constant 1.600000e+01 : f32
    %7 = vector.broadcast %cst_2 : f32 to vector<1x256xf32>
    %8 = arith.mulf %6, %7 : vector<1x256xf32>
    %9 = arith.subf %3, %8 : vector<1x256xf32>
    %c0_3 = arith.constant 0 : index
    %c0_4 = arith.constant 0 : index
    %10 = vector.load %arg2[%c0_3, %c0_4] : memref<8x16xf32, #tpu.memory_space<vmem>>, vector<8x16xf32>
    %cst_5 = arith.constant dense<0.000000e+00> : vector<8x256xf32>
    %11 = tpu.matmul %10, %1, %cst_5 {dimension_numbers = #tpu.dot_dimension_numbers<[1], [0], [0], [1], [0, 0, 1, 1], [], []>} : vector<8x16xf32>, vector<16x256xf32>, vector<8x256xf32> -> vector<8x256xf32>
    %c0_6 = arith.constant 0 : index
    %c0_7 = arith.constant 0 : index
    %12 = vector.load %arg3[%c0_6, %c0_7] : memref<8x1xf32, #tpu.memory_space<vmem>>, vector<8x1xf32>
    %13 = vector.broadcast %12 : vector<8x1xf32> to vector<8x256xf32>
    %14 = arith.addf %11, %13 : vector<8x256xf32>
    %cst_8 = arith.constant 0.000000e+00 : f32
    %15 = vector.broadcast %cst_8 : f32 to vector<8x256xf32>
    %16 = arith.maximumf %14, %15 : vector<8x256xf32>
    %17 = math.absf %14 : vector<8x256xf32>
    %cst_9 = arith.constant 0.000000e+00 : f32
    %18 = vector.broadcast %cst_9 : f32 to vector<8x256xf32>
    %19 = arith.subf %18, %17 : vector<8x256xf32>
    %20 = math.exp %19 : vector<8x256xf32>
    %cst_10 = arith.constant 1.000000e+00 : f32
    %21 = vector.broadcast %cst_10 : f32 to vector<8x256xf32>
    %22 = arith.addf %21, %20 : vector<8x256xf32>
    %23 = math.log %22 : vector<8x256xf32>
    %24 = arith.addf %16, %23 : vector<8x256xf32>
    %25 = math.tanh %24 : vector<8x256xf32>
    %26 = arith.mulf %14, %25 : vector<8x256xf32>
    %27 = vector.extract_strided_slice %26 {offsets = [0, 0], sizes = [4, 256], strides = [1, 1]} : vector<8x256xf32> to vector<4x256xf32>
    %c0_11 = arith.constant 0 : index
    %c0_12 = arith.constant 0 : index
    %c0_13 = arith.constant 0 : index
    %28 = vector.load %arg4[%c0_11, %c0_12, %c0_13] : memref<25x4x1xf32, #tpu.memory_space<vmem>>, vector<25x4x1xf32>
    %cst_14 = arith.constant 0.000000e+00 : f32
    %29 = vector.broadcast %cst_14 : f32 to vector<4x256xf32>
    %30 = vector.extract_strided_slice %28 {offsets = [0, 0, 0], sizes = [1, 4, 1], strides = [1, 1, 1]} : vector<25x4x1xf32> to vector<1x4x1xf32>
    %31 = vector.shape_cast %30 : vector<1x4x1xf32> to vector<4x1xf32>
    %c34_i32 = arith.constant 34 : i32
    %32 = tpu.dynamic_rotate %27 by %c34_i32 dim 1 : vector<4x256xf32>, i32 -> vector<4x256xf32>
    %cst_15 = arith.constant 2.000000e+00 : f32
    %33 = vector.broadcast %cst_15 : f32 to vector<1x256xf32>
    %34 = arith.cmpf oge, %6, %33 : vector<1x256xf32>
    %cst_16 = arith.constant 2.000000e+00 : f32
    %35 = vector.broadcast %cst_16 : f32 to vector<1x256xf32>
    %36 = arith.cmpf oge, %9, %35 : vector<1x256xf32>
    %37 = arith.andi %34, %36 : vector<1x256xi1>
    %cst_17 = arith.constant 0.000000e+00 : f32
    %38 = vector.shape_cast %37 : vector<1x256xi1> to vector<1x256xi1>
    %39 = vector.broadcast %38 : vector<1x256xi1> to vector<4x256xi1>
    %40 = vector.broadcast %cst_17 : f32 to vector<4x256xf32>
    %41 = arith.select %39, %32, %40 : vector<4x256xi1>, vector<4x256xf32>
    %42 = vector.broadcast %31 : vector<4x1xf32> to vector<4x256xf32>
    %43 = arith.mulf %42, %41 : vector<4x256xf32>
    %44 = arith.addf %29, %43 : vector<4x256xf32>
    %45 = vector.extract_strided_slice %28 {offsets = [1, 0, 0], sizes = [1, 4, 1], strides = [1, 1, 1]} : vector<25x4x1xf32> to vector<1x4x1xf32>
    %46 = vector.shape_cast %45 : vector<1x4x1xf32> to vector<4x1xf32>
    %c33_i32 = arith.constant 33 : i32
    %47 = tpu.dynamic_rotate %27 by %c33_i32 dim 1 : vector<4x256xf32>, i32 -> vector<4x256xf32>
    %cst_18 = arith.constant 2.000000e+00 : f32
    %48 = vector.broadcast %cst_18 : f32 to vector<1x256xf32>
    %49 = arith.cmpf oge, %6, %48 : vector<1x256xf32>
    %cst_19 = arith.constant 1.000000e+00 : f32
    %50 = vector.broadcast %cst_19 : f32 to vector<1x256xf32>
    %51 = arith.cmpf oge, %9, %50 : vector<1x256xf32>
    %52 = arith.andi %49, %51 : vector<1x256xi1>
    %cst_20 = arith.constant 0.000000e+00 : f32
    %53 = vector.shape_cast %52 : vector<1x256xi1> to vector<1x256xi1>
    %54 = vector.broadcast %53 : vector<1x256xi1> to vector<4x256xi1>
    %55 = vector.broadcast %cst_20 : f32 to vector<4x256xf32>
    %56 = arith.select %54, %47, %55 : vector<4x256xi1>, vector<4x256xf32>
    %57 = vector.broadcast %46 : vector<4x1xf32> to vector<4x256xf32>
    %58 = arith.mulf %57, %56 : vector<4x256xf32>
    %59 = arith.addf %44, %58 : vector<4x256xf32>
    %60 = vector.extract_strided_slice %28 {offsets = [2, 0, 0], sizes = [1, 4, 1], strides = [1, 1, 1]} : vector<25x4x1xf32> to vector<1x4x1xf32>
    %61 = vector.shape_cast %60 : vector<1x4x1xf32> to vector<4x1xf32>
    %c32_i32 = arith.constant 32 : i32
    %62 = tpu.dynamic_rotate %27 by %c32_i32 dim 1 : vector<4x256xf32>, i32 -> vector<4x256xf32>
    %cst_21 = arith.constant 2.000000e+00 : f32
    %63 = vector.broadcast %cst_21 : f32 to vector<1x256xf32>
    %64 = arith.cmpf oge, %6, %63 : vector<1x256xf32>
    %cst_22 = arith.constant 0.000000e+00 : f32
    %65 = vector.shape_cast %64 : vector<1x256xi1> to vector<1x256xi1>
    %66 = vector.broadcast %65 : vector<1x256xi1> to vector<4x256xi1>
    %67 = vector.broadcast %cst_22 : f32 to vector<4x256xf32>
    %68 = arith.select %66, %62, %67 : vector<4x256xi1>, vector<4x256xf32>
    %69 = vector.broadcast %61 : vector<4x1xf32> to vector<4x256xf32>
    %70 = arith.mulf %69, %68 : vector<4x256xf32>
    %71 = arith.addf %59, %70 : vector<4x256xf32>
    %72 = vector.extract_strided_slice %28 {offsets = [3, 0, 0], sizes = [1, 4, 1], strides = [1, 1, 1]} : vector<25x4x1xf32> to vector<1x4x1xf32>
    %73 = vector.shape_cast %72 : vector<1x4x1xf32> to vector<4x1xf32>
    %c31_i32 = arith.constant 31 : i32
    %74 = tpu.dynamic_rotate %27 by %c31_i32 dim 1 : vector<4x256xf32>, i32 -> vector<4x256xf32>
    %cst_23 = arith.constant 2.000000e+00 : f32
    %75 = vector.broadcast %cst_23 : f32 to vector<1x256xf32>
    %76 = arith.cmpf oge, %6, %75 : vector<1x256xf32>
    %cst_24 = arith.constant 1.500000e+01 : f32
    %77 = vector.broadcast %cst_24 : f32 to vector<1x256xf32>
    %78 = arith.cmpf olt, %9, %77 : vector<1x256xf32>
    %79 = arith.andi %76, %78 : vector<1x256xi1>
    %cst_25 = arith.constant 0.000000e+00 : f32
    %80 = vector.shape_cast %79 : vector<1x256xi1> to vector<1x256xi1>
    %81 = vector.broadcast %80 : vector<1x256xi1> to vector<4x256xi1>
    %82 = vector.broadcast %cst_25 : f32 to vector<4x256xf32>
    %83 = arith.select %81, %74, %82 : vector<4x256xi1>, vector<4x256xf32>
    %84 = vector.broadcast %73 : vector<4x1xf32> to vector<4x256xf32>
    %85 = arith.mulf %84, %83 : vector<4x256xf32>
    %86 = arith.addf %71, %85 : vector<4x256xf32>
    %87 = vector.extract_strided_slice %28 {offsets = [4, 0, 0], sizes = [1, 4, 1], strides = [1, 1, 1]} : vector<25x4x1xf32> to vector<1x4x1xf32>
    %88 = vector.shape_cast %87 : vector<1x4x1xf32> to vector<4x1xf32>
    %c30_i32 = arith.constant 30 : i32
    %89 = tpu.dynamic_rotate %27 by %c30_i32 dim 1 : vector<4x256xf32>, i32 -> vector<4x256xf32>
    %cst_26 = arith.constant 2.000000e+00 : f32
    %90 = vector.broadcast %cst_26 : f32 to vector<1x256xf32>
    %91 = arith.cmpf oge, %6, %90 : vector<1x256xf32>
    %cst_27 = arith.constant 1.400000e+01 : f32
    %92 = vector.broadcast %cst_27 : f32 to vector<1x256xf32>
    %93 = arith.cmpf olt, %9, %92 : vector<1x256xf32>
    %94 = arith.andi %91, %93 : vector<1x256xi1>
    %cst_28 = arith.constant 0.000000e+00 : f32
    %95 = vector.shape_cast %94 : vector<1x256xi1> to vector<1x256xi1>
    %96 = vector.broadcast %95 : vector<1x256xi1> to vector<4x256xi1>
    %97 = vector.broadcast %cst_28 : f32 to vector<4x256xf32>
    %98 = arith.select %96, %89, %97 : vector<4x256xi1>, vector<4x256xf32>
    %99 = vector.broadcast %88 : vector<4x1xf32> to vector<4x256xf32>
    %100 = arith.mulf %99, %98 : vector<4x256xf32>
    %101 = arith.addf %86, %100 : vector<4x256xf32>
    %102 = vector.extract_strided_slice %28 {offsets = [5, 0, 0], sizes = [1, 4, 1], strides = [1, 1, 1]} : vector<25x4x1xf32> to vector<1x4x1xf32>
    %103 = vector.shape_cast %102 : vector<1x4x1xf32> to vector<4x1xf32>
    %c18_i32 = arith.constant 18 : i32
    %104 = tpu.dynamic_rotate %27 by %c18_i32 dim 1 : vector<4x256xf32>, i32 -> vector<4x256xf32>
    %cst_29 = arith.constant 1.000000e+00 : f32
    %105 = vector.broadcast %cst_29 : f32 to vector<1x256xf32>
    %106 = arith.cmpf oge, %6, %105 : vector<1x256xf32>
    %cst_30 = arith.constant 2.000000e+00 : f32
    %107 = vector.broadcast %cst_30 : f32 to vector<1x256xf32>
    %108 = arith.cmpf oge, %9, %107 : vector<1x256xf32>
    %109 = arith.andi %106, %108 : vector<1x256xi1>
    %cst_31 = arith.constant 0.000000e+00 : f32
    %110 = vector.shape_cast %109 : vector<1x256xi1> to vector<1x256xi1>
    %111 = vector.broadcast %110 : vector<1x256xi1> to vector<4x256xi1>
    %112 = vector.broadcast %cst_31 : f32 to vector<4x256xf32>
    %113 = arith.select %111, %104, %112 : vector<4x256xi1>, vector<4x256xf32>
    %114 = vector.broadcast %103 : vector<4x1xf32> to vector<4x256xf32>
    %115 = arith.mulf %114, %113 : vector<4x256xf32>
    %116 = arith.addf %101, %115 : vector<4x256xf32>
    %117 = vector.extract_strided_slice %28 {offsets = [6, 0, 0], sizes = [1, 4, 1], strides = [1, 1, 1]} : vector<25x4x1xf32> to vector<1x4x1xf32>
    %118 = vector.shape_cast %117 : vector<1x4x1xf32> to vector<4x1xf32>
    %c17_i32 = arith.constant 17 : i32
    %119 = tpu.dynamic_rotate %27 by %c17_i32 dim 1 : vector<4x256xf32>, i32 -> vector<4x256xf32>
    %cst_32 = arith.constant 1.000000e+00 : f32
    %120 = vector.broadcast %cst_32 : f32 to vector<1x256xf32>
    %121 = arith.cmpf oge, %6, %120 : vector<1x256xf32>
    %cst_33 = arith.constant 1.000000e+00 : f32
    %122 = vector.broadcast %cst_33 : f32 to vector<1x256xf32>
    %123 = arith.cmpf oge, %9, %122 : vector<1x256xf32>
    %124 = arith.andi %121, %123 : vector<1x256xi1>
    %cst_34 = arith.constant 0.000000e+00 : f32
    %125 = vector.shape_cast %124 : vector<1x256xi1> to vector<1x256xi1>
    %126 = vector.broadcast %125 : vector<1x256xi1> to vector<4x256xi1>
    %127 = vector.broadcast %cst_34 : f32 to vector<4x256xf32>
    %128 = arith.select %126, %119, %127 : vector<4x256xi1>, vector<4x256xf32>
    %129 = vector.broadcast %118 : vector<4x1xf32> to vector<4x256xf32>
    %130 = arith.mulf %129, %128 : vector<4x256xf32>
    %131 = arith.addf %116, %130 : vector<4x256xf32>
    %132 = vector.extract_strided_slice %28 {offsets = [7, 0, 0], sizes = [1, 4, 1], strides = [1, 1, 1]} : vector<25x4x1xf32> to vector<1x4x1xf32>
    %133 = vector.shape_cast %132 : vector<1x4x1xf32> to vector<4x1xf32>
    %c16_i32 = arith.constant 16 : i32
    %134 = tpu.dynamic_rotate %27 by %c16_i32 dim 1 : vector<4x256xf32>, i32 -> vector<4x256xf32>
    %cst_35 = arith.constant 1.000000e+00 : f32
    %135 = vector.broadcast %cst_35 : f32 to vector<1x256xf32>
    %136 = arith.cmpf oge, %6, %135 : vector<1x256xf32>
    %cst_36 = arith.constant 0.000000e+00 : f32
    %137 = vector.shape_cast %136 : vector<1x256xi1> to vector<1x256xi1>
    %138 = vector.broadcast %137 : vector<1x256xi1> to vector<4x256xi1>
    %139 = vector.broadcast %cst_36 : f32 to vector<4x256xf32>
    %140 = arith.select %138, %134, %139 : vector<4x256xi1>, vector<4x256xf32>
    %141 = vector.broadcast %133 : vector<4x1xf32> to vector<4x256xf32>
    %142 = arith.mulf %141, %140 : vector<4x256xf32>
    %143 = arith.addf %131, %142 : vector<4x256xf32>
    %144 = vector.extract_strided_slice %28 {offsets = [8, 0, 0], sizes = [1, 4, 1], strides = [1, 1, 1]} : vector<25x4x1xf32> to vector<1x4x1xf32>
    %145 = vector.shape_cast %144 : vector<1x4x1xf32> to vector<4x1xf32>
    %c15_i32 = arith.constant 15 : i32
    %146 = tpu.dynamic_rotate %27 by %c15_i32 dim 1 : vector<4x256xf32>, i32 -> vector<4x256xf32>
    %cst_37 = arith.constant 1.000000e+00 : f32
    %147 = vector.broadcast %cst_37 : f32 to vector<1x256xf32>
    %148 = arith.cmpf oge, %6, %147 : vector<1x256xf32>
    %cst_38 = arith.constant 1.500000e+01 : f32
    %149 = vector.broadcast %cst_38 : f32 to vector<1x256xf32>
    %150 = arith.cmpf olt, %9, %149 : vector<1x256xf32>
    %151 = arith.andi %148, %150 : vector<1x256xi1>
    %cst_39 = arith.constant 0.000000e+00 : f32
    %152 = vector.shape_cast %151 : vector<1x256xi1> to vector<1x256xi1>
    %153 = vector.broadcast %152 : vector<1x256xi1> to vector<4x256xi1>
    %154 = vector.broadcast %cst_39 : f32 to vector<4x256xf32>
    %155 = arith.select %153, %146, %154 : vector<4x256xi1>, vector<4x256xf32>
    %156 = vector.broadcast %145 : vector<4x1xf32> to vector<4x256xf32>
    %157 = arith.mulf %156, %155 : vector<4x256xf32>
    %158 = arith.addf %143, %157 : vector<4x256xf32>
    %159 = vector.extract_strided_slice %28 {offsets = [9, 0, 0], sizes = [1, 4, 1], strides = [1, 1, 1]} : vector<25x4x1xf32> to vector<1x4x1xf32>
    %160 = vector.shape_cast %159 : vector<1x4x1xf32> to vector<4x1xf32>
    %c14_i32 = arith.constant 14 : i32
    %161 = tpu.dynamic_rotate %27 by %c14_i32 dim 1 : vector<4x256xf32>, i32 -> vector<4x256xf32>
    %cst_40 = arith.constant 1.000000e+00 : f32
    %162 = vector.broadcast %cst_40 : f32 to vector<1x256xf32>
    %163 = arith.cmpf oge, %6, %162 : vector<1x256xf32>
    %cst_41 = arith.constant 1.400000e+01 : f32
    %164 = vector.broadcast %cst_41 : f32 to vector<1x256xf32>
    %165 = arith.cmpf olt, %9, %164 : vector<1x256xf32>
    %166 = arith.andi %163, %165 : vector<1x256xi1>
    %cst_42 = arith.constant 0.000000e+00 : f32
    %167 = vector.shape_cast %166 : vector<1x256xi1> to vector<1x256xi1>
    %168 = vector.broadcast %167 : vector<1x256xi1> to vector<4x256xi1>
    %169 = vector.broadcast %cst_42 : f32 to vector<4x256xf32>
    %170 = arith.select %168, %161, %169 : vector<4x256xi1>, vector<4x256xf32>
    %171 = vector.broadcast %160 : vector<4x1xf32> to vector<4x256xf32>
    %172 = arith.mulf %171, %170 : vector<4x256xf32>
    %173 = arith.addf %158, %172 : vector<4x256xf32>
    %174 = vector.extract_strided_slice %28 {offsets = [10, 0, 0], sizes = [1, 4, 1], strides = [1, 1, 1]} : vector<25x4x1xf32> to vector<1x4x1xf32>
    %175 = vector.shape_cast %174 : vector<1x4x1xf32> to vector<4x1xf32>
    %c2_i32 = arith.constant 2 : i32
    %176 = tpu.dynamic_rotate %27 by %c2_i32 dim 1 : vector<4x256xf32>, i32 -> vector<4x256xf32>
    %cst_43 = arith.constant 2.000000e+00 : f32
    %177 = vector.broadcast %cst_43 : f32 to vector<1x256xf32>
    %178 = arith.cmpf oge, %9, %177 : vector<1x256xf32>
    %cst_44 = arith.constant 0.000000e+00 : f32
    %179 = vector.shape_cast %178 : vector<1x256xi1> to vector<1x256xi1>
    %180 = vector.broadcast %179 : vector<1x256xi1> to vector<4x256xi1>
    %181 = vector.broadcast %cst_44 : f32 to vector<4x256xf32>
    %182 = arith.select %180, %176, %181 : vector<4x256xi1>, vector<4x256xf32>
    %183 = vector.broadcast %175 : vector<4x1xf32> to vector<4x256xf32>
    %184 = arith.mulf %183, %182 : vector<4x256xf32>
    %185 = arith.addf %173, %184 : vector<4x256xf32>
    %186 = vector.extract_strided_slice %28 {offsets = [11, 0, 0], sizes = [1, 4, 1], strides = [1, 1, 1]} : vector<25x4x1xf32> to vector<1x4x1xf32>
    %187 = vector.shape_cast %186 : vector<1x4x1xf32> to vector<4x1xf32>
    %c1_i32 = arith.constant 1 : i32
    %188 = tpu.dynamic_rotate %27 by %c1_i32 dim 1 : vector<4x256xf32>, i32 -> vector<4x256xf32>
    %cst_45 = arith.constant 1.000000e+00 : f32
    %189 = vector.broadcast %cst_45 : f32 to vector<1x256xf32>
    %190 = arith.cmpf oge, %9, %189 : vector<1x256xf32>
    %cst_46 = arith.constant 0.000000e+00 : f32
    %191 = vector.shape_cast %190 : vector<1x256xi1> to vector<1x256xi1>
    %192 = vector.broadcast %191 : vector<1x256xi1> to vector<4x256xi1>
    %193 = vector.broadcast %cst_46 : f32 to vector<4x256xf32>
    %194 = arith.select %192, %188, %193 : vector<4x256xi1>, vector<4x256xf32>
    %195 = vector.broadcast %187 : vector<4x1xf32> to vector<4x256xf32>
    %196 = arith.mulf %195, %194 : vector<4x256xf32>
    %197 = arith.addf %185, %196 : vector<4x256xf32>
    %198 = vector.extract_strided_slice %28 {offsets = [12, 0, 0], sizes = [1, 4, 1], strides = [1, 1, 1]} : vector<25x4x1xf32> to vector<1x4x1xf32>
    %199 = vector.shape_cast %198 : vector<1x4x1xf32> to vector<4x1xf32>
    %200 = vector.broadcast %199 : vector<4x1xf32> to vector<4x256xf32>
    %201 = arith.mulf %200, %27 : vector<4x256xf32>
    %202 = arith.addf %197, %201 : vector<4x256xf32>
    %203 = vector.extract_strided_slice %28 {offsets = [13, 0, 0], sizes = [1, 4, 1], strides = [1, 1, 1]} : vector<25x4x1xf32> to vector<1x4x1xf32>
    %204 = vector.shape_cast %203 : vector<1x4x1xf32> to vector<4x1xf32>
    %c255_i32 = arith.constant 255 : i32
    %205 = tpu.dynamic_rotate %27 by %c255_i32 dim 1 : vector<4x256xf32>, i32 -> vector<4x256xf32>
    %cst_47 = arith.constant 1.500000e+01 : f32
    %206 = vector.broadcast %cst_47 : f32 to vector<1x256xf32>
    %207 = arith.cmpf olt, %9, %206 : vector<1x256xf32>
    %cst_48 = arith.constant 0.000000e+00 : f32
    %208 = vector.shape_cast %207 : vector<1x256xi1> to vector<1x256xi1>
    %209 = vector.broadcast %208 : vector<1x256xi1> to vector<4x256xi1>
    %210 = vector.broadcast %cst_48 : f32 to vector<4x256xf32>
    %211 = arith.select %209, %205, %210 : vector<4x256xi1>, vector<4x256xf32>
    %212 = vector.broadcast %204 : vector<4x1xf32> to vector<4x256xf32>
    %213 = arith.mulf %212, %211 : vector<4x256xf32>
    %214 = arith.addf %202, %213 : vector<4x256xf32>
    %215 = vector.extract_strided_slice %28 {offsets = [14, 0, 0], sizes = [1, 4, 1], strides = [1, 1, 1]} : vector<25x4x1xf32> to vector<1x4x1xf32>
    %216 = vector.shape_cast %215 : vector<1x4x1xf32> to vector<4x1xf32>
    %c254_i32 = arith.constant 254 : i32
    %217 = tpu.dynamic_rotate %27 by %c254_i32 dim 1 : vector<4x256xf32>, i32 -> vector<4x256xf32>
    %cst_49 = arith.constant 1.400000e+01 : f32
    %218 = vector.broadcast %cst_49 : f32 to vector<1x256xf32>
    %219 = arith.cmpf olt, %9, %218 : vector<1x256xf32>
    %cst_50 = arith.constant 0.000000e+00 : f32
    %220 = vector.shape_cast %219 : vector<1x256xi1> to vector<1x256xi1>
    %221 = vector.broadcast %220 : vector<1x256xi1> to vector<4x256xi1>
    %222 = vector.broadcast %cst_50 : f32 to vector<4x256xf32>
    %223 = arith.select %221, %217, %222 : vector<4x256xi1>, vector<4x256xf32>
    %224 = vector.broadcast %216 : vector<4x1xf32> to vector<4x256xf32>
    %225 = arith.mulf %224, %223 : vector<4x256xf32>
    %226 = arith.addf %214, %225 : vector<4x256xf32>
    %227 = vector.extract_strided_slice %28 {offsets = [15, 0, 0], sizes = [1, 4, 1], strides = [1, 1, 1]} : vector<25x4x1xf32> to vector<1x4x1xf32>
    %228 = vector.shape_cast %227 : vector<1x4x1xf32> to vector<4x1xf32>
    %c242_i32 = arith.constant 242 : i32
    %229 = tpu.dynamic_rotate %27 by %c242_i32 dim 1 : vector<4x256xf32>, i32 -> vector<4x256xf32>
    %cst_51 = arith.constant 1.500000e+01 : f32
    %230 = vector.broadcast %cst_51 : f32 to vector<1x256xf32>
    %231 = arith.cmpf olt, %6, %230 : vector<1x256xf32>
    %cst_52 = arith.constant 2.000000e+00 : f32
    %232 = vector.broadcast %cst_52 : f32 to vector<1x256xf32>
    %233 = arith.cmpf oge, %9, %232 : vector<1x256xf32>
    %234 = arith.andi %231, %233 : vector<1x256xi1>
    %cst_53 = arith.constant 0.000000e+00 : f32
    %235 = vector.shape_cast %234 : vector<1x256xi1> to vector<1x256xi1>
    %236 = vector.broadcast %235 : vector<1x256xi1> to vector<4x256xi1>
    %237 = vector.broadcast %cst_53 : f32 to vector<4x256xf32>
    %238 = arith.select %236, %229, %237 : vector<4x256xi1>, vector<4x256xf32>
    %239 = vector.broadcast %228 : vector<4x1xf32> to vector<4x256xf32>
    %240 = arith.mulf %239, %238 : vector<4x256xf32>
    %241 = arith.addf %226, %240 : vector<4x256xf32>
    %242 = vector.extract_strided_slice %28 {offsets = [16, 0, 0], sizes = [1, 4, 1], strides = [1, 1, 1]} : vector<25x4x1xf32> to vector<1x4x1xf32>
    %243 = vector.shape_cast %242 : vector<1x4x1xf32> to vector<4x1xf32>
    %c241_i32 = arith.constant 241 : i32
    %244 = tpu.dynamic_rotate %27 by %c241_i32 dim 1 : vector<4x256xf32>, i32 -> vector<4x256xf32>
    %cst_54 = arith.constant 1.500000e+01 : f32
    %245 = vector.broadcast %cst_54 : f32 to vector<1x256xf32>
    %246 = arith.cmpf olt, %6, %245 : vector<1x256xf32>
    %cst_55 = arith.constant 1.000000e+00 : f32
    %247 = vector.broadcast %cst_55 : f32 to vector<1x256xf32>
    %248 = arith.cmpf oge, %9, %247 : vector<1x256xf32>
    %249 = arith.andi %246, %248 : vector<1x256xi1>
    %cst_56 = arith.constant 0.000000e+00 : f32
    %250 = vector.shape_cast %249 : vector<1x256xi1> to vector<1x256xi1>
    %251 = vector.broadcast %250 : vector<1x256xi1> to vector<4x256xi1>
    %252 = vector.broadcast %cst_56 : f32 to vector<4x256xf32>
    %253 = arith.select %251, %244, %252 : vector<4x256xi1>, vector<4x256xf32>
    %254 = vector.broadcast %243 : vector<4x1xf32> to vector<4x256xf32>
    %255 = arith.mulf %254, %253 : vector<4x256xf32>
    %256 = arith.addf %241, %255 : vector<4x256xf32>
    %257 = vector.extract_strided_slice %28 {offsets = [17, 0, 0], sizes = [1, 4, 1], strides = [1, 1, 1]} : vector<25x4x1xf32> to vector<1x4x1xf32>
    %258 = vector.shape_cast %257 : vector<1x4x1xf32> to vector<4x1xf32>
    %c240_i32 = arith.constant 240 : i32
    %259 = tpu.dynamic_rotate %27 by %c240_i32 dim 1 : vector<4x256xf32>, i32 -> vector<4x256xf32>
    %cst_57 = arith.constant 1.500000e+01 : f32
    %260 = vector.broadcast %cst_57 : f32 to vector<1x256xf32>
    %261 = arith.cmpf olt, %6, %260 : vector<1x256xf32>
    %cst_58 = arith.constant 0.000000e+00 : f32
    %262 = vector.shape_cast %261 : vector<1x256xi1> to vector<1x256xi1>
    %263 = vector.broadcast %262 : vector<1x256xi1> to vector<4x256xi1>
    %264 = vector.broadcast %cst_58 : f32 to vector<4x256xf32>
    %265 = arith.select %263, %259, %264 : vector<4x256xi1>, vector<4x256xf32>
    %266 = vector.broadcast %258 : vector<4x1xf32> to vector<4x256xf32>
    %267 = arith.mulf %266, %265 : vector<4x256xf32>
    %268 = arith.addf %256, %267 : vector<4x256xf32>
    %269 = vector.extract_strided_slice %28 {offsets = [18, 0, 0], sizes = [1, 4, 1], strides = [1, 1, 1]} : vector<25x4x1xf32> to vector<1x4x1xf32>
    %270 = vector.shape_cast %269 : vector<1x4x1xf32> to vector<4x1xf32>
    %c239_i32 = arith.constant 239 : i32
    %271 = tpu.dynamic_rotate %27 by %c239_i32 dim 1 : vector<4x256xf32>, i32 -> vector<4x256xf32>
    %cst_59 = arith.constant 1.500000e+01 : f32
    %272 = vector.broadcast %cst_59 : f32 to vector<1x256xf32>
    %273 = arith.cmpf olt, %6, %272 : vector<1x256xf32>
    %cst_60 = arith.constant 1.500000e+01 : f32
    %274 = vector.broadcast %cst_60 : f32 to vector<1x256xf32>
    %275 = arith.cmpf olt, %9, %274 : vector<1x256xf32>
    %276 = arith.andi %273, %275 : vector<1x256xi1>
    %cst_61 = arith.constant 0.000000e+00 : f32
    %277 = vector.shape_cast %276 : vector<1x256xi1> to vector<1x256xi1>
    %278 = vector.broadcast %277 : vector<1x256xi1> to vector<4x256xi1>
    %279 = vector.broadcast %cst_61 : f32 to vector<4x256xf32>
    %280 = arith.select %278, %271, %279 : vector<4x256xi1>, vector<4x256xf32>
    %281 = vector.broadcast %270 : vector<4x1xf32> to vector<4x256xf32>
    %282 = arith.mulf %281, %280 : vector<4x256xf32>
    %283 = arith.addf %268, %282 : vector<4x256xf32>
    %284 = vector.extract_strided_slice %28 {offsets = [19, 0, 0], sizes = [1, 4, 1], strides = [1, 1, 1]} : vector<25x4x1xf32> to vector<1x4x1xf32>
    %285 = vector.shape_cast %284 : vector<1x4x1xf32> to vector<4x1xf32>
    %c238_i32 = arith.constant 238 : i32
    %286 = tpu.dynamic_rotate %27 by %c238_i32 dim 1 : vector<4x256xf32>, i32 -> vector<4x256xf32>
    %cst_62 = arith.constant 1.500000e+01 : f32
    %287 = vector.broadcast %cst_62 : f32 to vector<1x256xf32>
    %288 = arith.cmpf olt, %6, %287 : vector<1x256xf32>
    %cst_63 = arith.constant 1.400000e+01 : f32
    %289 = vector.broadcast %cst_63 : f32 to vector<1x256xf32>
    %290 = arith.cmpf olt, %9, %289 : vector<1x256xf32>
    %291 = arith.andi %288, %290 : vector<1x256xi1>
    %cst_64 = arith.constant 0.000000e+00 : f32
    %292 = vector.shape_cast %291 : vector<1x256xi1> to vector<1x256xi1>
    %293 = vector.broadcast %292 : vector<1x256xi1> to vector<4x256xi1>
    %294 = vector.broadcast %cst_64 : f32 to vector<4x256xf32>
    %295 = arith.select %293, %286, %294 : vector<4x256xi1>, vector<4x256xf32>
    %296 = vector.broadcast %285 : vector<4x1xf32> to vector<4x256xf32>
    %297 = arith.mulf %296, %295 : vector<4x256xf32>
    %298 = arith.addf %283, %297 : vector<4x256xf32>
    %299 = vector.extract_strided_slice %28 {offsets = [20, 0, 0], sizes = [1, 4, 1], strides = [1, 1, 1]} : vector<25x4x1xf32> to vector<1x4x1xf32>
    %300 = vector.shape_cast %299 : vector<1x4x1xf32> to vector<4x1xf32>
    %c226_i32 = arith.constant 226 : i32
    %301 = tpu.dynamic_rotate %27 by %c226_i32 dim 1 : vector<4x256xf32>, i32 -> vector<4x256xf32>
    %cst_65 = arith.constant 1.400000e+01 : f32
    %302 = vector.broadcast %cst_65 : f32 to vector<1x256xf32>
    %303 = arith.cmpf olt, %6, %302 : vector<1x256xf32>
    %cst_66 = arith.constant 2.000000e+00 : f32
    %304 = vector.broadcast %cst_66 : f32 to vector<1x256xf32>
    %305 = arith.cmpf oge, %9, %304 : vector<1x256xf32>
    %306 = arith.andi %303, %305 : vector<1x256xi1>
    %cst_67 = arith.constant 0.000000e+00 : f32
    %307 = vector.shape_cast %306 : vector<1x256xi1> to vector<1x256xi1>
    %308 = vector.broadcast %307 : vector<1x256xi1> to vector<4x256xi1>
    %309 = vector.broadcast %cst_67 : f32 to vector<4x256xf32>
    %310 = arith.select %308, %301, %309 : vector<4x256xi1>, vector<4x256xf32>
    %311 = vector.broadcast %300 : vector<4x1xf32> to vector<4x256xf32>
    %312 = arith.mulf %311, %310 : vector<4x256xf32>
    %313 = arith.addf %298, %312 : vector<4x256xf32>
    %314 = vector.extract_strided_slice %28 {offsets = [21, 0, 0], sizes = [1, 4, 1], strides = [1, 1, 1]} : vector<25x4x1xf32> to vector<1x4x1xf32>
    %315 = vector.shape_cast %314 : vector<1x4x1xf32> to vector<4x1xf32>
    %c225_i32 = arith.constant 225 : i32
    %316 = tpu.dynamic_rotate %27 by %c225_i32 dim 1 : vector<4x256xf32>, i32 -> vector<4x256xf32>
    %cst_68 = arith.constant 1.400000e+01 : f32
    %317 = vector.broadcast %cst_68 : f32 to vector<1x256xf32>
    %318 = arith.cmpf olt, %6, %317 : vector<1x256xf32>
    %cst_69 = arith.constant 1.000000e+00 : f32
    %319 = vector.broadcast %cst_69 : f32 to vector<1x256xf32>
    %320 = arith.cmpf oge, %9, %319 : vector<1x256xf32>
    %321 = arith.andi %318, %320 : vector<1x256xi1>
    %cst_70 = arith.constant 0.000000e+00 : f32
    %322 = vector.shape_cast %321 : vector<1x256xi1> to vector<1x256xi1>
    %323 = vector.broadcast %322 : vector<1x256xi1> to vector<4x256xi1>
    %324 = vector.broadcast %cst_70 : f32 to vector<4x256xf32>
    %325 = arith.select %323, %316, %324 : vector<4x256xi1>, vector<4x256xf32>
    %326 = vector.broadcast %315 : vector<4x1xf32> to vector<4x256xf32>
    %327 = arith.mulf %326, %325 : vector<4x256xf32>
    %328 = arith.addf %313, %327 : vector<4x256xf32>
    %329 = vector.extract_strided_slice %28 {offsets = [22, 0, 0], sizes = [1, 4, 1], strides = [1, 1, 1]} : vector<25x4x1xf32> to vector<1x4x1xf32>
    %330 = vector.shape_cast %329 : vector<1x4x1xf32> to vector<4x1xf32>
    %c224_i32 = arith.constant 224 : i32
    %331 = tpu.dynamic_rotate %27 by %c224_i32 dim 1 : vector<4x256xf32>, i32 -> vector<4x256xf32>
    %cst_71 = arith.constant 1.400000e+01 : f32
    %332 = vector.broadcast %cst_71 : f32 to vector<1x256xf32>
    %333 = arith.cmpf olt, %6, %332 : vector<1x256xf32>
    %cst_72 = arith.constant 0.000000e+00 : f32
    %334 = vector.shape_cast %333 : vector<1x256xi1> to vector<1x256xi1>
    %335 = vector.broadcast %334 : vector<1x256xi1> to vector<4x256xi1>
    %336 = vector.broadcast %cst_72 : f32 to vector<4x256xf32>
    %337 = arith.select %335, %331, %336 : vector<4x256xi1>, vector<4x256xf32>
    %338 = vector.broadcast %330 : vector<4x1xf32> to vector<4x256xf32>
    %339 = arith.mulf %338, %337 : vector<4x256xf32>
    %340 = arith.addf %328, %339 : vector<4x256xf32>
    %341 = vector.extract_strided_slice %28 {offsets = [23, 0, 0], sizes = [1, 4, 1], strides = [1, 1, 1]} : vector<25x4x1xf32> to vector<1x4x1xf32>
    %342 = vector.shape_cast %341 : vector<1x4x1xf32> to vector<4x1xf32>
    %c223_i32 = arith.constant 223 : i32
    %343 = tpu.dynamic_rotate %27 by %c223_i32 dim 1 : vector<4x256xf32>, i32 -> vector<4x256xf32>
    %cst_73 = arith.constant 1.400000e+01 : f32
    %344 = vector.broadcast %cst_73 : f32 to vector<1x256xf32>
    %345 = arith.cmpf olt, %6, %344 : vector<1x256xf32>
    %cst_74 = arith.constant 1.500000e+01 : f32
    %346 = vector.broadcast %cst_74 : f32 to vector<1x256xf32>
    %347 = arith.cmpf olt, %9, %346 : vector<1x256xf32>
    %348 = arith.andi %345, %347 : vector<1x256xi1>
    %cst_75 = arith.constant 0.000000e+00 : f32
    %349 = vector.shape_cast %348 : vector<1x256xi1> to vector<1x256xi1>
    %350 = vector.broadcast %349 : vector<1x256xi1> to vector<4x256xi1>
    %351 = vector.broadcast %cst_75 : f32 to vector<4x256xf32>
    %352 = arith.select %350, %343, %351 : vector<4x256xi1>, vector<4x256xf32>
    %353 = vector.broadcast %342 : vector<4x1xf32> to vector<4x256xf32>
    %354 = arith.mulf %353, %352 : vector<4x256xf32>
    %355 = arith.addf %340, %354 : vector<4x256xf32>
    %356 = vector.extract_strided_slice %28 {offsets = [24, 0, 0], sizes = [1, 4, 1], strides = [1, 1, 1]} : vector<25x4x1xf32> to vector<1x4x1xf32>
    %357 = vector.shape_cast %356 : vector<1x4x1xf32> to vector<4x1xf32>
    %c222_i32 = arith.constant 222 : i32
    %358 = tpu.dynamic_rotate %27 by %c222_i32 dim 1 : vector<4x256xf32>, i32 -> vector<4x256xf32>
    %cst_76 = arith.constant 1.400000e+01 : f32
    %359 = vector.broadcast %cst_76 : f32 to vector<1x256xf32>
    %360 = arith.cmpf olt, %6, %359 : vector<1x256xf32>
    %cst_77 = arith.constant 1.400000e+01 : f32
    %361 = vector.broadcast %cst_77 : f32 to vector<1x256xf32>
    %362 = arith.cmpf olt, %9, %361 : vector<1x256xf32>
    %363 = arith.andi %360, %362 : vector<1x256xi1>
    %cst_78 = arith.constant 0.000000e+00 : f32
    %364 = vector.shape_cast %363 : vector<1x256xi1> to vector<1x256xi1>
    %365 = vector.broadcast %364 : vector<1x256xi1> to vector<4x256xi1>
    %366 = vector.broadcast %cst_78 : f32 to vector<4x256xf32>
    %367 = arith.select %365, %358, %366 : vector<4x256xi1>, vector<4x256xf32>
    %368 = vector.broadcast %357 : vector<4x1xf32> to vector<4x256xf32>
    %369 = arith.mulf %368, %367 : vector<4x256xf32>
    %370 = arith.addf %355, %369 : vector<4x256xf32>
    %c0_79 = arith.constant 0 : index
    %c0_80 = arith.constant 0 : index
    %371 = vector.load %arg5[%c0_79, %c0_80] : memref<4x1xf32, #tpu.memory_space<vmem>>, vector<4x1xf32>
    %372 = vector.broadcast %371 : vector<4x1xf32> to vector<4x256xf32>
    %373 = arith.addf %370, %372 : vector<4x256xf32>
    %cst_81 = arith.constant 0.000000e+00 : f32
    %374 = vector.broadcast %cst_81 : f32 to vector<4x256xf32>
    %375 = arith.maximumf %373, %374 : vector<4x256xf32>
    %376 = math.absf %373 : vector<4x256xf32>
    %cst_82 = arith.constant 0.000000e+00 : f32
    %377 = vector.broadcast %cst_82 : f32 to vector<4x256xf32>
    %378 = arith.subf %377, %376 : vector<4x256xf32>
    %379 = math.exp %378 : vector<4x256xf32>
    %cst_83 = arith.constant 1.000000e+00 : f32
    %380 = vector.broadcast %cst_83 : f32 to vector<4x256xf32>
    %381 = arith.addf %380, %379 : vector<4x256xf32>
    %382 = math.log %381 : vector<4x256xf32>
    %383 = arith.addf %375, %382 : vector<4x256xf32>
    %384 = math.tanh %383 : vector<4x256xf32>
    %385 = arith.mulf %373, %384 : vector<4x256xf32>
    %386 = tpu.concatenate %27, %385 in 0 : vector<4x256xf32>, vector<4x256xf32> -> vector<8x256xf32>
    %c17_i32_84 = arith.constant 17 : i32
    %387 = tpu.dynamic_rotate %386 by %c17_i32_84 dim 1 : vector<8x256xf32>, i32 -> vector<8x256xf32>
    %cst_85 = arith.constant 1.000000e+00 : f32
    %388 = vector.broadcast %cst_85 : f32 to vector<1x256xf32>
    %389 = arith.cmpf oge, %6, %388 : vector<1x256xf32>
    %cst_86 = arith.constant 1.000000e+00 : f32
    %390 = vector.broadcast %cst_86 : f32 to vector<1x256xf32>
    %391 = arith.cmpf oge, %9, %390 : vector<1x256xf32>
    %392 = arith.andi %389, %391 : vector<1x256xi1>
    %cst_87 = arith.constant 0.000000e+00 : f32
    %393 = vector.shape_cast %392 : vector<1x256xi1> to vector<1x256xi1>
    %394 = vector.broadcast %393 : vector<1x256xi1> to vector<8x256xi1>
    %395 = vector.broadcast %cst_87 : f32 to vector<8x256xf32>
    %396 = arith.select %394, %387, %395 : vector<8x256xi1>, vector<8x256xf32>
    %c16_i32_88 = arith.constant 16 : i32
    %397 = tpu.dynamic_rotate %386 by %c16_i32_88 dim 1 : vector<8x256xf32>, i32 -> vector<8x256xf32>
    %cst_89 = arith.constant 1.000000e+00 : f32
    %398 = vector.broadcast %cst_89 : f32 to vector<1x256xf32>
    %399 = arith.cmpf oge, %6, %398 : vector<1x256xf32>
    %cst_90 = arith.constant 0.000000e+00 : f32
    %400 = vector.shape_cast %399 : vector<1x256xi1> to vector<1x256xi1>
    %401 = vector.broadcast %400 : vector<1x256xi1> to vector<8x256xi1>
    %402 = vector.broadcast %cst_90 : f32 to vector<8x256xf32>
    %403 = arith.select %401, %397, %402 : vector<8x256xi1>, vector<8x256xf32>
    %c15_i32_91 = arith.constant 15 : i32
    %404 = tpu.dynamic_rotate %386 by %c15_i32_91 dim 1 : vector<8x256xf32>, i32 -> vector<8x256xf32>
    %cst_92 = arith.constant 1.000000e+00 : f32
    %405 = vector.broadcast %cst_92 : f32 to vector<1x256xf32>
    %406 = arith.cmpf oge, %6, %405 : vector<1x256xf32>
    %cst_93 = arith.constant 1.500000e+01 : f32
    %407 = vector.broadcast %cst_93 : f32 to vector<1x256xf32>
    %408 = arith.cmpf olt, %9, %407 : vector<1x256xf32>
    %409 = arith.andi %406, %408 : vector<1x256xi1>
    %cst_94 = arith.constant 0.000000e+00 : f32
    %410 = vector.shape_cast %409 : vector<1x256xi1> to vector<1x256xi1>
    %411 = vector.broadcast %410 : vector<1x256xi1> to vector<8x256xi1>
    %412 = vector.broadcast %cst_94 : f32 to vector<8x256xf32>
    %413 = arith.select %411, %404, %412 : vector<8x256xi1>, vector<8x256xf32>
    %c1_i32_95 = arith.constant 1 : i32
    %414 = tpu.dynamic_rotate %386 by %c1_i32_95 dim 1 : vector<8x256xf32>, i32 -> vector<8x256xf32>
    %cst_96 = arith.constant 1.000000e+00 : f32
    %415 = vector.broadcast %cst_96 : f32 to vector<1x256xf32>
    %416 = arith.cmpf oge, %9, %415 : vector<1x256xf32>
    %cst_97 = arith.constant 0.000000e+00 : f32
    %417 = vector.shape_cast %416 : vector<1x256xi1> to vector<1x256xi1>
    %418 = vector.broadcast %417 : vector<1x256xi1> to vector<8x256xi1>
    %419 = vector.broadcast %cst_97 : f32 to vector<8x256xf32>
    %420 = arith.select %418, %414, %419 : vector<8x256xi1>, vector<8x256xf32>
    %c255_i32_98 = arith.constant 255 : i32
    %421 = tpu.dynamic_rotate %386 by %c255_i32_98 dim 1 : vector<8x256xf32>, i32 -> vector<8x256xf32>
    %cst_99 = arith.constant 1.500000e+01 : f32
    %422 = vector.broadcast %cst_99 : f32 to vector<1x256xf32>
    %423 = arith.cmpf olt, %9, %422 : vector<1x256xf32>
    %cst_100 = arith.constant 0.000000e+00 : f32
    %424 = vector.shape_cast %423 : vector<1x256xi1> to vector<1x256xi1>
    %425 = vector.broadcast %424 : vector<1x256xi1> to vector<8x256xi1>
    %426 = vector.broadcast %cst_100 : f32 to vector<8x256xf32>
    %427 = arith.select %425, %421, %426 : vector<8x256xi1>, vector<8x256xf32>
    %c241_i32_101 = arith.constant 241 : i32
    %428 = tpu.dynamic_rotate %386 by %c241_i32_101 dim 1 : vector<8x256xf32>, i32 -> vector<8x256xf32>
    %cst_102 = arith.constant 1.500000e+01 : f32
    %429 = vector.broadcast %cst_102 : f32 to vector<1x256xf32>
    %430 = arith.cmpf olt, %6, %429 : vector<1x256xf32>
    %cst_103 = arith.constant 1.000000e+00 : f32
    %431 = vector.broadcast %cst_103 : f32 to vector<1x256xf32>
    %432 = arith.cmpf oge, %9, %431 : vector<1x256xf32>
    %433 = arith.andi %430, %432 : vector<1x256xi1>
    %cst_104 = arith.constant 0.000000e+00 : f32
    %434 = vector.shape_cast %433 : vector<1x256xi1> to vector<1x256xi1>
    %435 = vector.broadcast %434 : vector<1x256xi1> to vector<8x256xi1>
    %436 = vector.broadcast %cst_104 : f32 to vector<8x256xf32>
    %437 = arith.select %435, %428, %436 : vector<8x256xi1>, vector<8x256xf32>
    %c240_i32_105 = arith.constant 240 : i32
    %438 = tpu.dynamic_rotate %386 by %c240_i32_105 dim 1 : vector<8x256xf32>, i32 -> vector<8x256xf32>
    %cst_106 = arith.constant 1.500000e+01 : f32
    %439 = vector.broadcast %cst_106 : f32 to vector<1x256xf32>
    %440 = arith.cmpf olt, %6, %439 : vector<1x256xf32>
    %cst_107 = arith.constant 0.000000e+00 : f32
    %441 = vector.shape_cast %440 : vector<1x256xi1> to vector<1x256xi1>
    %442 = vector.broadcast %441 : vector<1x256xi1> to vector<8x256xi1>
    %443 = vector.broadcast %cst_107 : f32 to vector<8x256xf32>
    %444 = arith.select %442, %438, %443 : vector<8x256xi1>, vector<8x256xf32>
    %c239_i32_108 = arith.constant 239 : i32
    %445 = tpu.dynamic_rotate %386 by %c239_i32_108 dim 1 : vector<8x256xf32>, i32 -> vector<8x256xf32>
    %cst_109 = arith.constant 1.500000e+01 : f32
    %446 = vector.broadcast %cst_109 : f32 to vector<1x256xf32>
    %447 = arith.cmpf olt, %6, %446 : vector<1x256xf32>
    %cst_110 = arith.constant 1.500000e+01 : f32
    %448 = vector.broadcast %cst_110 : f32 to vector<1x256xf32>
    %449 = arith.cmpf olt, %9, %448 : vector<1x256xf32>
    %450 = arith.andi %447, %449 : vector<1x256xi1>
    %cst_111 = arith.constant 0.000000e+00 : f32
    %451 = vector.shape_cast %450 : vector<1x256xi1> to vector<1x256xi1>
    %452 = vector.broadcast %451 : vector<1x256xi1> to vector<8x256xi1>
    %453 = vector.broadcast %cst_111 : f32 to vector<8x256xf32>
    %454 = arith.select %452, %445, %453 : vector<8x256xi1>, vector<8x256xf32>
    %455 = tpu.concatenate %396, %403, %413, %420, %386, %427, %437, %444, %454 in 0 : vector<8x256xf32>, vector<8x256xf32>, vector<8x256xf32>, vector<8x256xf32>, vector<8x256xf32>, vector<8x256xf32>, vector<8x256xf32>, vector<8x256xf32>, vector<8x256xf32> -> vector<72x256xf32>
    %c0_112 = arith.constant 0 : index
    %c0_113 = arith.constant 0 : index
    %456 = vector.load %arg6[%c0_112, %c0_113] : memref<8x72xf32, #tpu.memory_space<vmem>>, vector<8x72xf32>
    %cst_114 = arith.constant dense<0.000000e+00> : vector<8x256xf32>
    %457 = tpu.matmul %456, %455, %cst_114 {dimension_numbers = #tpu.dot_dimension_numbers<[1], [0], [0], [1], [0, 0, 1, 1], [], []>} : vector<8x72xf32>, vector<72x256xf32>, vector<8x256xf32> -> vector<8x256xf32>
    %c0_115 = arith.constant 0 : index
    %c0_116 = arith.constant 0 : index
    %458 = vector.load %arg7[%c0_115, %c0_116] : memref<8x1xf32, #tpu.memory_space<vmem>>, vector<8x1xf32>
    %459 = vector.broadcast %458 : vector<8x1xf32> to vector<8x256xf32>
    %460 = arith.addf %457, %459 : vector<8x256xf32>
    %c0_117 = arith.constant 0 : index
    %c0_118 = arith.constant 0 : index
    %c0_119 = arith.constant 0 : index
    %461 = vector.load %arg8[%c0_117, %c0_118, %c0_119] : memref<25x8x1xf32, #tpu.memory_space<vmem>>, vector<25x8x1xf32>
    %cst_120 = arith.constant 0.000000e+00 : f32
    %462 = vector.broadcast %cst_120 : f32 to vector<8x256xf32>
    %463 = vector.extract_strided_slice %461 {offsets = [0, 0, 0], sizes = [1, 8, 1], strides = [1, 1, 1]} : vector<25x8x1xf32> to vector<1x8x1xf32>
    %464 = vector.shape_cast %463 : vector<1x8x1xf32> to vector<8x1xf32>
    %c34_i32_121 = arith.constant 34 : i32
    %465 = tpu.dynamic_rotate %460 by %c34_i32_121 dim 1 : vector<8x256xf32>, i32 -> vector<8x256xf32>
    %cst_122 = arith.constant 2.000000e+00 : f32
    %466 = vector.broadcast %cst_122 : f32 to vector<1x256xf32>
    %467 = arith.cmpf oge, %6, %466 : vector<1x256xf32>
    %cst_123 = arith.constant 2.000000e+00 : f32
    %468 = vector.broadcast %cst_123 : f32 to vector<1x256xf32>
    %469 = arith.cmpf oge, %9, %468 : vector<1x256xf32>
    %470 = arith.andi %467, %469 : vector<1x256xi1>
    %cst_124 = arith.constant 0.000000e+00 : f32
    %471 = vector.shape_cast %470 : vector<1x256xi1> to vector<1x256xi1>
    %472 = vector.broadcast %471 : vector<1x256xi1> to vector<8x256xi1>
    %473 = vector.broadcast %cst_124 : f32 to vector<8x256xf32>
    %474 = arith.select %472, %465, %473 : vector<8x256xi1>, vector<8x256xf32>
    %475 = vector.broadcast %464 : vector<8x1xf32> to vector<8x256xf32>
    %476 = arith.mulf %475, %474 : vector<8x256xf32>
    %477 = arith.addf %462, %476 : vector<8x256xf32>
    %478 = vector.extract_strided_slice %461 {offsets = [1, 0, 0], sizes = [1, 8, 1], strides = [1, 1, 1]} : vector<25x8x1xf32> to vector<1x8x1xf32>
    %479 = vector.shape_cast %478 : vector<1x8x1xf32> to vector<8x1xf32>
    %c33_i32_125 = arith.constant 33 : i32
    %480 = tpu.dynamic_rotate %460 by %c33_i32_125 dim 1 : vector<8x256xf32>, i32 -> vector<8x256xf32>
    %cst_126 = arith.constant 2.000000e+00 : f32
    %481 = vector.broadcast %cst_126 : f32 to vector<1x256xf32>
    %482 = arith.cmpf oge, %6, %481 : vector<1x256xf32>
    %cst_127 = arith.constant 1.000000e+00 : f32
    %483 = vector.broadcast %cst_127 : f32 to vector<1x256xf32>
    %484 = arith.cmpf oge, %9, %483 : vector<1x256xf32>
    %485 = arith.andi %482, %484 : vector<1x256xi1>
    %cst_128 = arith.constant 0.000000e+00 : f32
    %486 = vector.shape_cast %485 : vector<1x256xi1> to vector<1x256xi1>
    %487 = vector.broadcast %486 : vector<1x256xi1> to vector<8x256xi1>
    %488 = vector.broadcast %cst_128 : f32 to vector<8x256xf32>
    %489 = arith.select %487, %480, %488 : vector<8x256xi1>, vector<8x256xf32>
    %490 = vector.broadcast %479 : vector<8x1xf32> to vector<8x256xf32>
    %491 = arith.mulf %490, %489 : vector<8x256xf32>
    %492 = arith.addf %477, %491 : vector<8x256xf32>
    %493 = vector.extract_strided_slice %461 {offsets = [2, 0, 0], sizes = [1, 8, 1], strides = [1, 1, 1]} : vector<25x8x1xf32> to vector<1x8x1xf32>
    %494 = vector.shape_cast %493 : vector<1x8x1xf32> to vector<8x1xf32>
    %c32_i32_129 = arith.constant 32 : i32
    %495 = tpu.dynamic_rotate %460 by %c32_i32_129 dim 1 : vector<8x256xf32>, i32 -> vector<8x256xf32>
    %cst_130 = arith.constant 2.000000e+00 : f32
    %496 = vector.broadcast %cst_130 : f32 to vector<1x256xf32>
    %497 = arith.cmpf oge, %6, %496 : vector<1x256xf32>
    %cst_131 = arith.constant 0.000000e+00 : f32
    %498 = vector.shape_cast %497 : vector<1x256xi1> to vector<1x256xi1>
    %499 = vector.broadcast %498 : vector<1x256xi1> to vector<8x256xi1>
    %500 = vector.broadcast %cst_131 : f32 to vector<8x256xf32>
    %501 = arith.select %499, %495, %500 : vector<8x256xi1>, vector<8x256xf32>
    %502 = vector.broadcast %494 : vector<8x1xf32> to vector<8x256xf32>
    %503 = arith.mulf %502, %501 : vector<8x256xf32>
    %504 = arith.addf %492, %503 : vector<8x256xf32>
    %505 = vector.extract_strided_slice %461 {offsets = [3, 0, 0], sizes = [1, 8, 1], strides = [1, 1, 1]} : vector<25x8x1xf32> to vector<1x8x1xf32>
    %506 = vector.shape_cast %505 : vector<1x8x1xf32> to vector<8x1xf32>
    %c31_i32_132 = arith.constant 31 : i32
    %507 = tpu.dynamic_rotate %460 by %c31_i32_132 dim 1 : vector<8x256xf32>, i32 -> vector<8x256xf32>
    %cst_133 = arith.constant 2.000000e+00 : f32
    %508 = vector.broadcast %cst_133 : f32 to vector<1x256xf32>
    %509 = arith.cmpf oge, %6, %508 : vector<1x256xf32>
    %cst_134 = arith.constant 1.500000e+01 : f32
    %510 = vector.broadcast %cst_134 : f32 to vector<1x256xf32>
    %511 = arith.cmpf olt, %9, %510 : vector<1x256xf32>
    %512 = arith.andi %509, %511 : vector<1x256xi1>
    %cst_135 = arith.constant 0.000000e+00 : f32
    %513 = vector.shape_cast %512 : vector<1x256xi1> to vector<1x256xi1>
    %514 = vector.broadcast %513 : vector<1x256xi1> to vector<8x256xi1>
    %515 = vector.broadcast %cst_135 : f32 to vector<8x256xf32>
    %516 = arith.select %514, %507, %515 : vector<8x256xi1>, vector<8x256xf32>
    %517 = vector.broadcast %506 : vector<8x1xf32> to vector<8x256xf32>
    %518 = arith.mulf %517, %516 : vector<8x256xf32>
    %519 = arith.addf %504, %518 : vector<8x256xf32>
    %520 = vector.extract_strided_slice %461 {offsets = [4, 0, 0], sizes = [1, 8, 1], strides = [1, 1, 1]} : vector<25x8x1xf32> to vector<1x8x1xf32>
    %521 = vector.shape_cast %520 : vector<1x8x1xf32> to vector<8x1xf32>
    %c30_i32_136 = arith.constant 30 : i32
    %522 = tpu.dynamic_rotate %460 by %c30_i32_136 dim 1 : vector<8x256xf32>, i32 -> vector<8x256xf32>
    %cst_137 = arith.constant 2.000000e+00 : f32
    %523 = vector.broadcast %cst_137 : f32 to vector<1x256xf32>
    %524 = arith.cmpf oge, %6, %523 : vector<1x256xf32>
    %cst_138 = arith.constant 1.400000e+01 : f32
    %525 = vector.broadcast %cst_138 : f32 to vector<1x256xf32>
    %526 = arith.cmpf olt, %9, %525 : vector<1x256xf32>
    %527 = arith.andi %524, %526 : vector<1x256xi1>
    %cst_139 = arith.constant 0.000000e+00 : f32
    %528 = vector.shape_cast %527 : vector<1x256xi1> to vector<1x256xi1>
    %529 = vector.broadcast %528 : vector<1x256xi1> to vector<8x256xi1>
    %530 = vector.broadcast %cst_139 : f32 to vector<8x256xf32>
    %531 = arith.select %529, %522, %530 : vector<8x256xi1>, vector<8x256xf32>
    %532 = vector.broadcast %521 : vector<8x1xf32> to vector<8x256xf32>
    %533 = arith.mulf %532, %531 : vector<8x256xf32>
    %534 = arith.addf %519, %533 : vector<8x256xf32>
    %535 = vector.extract_strided_slice %461 {offsets = [5, 0, 0], sizes = [1, 8, 1], strides = [1, 1, 1]} : vector<25x8x1xf32> to vector<1x8x1xf32>
    %536 = vector.shape_cast %535 : vector<1x8x1xf32> to vector<8x1xf32>
    %c18_i32_140 = arith.constant 18 : i32
    %537 = tpu.dynamic_rotate %460 by %c18_i32_140 dim 1 : vector<8x256xf32>, i32 -> vector<8x256xf32>
    %cst_141 = arith.constant 1.000000e+00 : f32
    %538 = vector.broadcast %cst_141 : f32 to vector<1x256xf32>
    %539 = arith.cmpf oge, %6, %538 : vector<1x256xf32>
    %cst_142 = arith.constant 2.000000e+00 : f32
    %540 = vector.broadcast %cst_142 : f32 to vector<1x256xf32>
    %541 = arith.cmpf oge, %9, %540 : vector<1x256xf32>
    %542 = arith.andi %539, %541 : vector<1x256xi1>
    %cst_143 = arith.constant 0.000000e+00 : f32
    %543 = vector.shape_cast %542 : vector<1x256xi1> to vector<1x256xi1>
    %544 = vector.broadcast %543 : vector<1x256xi1> to vector<8x256xi1>
    %545 = vector.broadcast %cst_143 : f32 to vector<8x256xf32>
    %546 = arith.select %544, %537, %545 : vector<8x256xi1>, vector<8x256xf32>
    %547 = vector.broadcast %536 : vector<8x1xf32> to vector<8x256xf32>
    %548 = arith.mulf %547, %546 : vector<8x256xf32>
    %549 = arith.addf %534, %548 : vector<8x256xf32>
    %550 = vector.extract_strided_slice %461 {offsets = [6, 0, 0], sizes = [1, 8, 1], strides = [1, 1, 1]} : vector<25x8x1xf32> to vector<1x8x1xf32>
    %551 = vector.shape_cast %550 : vector<1x8x1xf32> to vector<8x1xf32>
    %c17_i32_144 = arith.constant 17 : i32
    %552 = tpu.dynamic_rotate %460 by %c17_i32_144 dim 1 : vector<8x256xf32>, i32 -> vector<8x256xf32>
    %cst_145 = arith.constant 1.000000e+00 : f32
    %553 = vector.broadcast %cst_145 : f32 to vector<1x256xf32>
    %554 = arith.cmpf oge, %6, %553 : vector<1x256xf32>
    %cst_146 = arith.constant 1.000000e+00 : f32
    %555 = vector.broadcast %cst_146 : f32 to vector<1x256xf32>
    %556 = arith.cmpf oge, %9, %555 : vector<1x256xf32>
    %557 = arith.andi %554, %556 : vector<1x256xi1>
    %cst_147 = arith.constant 0.000000e+00 : f32
    %558 = vector.shape_cast %557 : vector<1x256xi1> to vector<1x256xi1>
    %559 = vector.broadcast %558 : vector<1x256xi1> to vector<8x256xi1>
    %560 = vector.broadcast %cst_147 : f32 to vector<8x256xf32>
    %561 = arith.select %559, %552, %560 : vector<8x256xi1>, vector<8x256xf32>
    %562 = vector.broadcast %551 : vector<8x1xf32> to vector<8x256xf32>
    %563 = arith.mulf %562, %561 : vector<8x256xf32>
    %564 = arith.addf %549, %563 : vector<8x256xf32>
    %565 = vector.extract_strided_slice %461 {offsets = [7, 0, 0], sizes = [1, 8, 1], strides = [1, 1, 1]} : vector<25x8x1xf32> to vector<1x8x1xf32>
    %566 = vector.shape_cast %565 : vector<1x8x1xf32> to vector<8x1xf32>
    %c16_i32_148 = arith.constant 16 : i32
    %567 = tpu.dynamic_rotate %460 by %c16_i32_148 dim 1 : vector<8x256xf32>, i32 -> vector<8x256xf32>
    %cst_149 = arith.constant 1.000000e+00 : f32
    %568 = vector.broadcast %cst_149 : f32 to vector<1x256xf32>
    %569 = arith.cmpf oge, %6, %568 : vector<1x256xf32>
    %cst_150 = arith.constant 0.000000e+00 : f32
    %570 = vector.shape_cast %569 : vector<1x256xi1> to vector<1x256xi1>
    %571 = vector.broadcast %570 : vector<1x256xi1> to vector<8x256xi1>
    %572 = vector.broadcast %cst_150 : f32 to vector<8x256xf32>
    %573 = arith.select %571, %567, %572 : vector<8x256xi1>, vector<8x256xf32>
    %574 = vector.broadcast %566 : vector<8x1xf32> to vector<8x256xf32>
    %575 = arith.mulf %574, %573 : vector<8x256xf32>
    %576 = arith.addf %564, %575 : vector<8x256xf32>
    %577 = vector.extract_strided_slice %461 {offsets = [8, 0, 0], sizes = [1, 8, 1], strides = [1, 1, 1]} : vector<25x8x1xf32> to vector<1x8x1xf32>
    %578 = vector.shape_cast %577 : vector<1x8x1xf32> to vector<8x1xf32>
    %c15_i32_151 = arith.constant 15 : i32
    %579 = tpu.dynamic_rotate %460 by %c15_i32_151 dim 1 : vector<8x256xf32>, i32 -> vector<8x256xf32>
    %cst_152 = arith.constant 1.000000e+00 : f32
    %580 = vector.broadcast %cst_152 : f32 to vector<1x256xf32>
    %581 = arith.cmpf oge, %6, %580 : vector<1x256xf32>
    %cst_153 = arith.constant 1.500000e+01 : f32
    %582 = vector.broadcast %cst_153 : f32 to vector<1x256xf32>
    %583 = arith.cmpf olt, %9, %582 : vector<1x256xf32>
    %584 = arith.andi %581, %583 : vector<1x256xi1>
    %cst_154 = arith.constant 0.000000e+00 : f32
    %585 = vector.shape_cast %584 : vector<1x256xi1> to vector<1x256xi1>
    %586 = vector.broadcast %585 : vector<1x256xi1> to vector<8x256xi1>
    %587 = vector.broadcast %cst_154 : f32 to vector<8x256xf32>
    %588 = arith.select %586, %579, %587 : vector<8x256xi1>, vector<8x256xf32>
    %589 = vector.broadcast %578 : vector<8x1xf32> to vector<8x256xf32>
    %590 = arith.mulf %589, %588 : vector<8x256xf32>
    %591 = arith.addf %576, %590 : vector<8x256xf32>
    %592 = vector.extract_strided_slice %461 {offsets = [9, 0, 0], sizes = [1, 8, 1], strides = [1, 1, 1]} : vector<25x8x1xf32> to vector<1x8x1xf32>
    %593 = vector.shape_cast %592 : vector<1x8x1xf32> to vector<8x1xf32>
    %c14_i32_155 = arith.constant 14 : i32
    %594 = tpu.dynamic_rotate %460 by %c14_i32_155 dim 1 : vector<8x256xf32>, i32 -> vector<8x256xf32>
    %cst_156 = arith.constant 1.000000e+00 : f32
    %595 = vector.broadcast %cst_156 : f32 to vector<1x256xf32>
    %596 = arith.cmpf oge, %6, %595 : vector<1x256xf32>
    %cst_157 = arith.constant 1.400000e+01 : f32
    %597 = vector.broadcast %cst_157 : f32 to vector<1x256xf32>
    %598 = arith.cmpf olt, %9, %597 : vector<1x256xf32>
    %599 = arith.andi %596, %598 : vector<1x256xi1>
    %cst_158 = arith.constant 0.000000e+00 : f32
    %600 = vector.shape_cast %599 : vector<1x256xi1> to vector<1x256xi1>
    %601 = vector.broadcast %600 : vector<1x256xi1> to vector<8x256xi1>
    %602 = vector.broadcast %cst_158 : f32 to vector<8x256xf32>
    %603 = arith.select %601, %594, %602 : vector<8x256xi1>, vector<8x256xf32>
    %604 = vector.broadcast %593 : vector<8x1xf32> to vector<8x256xf32>
    %605 = arith.mulf %604, %603 : vector<8x256xf32>
    %606 = arith.addf %591, %605 : vector<8x256xf32>
    %607 = vector.extract_strided_slice %461 {offsets = [10, 0, 0], sizes = [1, 8, 1], strides = [1, 1, 1]} : vector<25x8x1xf32> to vector<1x8x1xf32>
    %608 = vector.shape_cast %607 : vector<1x8x1xf32> to vector<8x1xf32>
    %c2_i32_159 = arith.constant 2 : i32
    %609 = tpu.dynamic_rotate %460 by %c2_i32_159 dim 1 : vector<8x256xf32>, i32 -> vector<8x256xf32>
    %cst_160 = arith.constant 2.000000e+00 : f32
    %610 = vector.broadcast %cst_160 : f32 to vector<1x256xf32>
    %611 = arith.cmpf oge, %9, %610 : vector<1x256xf32>
    %cst_161 = arith.constant 0.000000e+00 : f32
    %612 = vector.shape_cast %611 : vector<1x256xi1> to vector<1x256xi1>
    %613 = vector.broadcast %612 : vector<1x256xi1> to vector<8x256xi1>
    %614 = vector.broadcast %cst_161 : f32 to vector<8x256xf32>
    %615 = arith.select %613, %609, %614 : vector<8x256xi1>, vector<8x256xf32>
    %616 = vector.broadcast %608 : vector<8x1xf32> to vector<8x256xf32>
    %617 = arith.mulf %616, %615 : vector<8x256xf32>
    %618 = arith.addf %606, %617 : vector<8x256xf32>
    %619 = vector.extract_strided_slice %461 {offsets = [11, 0, 0], sizes = [1, 8, 1], strides = [1, 1, 1]} : vector<25x8x1xf32> to vector<1x8x1xf32>
    %620 = vector.shape_cast %619 : vector<1x8x1xf32> to vector<8x1xf32>
    %c1_i32_162 = arith.constant 1 : i32
    %621 = tpu.dynamic_rotate %460 by %c1_i32_162 dim 1 : vector<8x256xf32>, i32 -> vector<8x256xf32>
    %cst_163 = arith.constant 1.000000e+00 : f32
    %622 = vector.broadcast %cst_163 : f32 to vector<1x256xf32>
    %623 = arith.cmpf oge, %9, %622 : vector<1x256xf32>
    %cst_164 = arith.constant 0.000000e+00 : f32
    %624 = vector.shape_cast %623 : vector<1x256xi1> to vector<1x256xi1>
    %625 = vector.broadcast %624 : vector<1x256xi1> to vector<8x256xi1>
    %626 = vector.broadcast %cst_164 : f32 to vector<8x256xf32>
    %627 = arith.select %625, %621, %626 : vector<8x256xi1>, vector<8x256xf32>
    %628 = vector.broadcast %620 : vector<8x1xf32> to vector<8x256xf32>
    %629 = arith.mulf %628, %627 : vector<8x256xf32>
    %630 = arith.addf %618, %629 : vector<8x256xf32>
    %631 = vector.extract_strided_slice %461 {offsets = [12, 0, 0], sizes = [1, 8, 1], strides = [1, 1, 1]} : vector<25x8x1xf32> to vector<1x8x1xf32>
    %632 = vector.shape_cast %631 : vector<1x8x1xf32> to vector<8x1xf32>
    %633 = vector.broadcast %632 : vector<8x1xf32> to vector<8x256xf32>
    %634 = arith.mulf %633, %460 : vector<8x256xf32>
    %635 = arith.addf %630, %634 : vector<8x256xf32>
    %636 = vector.extract_strided_slice %461 {offsets = [13, 0, 0], sizes = [1, 8, 1], strides = [1, 1, 1]} : vector<25x8x1xf32> to vector<1x8x1xf32>
    %637 = vector.shape_cast %636 : vector<1x8x1xf32> to vector<8x1xf32>
    %c255_i32_165 = arith.constant 255 : i32
    %638 = tpu.dynamic_rotate %460 by %c255_i32_165 dim 1 : vector<8x256xf32>, i32 -> vector<8x256xf32>
    %cst_166 = arith.constant 1.500000e+01 : f32
    %639 = vector.broadcast %cst_166 : f32 to vector<1x256xf32>
    %640 = arith.cmpf olt, %9, %639 : vector<1x256xf32>
    %cst_167 = arith.constant 0.000000e+00 : f32
    %641 = vector.shape_cast %640 : vector<1x256xi1> to vector<1x256xi1>
    %642 = vector.broadcast %641 : vector<1x256xi1> to vector<8x256xi1>
    %643 = vector.broadcast %cst_167 : f32 to vector<8x256xf32>
    %644 = arith.select %642, %638, %643 : vector<8x256xi1>, vector<8x256xf32>
    %645 = vector.broadcast %637 : vector<8x1xf32> to vector<8x256xf32>
    %646 = arith.mulf %645, %644 : vector<8x256xf32>
    %647 = arith.addf %635, %646 : vector<8x256xf32>
    %648 = vector.extract_strided_slice %461 {offsets = [14, 0, 0], sizes = [1, 8, 1], strides = [1, 1, 1]} : vector<25x8x1xf32> to vector<1x8x1xf32>
    %649 = vector.shape_cast %648 : vector<1x8x1xf32> to vector<8x1xf32>
    %c254_i32_168 = arith.constant 254 : i32
    %650 = tpu.dynamic_rotate %460 by %c254_i32_168 dim 1 : vector<8x256xf32>, i32 -> vector<8x256xf32>
    %cst_169 = arith.constant 1.400000e+01 : f32
    %651 = vector.broadcast %cst_169 : f32 to vector<1x256xf32>
    %652 = arith.cmpf olt, %9, %651 : vector<1x256xf32>
    %cst_170 = arith.constant 0.000000e+00 : f32
    %653 = vector.shape_cast %652 : vector<1x256xi1> to vector<1x256xi1>
    %654 = vector.broadcast %653 : vector<1x256xi1> to vector<8x256xi1>
    %655 = vector.broadcast %cst_170 : f32 to vector<8x256xf32>
    %656 = arith.select %654, %650, %655 : vector<8x256xi1>, vector<8x256xf32>
    %657 = vector.broadcast %649 : vector<8x1xf32> to vector<8x256xf32>
    %658 = arith.mulf %657, %656 : vector<8x256xf32>
    %659 = arith.addf %647, %658 : vector<8x256xf32>
    %660 = vector.extract_strided_slice %461 {offsets = [15, 0, 0], sizes = [1, 8, 1], strides = [1, 1, 1]} : vector<25x8x1xf32> to vector<1x8x1xf32>
    %661 = vector.shape_cast %660 : vector<1x8x1xf32> to vector<8x1xf32>
    %c242_i32_171 = arith.constant 242 : i32
    %662 = tpu.dynamic_rotate %460 by %c242_i32_171 dim 1 : vector<8x256xf32>, i32 -> vector<8x256xf32>
    %cst_172 = arith.constant 1.500000e+01 : f32
    %663 = vector.broadcast %cst_172 : f32 to vector<1x256xf32>
    %664 = arith.cmpf olt, %6, %663 : vector<1x256xf32>
    %cst_173 = arith.constant 2.000000e+00 : f32
    %665 = vector.broadcast %cst_173 : f32 to vector<1x256xf32>
    %666 = arith.cmpf oge, %9, %665 : vector<1x256xf32>
    %667 = arith.andi %664, %666 : vector<1x256xi1>
    %cst_174 = arith.constant 0.000000e+00 : f32
    %668 = vector.shape_cast %667 : vector<1x256xi1> to vector<1x256xi1>
    %669 = vector.broadcast %668 : vector<1x256xi1> to vector<8x256xi1>
    %670 = vector.broadcast %cst_174 : f32 to vector<8x256xf32>
    %671 = arith.select %669, %662, %670 : vector<8x256xi1>, vector<8x256xf32>
    %672 = vector.broadcast %661 : vector<8x1xf32> to vector<8x256xf32>
    %673 = arith.mulf %672, %671 : vector<8x256xf32>
    %674 = arith.addf %659, %673 : vector<8x256xf32>
    %675 = vector.extract_strided_slice %461 {offsets = [16, 0, 0], sizes = [1, 8, 1], strides = [1, 1, 1]} : vector<25x8x1xf32> to vector<1x8x1xf32>
    %676 = vector.shape_cast %675 : vector<1x8x1xf32> to vector<8x1xf32>
    %c241_i32_175 = arith.constant 241 : i32
    %677 = tpu.dynamic_rotate %460 by %c241_i32_175 dim 1 : vector<8x256xf32>, i32 -> vector<8x256xf32>
    %cst_176 = arith.constant 1.500000e+01 : f32
    %678 = vector.broadcast %cst_176 : f32 to vector<1x256xf32>
    %679 = arith.cmpf olt, %6, %678 : vector<1x256xf32>
    %cst_177 = arith.constant 1.000000e+00 : f32
    %680 = vector.broadcast %cst_177 : f32 to vector<1x256xf32>
    %681 = arith.cmpf oge, %9, %680 : vector<1x256xf32>
    %682 = arith.andi %679, %681 : vector<1x256xi1>
    %cst_178 = arith.constant 0.000000e+00 : f32
    %683 = vector.shape_cast %682 : vector<1x256xi1> to vector<1x256xi1>
    %684 = vector.broadcast %683 : vector<1x256xi1> to vector<8x256xi1>
    %685 = vector.broadcast %cst_178 : f32 to vector<8x256xf32>
    %686 = arith.select %684, %677, %685 : vector<8x256xi1>, vector<8x256xf32>
    %687 = vector.broadcast %676 : vector<8x1xf32> to vector<8x256xf32>
    %688 = arith.mulf %687, %686 : vector<8x256xf32>
    %689 = arith.addf %674, %688 : vector<8x256xf32>
    %690 = vector.extract_strided_slice %461 {offsets = [17, 0, 0], sizes = [1, 8, 1], strides = [1, 1, 1]} : vector<25x8x1xf32> to vector<1x8x1xf32>
    %691 = vector.shape_cast %690 : vector<1x8x1xf32> to vector<8x1xf32>
    %c240_i32_179 = arith.constant 240 : i32
    %692 = tpu.dynamic_rotate %460 by %c240_i32_179 dim 1 : vector<8x256xf32>, i32 -> vector<8x256xf32>
    %cst_180 = arith.constant 1.500000e+01 : f32
    %693 = vector.broadcast %cst_180 : f32 to vector<1x256xf32>
    %694 = arith.cmpf olt, %6, %693 : vector<1x256xf32>
    %cst_181 = arith.constant 0.000000e+00 : f32
    %695 = vector.shape_cast %694 : vector<1x256xi1> to vector<1x256xi1>
    %696 = vector.broadcast %695 : vector<1x256xi1> to vector<8x256xi1>
    %697 = vector.broadcast %cst_181 : f32 to vector<8x256xf32>
    %698 = arith.select %696, %692, %697 : vector<8x256xi1>, vector<8x256xf32>
    %699 = vector.broadcast %691 : vector<8x1xf32> to vector<8x256xf32>
    %700 = arith.mulf %699, %698 : vector<8x256xf32>
    %701 = arith.addf %689, %700 : vector<8x256xf32>
    %702 = vector.extract_strided_slice %461 {offsets = [18, 0, 0], sizes = [1, 8, 1], strides = [1, 1, 1]} : vector<25x8x1xf32> to vector<1x8x1xf32>
    %703 = vector.shape_cast %702 : vector<1x8x1xf32> to vector<8x1xf32>
    %c239_i32_182 = arith.constant 239 : i32
    %704 = tpu.dynamic_rotate %460 by %c239_i32_182 dim 1 : vector<8x256xf32>, i32 -> vector<8x256xf32>
    %cst_183 = arith.constant 1.500000e+01 : f32
    %705 = vector.broadcast %cst_183 : f32 to vector<1x256xf32>
    %706 = arith.cmpf olt, %6, %705 : vector<1x256xf32>
    %cst_184 = arith.constant 1.500000e+01 : f32
    %707 = vector.broadcast %cst_184 : f32 to vector<1x256xf32>
    %708 = arith.cmpf olt, %9, %707 : vector<1x256xf32>
    %709 = arith.andi %706, %708 : vector<1x256xi1>
    %cst_185 = arith.constant 0.000000e+00 : f32
    %710 = vector.shape_cast %709 : vector<1x256xi1> to vector<1x256xi1>
    %711 = vector.broadcast %710 : vector<1x256xi1> to vector<8x256xi1>
    %712 = vector.broadcast %cst_185 : f32 to vector<8x256xf32>
    %713 = arith.select %711, %704, %712 : vector<8x256xi1>, vector<8x256xf32>
    %714 = vector.broadcast %703 : vector<8x1xf32> to vector<8x256xf32>
    %715 = arith.mulf %714, %713 : vector<8x256xf32>
    %716 = arith.addf %701, %715 : vector<8x256xf32>
    %717 = vector.extract_strided_slice %461 {offsets = [19, 0, 0], sizes = [1, 8, 1], strides = [1, 1, 1]} : vector<25x8x1xf32> to vector<1x8x1xf32>
    %718 = vector.shape_cast %717 : vector<1x8x1xf32> to vector<8x1xf32>
    %c238_i32_186 = arith.constant 238 : i32
    %719 = tpu.dynamic_rotate %460 by %c238_i32_186 dim 1 : vector<8x256xf32>, i32 -> vector<8x256xf32>
    %cst_187 = arith.constant 1.500000e+01 : f32
    %720 = vector.broadcast %cst_187 : f32 to vector<1x256xf32>
    %721 = arith.cmpf olt, %6, %720 : vector<1x256xf32>
    %cst_188 = arith.constant 1.400000e+01 : f32
    %722 = vector.broadcast %cst_188 : f32 to vector<1x256xf32>
    %723 = arith.cmpf olt, %9, %722 : vector<1x256xf32>
    %724 = arith.andi %721, %723 : vector<1x256xi1>
    %cst_189 = arith.constant 0.000000e+00 : f32
    %725 = vector.shape_cast %724 : vector<1x256xi1> to vector<1x256xi1>
    %726 = vector.broadcast %725 : vector<1x256xi1> to vector<8x256xi1>
    %727 = vector.broadcast %cst_189 : f32 to vector<8x256xf32>
    %728 = arith.select %726, %719, %727 : vector<8x256xi1>, vector<8x256xf32>
    %729 = vector.broadcast %718 : vector<8x1xf32> to vector<8x256xf32>
    %730 = arith.mulf %729, %728 : vector<8x256xf32>
    %731 = arith.addf %716, %730 : vector<8x256xf32>
    %732 = vector.extract_strided_slice %461 {offsets = [20, 0, 0], sizes = [1, 8, 1], strides = [1, 1, 1]} : vector<25x8x1xf32> to vector<1x8x1xf32>
    %733 = vector.shape_cast %732 : vector<1x8x1xf32> to vector<8x1xf32>
    %c226_i32_190 = arith.constant 226 : i32
    %734 = tpu.dynamic_rotate %460 by %c226_i32_190 dim 1 : vector<8x256xf32>, i32 -> vector<8x256xf32>
    %cst_191 = arith.constant 1.400000e+01 : f32
    %735 = vector.broadcast %cst_191 : f32 to vector<1x256xf32>
    %736 = arith.cmpf olt, %6, %735 : vector<1x256xf32>
    %cst_192 = arith.constant 2.000000e+00 : f32
    %737 = vector.broadcast %cst_192 : f32 to vector<1x256xf32>
    %738 = arith.cmpf oge, %9, %737 : vector<1x256xf32>
    %739 = arith.andi %736, %738 : vector<1x256xi1>
    %cst_193 = arith.constant 0.000000e+00 : f32
    %740 = vector.shape_cast %739 : vector<1x256xi1> to vector<1x256xi1>
    %741 = vector.broadcast %740 : vector<1x256xi1> to vector<8x256xi1>
    %742 = vector.broadcast %cst_193 : f32 to vector<8x256xf32>
    %743 = arith.select %741, %734, %742 : vector<8x256xi1>, vector<8x256xf32>
    %744 = vector.broadcast %733 : vector<8x1xf32> to vector<8x256xf32>
    %745 = arith.mulf %744, %743 : vector<8x256xf32>
    %746 = arith.addf %731, %745 : vector<8x256xf32>
    %747 = vector.extract_strided_slice %461 {offsets = [21, 0, 0], sizes = [1, 8, 1], strides = [1, 1, 1]} : vector<25x8x1xf32> to vector<1x8x1xf32>
    %748 = vector.shape_cast %747 : vector<1x8x1xf32> to vector<8x1xf32>
    %c225_i32_194 = arith.constant 225 : i32
    %749 = tpu.dynamic_rotate %460 by %c225_i32_194 dim 1 : vector<8x256xf32>, i32 -> vector<8x256xf32>
    %cst_195 = arith.constant 1.400000e+01 : f32
    %750 = vector.broadcast %cst_195 : f32 to vector<1x256xf32>
    %751 = arith.cmpf olt, %6, %750 : vector<1x256xf32>
    %cst_196 = arith.constant 1.000000e+00 : f32
    %752 = vector.broadcast %cst_196 : f32 to vector<1x256xf32>
    %753 = arith.cmpf oge, %9, %752 : vector<1x256xf32>
    %754 = arith.andi %751, %753 : vector<1x256xi1>
    %cst_197 = arith.constant 0.000000e+00 : f32
    %755 = vector.shape_cast %754 : vector<1x256xi1> to vector<1x256xi1>
    %756 = vector.broadcast %755 : vector<1x256xi1> to vector<8x256xi1>
    %757 = vector.broadcast %cst_197 : f32 to vector<8x256xf32>
    %758 = arith.select %756, %749, %757 : vector<8x256xi1>, vector<8x256xf32>
    %759 = vector.broadcast %748 : vector<8x1xf32> to vector<8x256xf32>
    %760 = arith.mulf %759, %758 : vector<8x256xf32>
    %761 = arith.addf %746, %760 : vector<8x256xf32>
    %762 = vector.extract_strided_slice %461 {offsets = [22, 0, 0], sizes = [1, 8, 1], strides = [1, 1, 1]} : vector<25x8x1xf32> to vector<1x8x1xf32>
    %763 = vector.shape_cast %762 : vector<1x8x1xf32> to vector<8x1xf32>
    %c224_i32_198 = arith.constant 224 : i32
    %764 = tpu.dynamic_rotate %460 by %c224_i32_198 dim 1 : vector<8x256xf32>, i32 -> vector<8x256xf32>
    %cst_199 = arith.constant 1.400000e+01 : f32
    %765 = vector.broadcast %cst_199 : f32 to vector<1x256xf32>
    %766 = arith.cmpf olt, %6, %765 : vector<1x256xf32>
    %cst_200 = arith.constant 0.000000e+00 : f32
    %767 = vector.shape_cast %766 : vector<1x256xi1> to vector<1x256xi1>
    %768 = vector.broadcast %767 : vector<1x256xi1> to vector<8x256xi1>
    %769 = vector.broadcast %cst_200 : f32 to vector<8x256xf32>
    %770 = arith.select %768, %764, %769 : vector<8x256xi1>, vector<8x256xf32>
    %771 = vector.broadcast %763 : vector<8x1xf32> to vector<8x256xf32>
    %772 = arith.mulf %771, %770 : vector<8x256xf32>
    %773 = arith.addf %761, %772 : vector<8x256xf32>
    %774 = vector.extract_strided_slice %461 {offsets = [23, 0, 0], sizes = [1, 8, 1], strides = [1, 1, 1]} : vector<25x8x1xf32> to vector<1x8x1xf32>
    %775 = vector.shape_cast %774 : vector<1x8x1xf32> to vector<8x1xf32>
    %c223_i32_201 = arith.constant 223 : i32
    %776 = tpu.dynamic_rotate %460 by %c223_i32_201 dim 1 : vector<8x256xf32>, i32 -> vector<8x256xf32>
    %cst_202 = arith.constant 1.400000e+01 : f32
    %777 = vector.broadcast %cst_202 : f32 to vector<1x256xf32>
    %778 = arith.cmpf olt, %6, %777 : vector<1x256xf32>
    %cst_203 = arith.constant 1.500000e+01 : f32
    %779 = vector.broadcast %cst_203 : f32 to vector<1x256xf32>
    %780 = arith.cmpf olt, %9, %779 : vector<1x256xf32>
    %781 = arith.andi %778, %780 : vector<1x256xi1>
    %cst_204 = arith.constant 0.000000e+00 : f32
    %782 = vector.shape_cast %781 : vector<1x256xi1> to vector<1x256xi1>
    %783 = vector.broadcast %782 : vector<1x256xi1> to vector<8x256xi1>
    %784 = vector.broadcast %cst_204 : f32 to vector<8x256xf32>
    %785 = arith.select %783, %776, %784 : vector<8x256xi1>, vector<8x256xf32>
    %786 = vector.broadcast %775 : vector<8x1xf32> to vector<8x256xf32>
    %787 = arith.mulf %786, %785 : vector<8x256xf32>
    %788 = arith.addf %773, %787 : vector<8x256xf32>
    %789 = vector.extract_strided_slice %461 {offsets = [24, 0, 0], sizes = [1, 8, 1], strides = [1, 1, 1]} : vector<25x8x1xf32> to vector<1x8x1xf32>
    %790 = vector.shape_cast %789 : vector<1x8x1xf32> to vector<8x1xf32>
    %c222_i32_205 = arith.constant 222 : i32
    %791 = tpu.dynamic_rotate %460 by %c222_i32_205 dim 1 : vector<8x256xf32>, i32 -> vector<8x256xf32>
    %cst_206 = arith.constant 1.400000e+01 : f32
    %792 = vector.broadcast %cst_206 : f32 to vector<1x256xf32>
    %793 = arith.cmpf olt, %6, %792 : vector<1x256xf32>
    %cst_207 = arith.constant 1.400000e+01 : f32
    %794 = vector.broadcast %cst_207 : f32 to vector<1x256xf32>
    %795 = arith.cmpf olt, %9, %794 : vector<1x256xf32>
    %796 = arith.andi %793, %795 : vector<1x256xi1>
    %cst_208 = arith.constant 0.000000e+00 : f32
    %797 = vector.shape_cast %796 : vector<1x256xi1> to vector<1x256xi1>
    %798 = vector.broadcast %797 : vector<1x256xi1> to vector<8x256xi1>
    %799 = vector.broadcast %cst_208 : f32 to vector<8x256xf32>
    %800 = arith.select %798, %791, %799 : vector<8x256xi1>, vector<8x256xf32>
    %801 = vector.broadcast %790 : vector<8x1xf32> to vector<8x256xf32>
    %802 = arith.mulf %801, %800 : vector<8x256xf32>
    %803 = arith.addf %788, %802 : vector<8x256xf32>
    %c0_209 = arith.constant 0 : index
    %c0_210 = arith.constant 0 : index
    %804 = vector.load %arg9[%c0_209, %c0_210] : memref<8x1xf32, #tpu.memory_space<vmem>>, vector<8x1xf32>
    %805 = vector.broadcast %804 : vector<8x1xf32> to vector<8x256xf32>
    %806 = arith.addf %803, %805 : vector<8x256xf32>
    %c0_211 = arith.constant 0 : index
    %c0_212 = arith.constant 0 : index
    %807 = vector.load %arg10[%c0_211, %c0_212] : memref<16x16xf32, #tpu.memory_space<vmem>>, vector<16x16xf32>
    %cst_213 = arith.constant dense<0.000000e+00> : vector<16x256xf32>
    %808 = tpu.matmul %807, %1, %cst_213 {dimension_numbers = #tpu.dot_dimension_numbers<[1], [0], [0], [1], [0, 0, 1, 1], [], []>} : vector<16x16xf32>, vector<16x256xf32>, vector<16x256xf32> -> vector<16x256xf32>
    %c0_214 = arith.constant 0 : index
    %c0_215 = arith.constant 0 : index
    %809 = vector.load %arg11[%c0_214, %c0_215] : memref<16x1xf32, #tpu.memory_space<vmem>>, vector<16x1xf32>
    %810 = vector.broadcast %809 : vector<16x1xf32> to vector<16x256xf32>
    %811 = arith.addf %808, %810 : vector<16x256xf32>
    %812 = vector.extract_strided_slice %460 {offsets = [0, 0], sizes = [4, 256], strides = [1, 1]} : vector<8x256xf32> to vector<4x256xf32>
    %813 = vector.extract_strided_slice %806 {offsets = [0, 0], sizes = [4, 256], strides = [1, 1]} : vector<8x256xf32> to vector<4x256xf32>
    %814 = vector.extract_strided_slice %460 {offsets = [4, 0], sizes = [4, 256], strides = [1, 1]} : vector<8x256xf32> to vector<4x256xf32>
    %815 = vector.extract_strided_slice %806 {offsets = [4, 0], sizes = [4, 256], strides = [1, 1]} : vector<8x256xf32> to vector<4x256xf32>
    %816 = tpu.concatenate %812, %813, %814, %815 in 0 : vector<4x256xf32>, vector<4x256xf32>, vector<4x256xf32>, vector<4x256xf32> -> vector<16x256xf32>
    %817 = arith.addf %816, %811 : vector<16x256xf32>
    %c0_216 = arith.constant 0 : index
    %c0_217 = arith.constant 0 : index
    %c0_218 = arith.constant 0 : index
    %818 = vector.load %arg12[%c0_216, %c0_217, %c0_218] : memref<1x16x256xf32, #tpu.memory_space<vmem>>, vector<1x16x256xf32>
    %819 = vector.shape_cast %818 : vector<1x16x256xf32> to vector<16x256xf32>
    %820 = vector.shape_cast %817 : vector<16x256xf32> to vector<1x16x256xf32>
    tpu.vector_store %arg12[%c0_216, %c0_217, %c0_218], %820 {strides = array<i32>} : memref<1x16x256xf32, #tpu.memory_space<vmem>>, vector<1x16x256xf32>,
    return
  }
  func.func @transform_0(%arg0: i32) -> (i32, i32, i32) {
    %c0_i32 = arith.constant 0 : i32
    %c0_i32_0 = arith.constant 0 : i32
    %c0_i32_1 = arith.constant 0 : i32
    return %arg0, %c0_i32, %c0_i32_0 : i32, i32, i32
  }
  func.func @transform_1(%arg0: i32) -> (i32, i32) {
    %c0_i32 = arith.constant 0 : i32
    %c0_i32_0 = arith.constant 0 : i32
    %c0_i32_1 = arith.constant 0 : i32
    return %c0_i32, %c0_i32_0 : i32, i32
  }
  func.func @transform_2(%arg0: i32) -> (i32, i32) {
    %c0_i32 = arith.constant 0 : i32
    %c0_i32_0 = arith.constant 0 : i32
    %c0_i32_1 = arith.constant 0 : i32
    return %c0_i32, %c0_i32_0 : i32, i32
  }
  func.func @transform_3(%arg0: i32) -> (i32, i32, i32) {
    %c0_i32 = arith.constant 0 : i32
    %c0_i32_0 = arith.constant 0 : i32
    %c0_i32_1 = arith.constant 0 : i32
    %c0_i32_2 = arith.constant 0 : i32
    return %c0_i32, %c0_i32_0, %c0_i32_1 : i32, i32, i32
  }
  func.func @transform_4(%arg0: i32) -> (i32, i32) {
    %c0_i32 = arith.constant 0 : i32
    %c0_i32_0 = arith.constant 0 : i32
    %c0_i32_1 = arith.constant 0 : i32
    return %c0_i32, %c0_i32_0 : i32, i32
  }
  func.func @transform_5(%arg0: i32) -> (i32, i32) {
    %c0_i32 = arith.constant 0 : i32
    %c0_i32_0 = arith.constant 0 : i32
    %c0_i32_1 = arith.constant 0 : i32
    return %c0_i32, %c0_i32_0 : i32, i32
  }
  func.func @transform_6(%arg0: i32) -> (i32, i32) {
    %c0_i32 = arith.constant 0 : i32
    %c0_i32_0 = arith.constant 0 : i32
    %c0_i32_1 = arith.constant 0 : i32
    return %c0_i32, %c0_i32_0 : i32, i32
  }
  func.func @transform_7(%arg0: i32) -> (i32, i32, i32) {
    %c0_i32 = arith.constant 0 : i32
    %c0_i32_0 = arith.constant 0 : i32
    %c0_i32_1 = arith.constant 0 : i32
    %c0_i32_2 = arith.constant 0 : i32
    return %c0_i32, %c0_i32_0, %c0_i32_1 : i32, i32, i32
  }
  func.func @transform_8(%arg0: i32) -> (i32, i32) {
    %c0_i32 = arith.constant 0 : i32
    %c0_i32_0 = arith.constant 0 : i32
    %c0_i32_1 = arith.constant 0 : i32
    return %c0_i32, %c0_i32_0 : i32, i32
  }
  func.func @transform_9(%arg0: i32) -> (i32, i32) {
    %c0_i32 = arith.constant 0 : i32
    %c0_i32_0 = arith.constant 0 : i32
    %c0_i32_1 = arith.constant 0 : i32
    return %c0_i32, %c0_i32_0 : i32, i32
  }
  func.func @transform_10(%arg0: i32) -> (i32, i32) {
    %c0_i32 = arith.constant 0 : i32
    %c0_i32_0 = arith.constant 0 : i32
    %c0_i32_1 = arith.constant 0 : i32
    return %c0_i32, %c0_i32_0 : i32, i32
  }
  func.func @transform_11(%arg0: i32) -> (i32, i32, i32) {
    %c0_i32 = arith.constant 0 : i32
    %c0_i32_0 = arith.constant 0 : i32
    %c0_i32_1 = arith.constant 0 : i32
    return %arg0, %c0_i32, %c0_i32_0 : i32, i32, i32
  }
}

</mosaic_0001>

<bundles_post_ra>
// kernel: squeeze.4
= control target key start
LH: loop header
LB: loop body
LE: loop exit
PB: predicated region body
PF: predicated region fallthrough
CT: control target
= control target key end

     0   :  { %s43_s8 = smov 20   ;;  %s44_s13 = smov 10   ;;  %vm3_vm0 = vcmask 39936   ;;  %vm9_vm1 = vcmask 203936   ;;  %vm15_vm2 = vcmask 162936   ;;  %vm21_vm3 = vcmask 121936   ;;  %s75_s0 = inlined_call_operand.vmem [shape: f32[4,5,5], index: 0, kind: input, shape index: {}]   ;;  %s76_s1 = inlined_call_operand.vmem [shape: f32[4,25], index: 1, kind: output, shape index: {}]  }
   0x1   :  { %v35_v0 = vld [vmem:[%s75_s0 + $0x4] ss:$8 sm:$0xf]   ;;  %v37_v1 = vld [vmem:[%s75_s0 + $0x2] ss:$8 sm:$0xf]  }
   0x2   :  { %7 = vrot.lane.b32.xlu0 %v35_v0, %s43_s8  ;;  %v36_v2 = vld [vmem:[%s75_s0 + $0x3] ss:$8 sm:$0xf]   ;;  %19 = vrot.lane.b32.xlu1 %v37_v1, %s44_s13  ;;  %v38_v3 = vld [vmem:[%s75_s0 + $0x1] ss:$8 sm:$0xf]  }
   0x3   :  { %v2_v4 = vld [vmem:[%s75_s0] ss:$8 sm:$0xf]   ;;  %s45_s0 = smov 15   ;;  %s46_s18 = smov 5   ;;  %vm27_vm4 = vcmask 80936  }
   0x4   :  { %4 = vst.msk [vmem:[#allocation0] sm:$0xf] %vm3_vm0, %v2_v4  }
   0x6   :  { %13 = vrot.lane.b32.xlu0 %v36_v2, %s45_s0  ;;  %25 = vrot.lane.b32.xlu1 %v38_v3, %s46_s18 }
  0x74   :  { %v8_v5 = vpop.permute.xlu0 %7   ;;  %v20_v6 = vpop.permute.xlu1 %19  }
  0x75   :  { %10 = vst.msk [vmem:[#allocation0] sm:$0xf] %vm9_vm1, %v8_v5  }
  0x78   :  { %v14_v7 = vpop.permute.xlu0 %13   ;;  %v26_v8 = vpop.permute.xlu1 %25  }
  0x79   :  { %16 = vst.msk [vmem:[#allocation0] sm:$0xf] %vm15_vm2, %v14_v7  }
  0x7a   :  { %22 = vst.msk [vmem:[#allocation0] sm:$0xf] %vm21_vm3, %v20_v6  }
  0x7b   :  { %28 = vst.msk [vmem:[#allocation0] sm:$0xf] %vm27_vm4, %v26_v8  }
  0x82   :  { %v32_v9 = vld [vmem:[#allocation0] sm:$0xf] }
  0x83   :  { %34 = vst [vmem:[%s76_s1] sm:$0xf] %v32_v9 }

// kernel: gsbottleneck_forward.1
= control target key start
LH: loop header
LB: loop body
LE: loop exit
PB: predicated region body
PF: predicated region fallthrough
CT: control target
= control target key end

     0   :  { %s2186_s17 = smov 0   ;;  %s3777_s0 = inlined_call_operand.vmem [shape: f32[2,16,256], index: 0, kind: input, shape index: {}]   ;;  %s3778_s1 = inlined_call_operand.vmem [shape: f32[8,16], index: 1, kind: input, shape index: {}]   ;;  %s3779_s2 = inlined_call_operand.vmem [shape: f32[8,1], index: 2, kind: input, shape index: {}]   ;;  %s3780_s3 = inlined_call_operand.vmem [shape: f32[25,4,1], index: 3, kind: input, shape index: {}]   ;;  %s3781_s4 = inlined_call_operand.vmem [shape: f32[4,1], index: 4, kind: input, shape index: {}]   ;;  %s3782_s5 = inlined_call_operand.vmem [shape: f32[8,72], index: 5, kind: input, shape index: {}]   ;;  %s3783_s6 = inlined_call_operand.vmem [shape: f32[8,1], index: 6, kind: input, shape index: {}]   ;;  %s3784_s7 = inlined_call_operand.vmem [shape: f32[25,8,1], index: 7, kind: input, shape index: {}]   ;;  %s3785_s8 = inlined_call_operand.vmem [shape: f32[8,1], index: 8, kind: input, shape index: {}]   ;;  %s3786_s9 = inlined_call_operand.vmem [shape: f32[16,16], index: 9, kind: input, shape index: {}]   ;;  %s3787_s10 = inlined_call_operand.vmem [shape: f32[16,1], index: 10, kind: input, shape index: {}]   ;;  %s3788_s11 = inlined_call_operand.vmem [shape: f32[2,16,256], index: 11, kind: output, shape index: {}]  }
   0x1   :  { %3927 = sst [smem:[#allocation43_spill]] %s3777_s0 }
   0x2   :  { %3928 = sst [smem:[#allocation44_spill]] %s3778_s1 }
   0x3   :  { %3929 = sst [smem:[#allocation45_spill]] %s3779_s2 }
   0x4   :  { %3930 = sst [smem:[#allocation46_spill]] %s3780_s3 }
   0x5   :  { %3931 = sst [smem:[#allocation47_spill]] %s3781_s4 }
   0x6   :  { %3932 = sst [smem:[#allocation48_spill]] %s3782_s5 }
   0x7 LB: > { %s1930_s18 = sadd.s32 4294967295, %s2097_s17   ;;  %p1934_p0 = scmp.ge.s32.totalorder %s2097_s17, 1  ;;  %s2097_s17 = sphi %s2186_s17, %s21_s17  }
   0x8   : > { %p337_p1 = scmp.lt.s32.totalorder %s2097_s17, 3 }
   0xa   : > { %p338_p2 = pnand %p1934_p0, %p337_p1 }
   0xc   : > { %341 = sbr.rel (%p338_p2) target bundleno = 1183 (0x49f), region = 64 }
  0x13   : > { %p377_p3 = scmp.lt.s32.totalorder %s1930_s18, 1  ;;  %s3933_s2 = sld [smem:[#allocation45_spill]]  ;;  %v3825_v1 = vmov 0.0   ;;  %v2100_v2 = vmov 0   ;;  %vm3821_vm0 = vcmask 130048  }
  0x14   : > { %480 = vmatprep.mubr.f32.mxu0 %v3825_v1  ;;  %2030 = vset.pattern.permute.xlu0 %v2100_v2  ;;  %s3934_s3 = sld [smem:[#allocation46_spill]]  ;;  %s3935_s0 = sld [smem:[#allocation43_spill]] }
  0x15   : > { %s4327_s18 = smov (!%p377_p3, %s1930_s18), 1  ;;  %2031 = vset.pattern.permute.xlu1 %v2100_v2  ;;  %1297 = vmatprep.mubr.f32.mxu1 %v3825_v1  ;;  %s3936_s1 = sld [smem:[#allocation44_spill]] }
  0x16   : > { %s3789_s23 = sshll.u32 %s4327_s18, 5  ;;  %s3806_s29 = smov 32  }
  0x17   : > { %s3816_s30 = smov 34   ;;  %s3802_s12 = smov 30  }
  0x18   : > { %s3893_s13 = smov 33   ;;  %s3883_s14 = smov 17  }
  0x19   : > { %v406_v0 = vld [vmem:[%s3933_s2] sm:$0xff]  ;;  %s3812_s15 = smov 31   ;;  %s3877_s16 = smov 15  }
  0x1a   : > { %409 = vperm.xlu0 %2030, %v406_v0   ;;  %v509_v3 = vld [vmem:[%s3934_s3] sm:$0xf]  ;;  %s381_s26 = scalar_lea.vmem %s3935_s0, %s3789_s23  ;;  %v510_v4 = vld [vmem:[%s3934_s3 + $0x4] sm:$0xf]  ;;  %v512_v10 = vld [vmem:[%s3934_s3 + $0xc] sm:$0xf] }
  0x1b   : > { %v388_v5 = vld [vmem:[%s381_s26 + $0x8] sm:$0xff]  ;;  %v390_v6 = vld [vmem:[%s381_s26 + $0x18] sm:$0xff]  ;;  %v387_v7 = vld [vmem:[%s381_s26] sm:$0xff]  ;;  %581 = vperm.xlu1 %2031, %v510_v4   ;;  %s3804_s19 = smov 18   ;;  %s3808_s20 = smov 2  }
  0x1c   : > { %v1963_v8 = vpack.c.bf16 %v390_v6, %v388_v5  ;;  %v389_v9 = vld [vmem:[%s381_s26 + $0x10] sm:$0xff]  ;;  %v511_v12 = vld [vmem:[%s3934_s3 + $0x8] sm:$0xf]  ;;  %v405_v13 = vld [vmem:[%s3936_s1] sm:$0xff]  ;;  %s3885_s21 = smov 16   ;;  %s3790_s22 = smov 126  }
  0x1d   : > { %v1965_v11 = vpack.c.bf16 %v389_v9, %v387_v7  ;;  %v514_v14 = vld [vmem:[%s3934_s3 + $0x14] sm:$0xf]  ;;  %v513_v15 = vld [vmem:[%s3934_s3 + $0x10] sm:$0xf]  ;;  %v516_v16 = vld [vmem:[%s3934_s3 + $0x1c] sm:$0xf] }
  0x1e   : > { %555 = vperm.xlu0 %2030, %v509_v3   ;;  %1964 = vmatprep.subr.bf16.mxu0 %v1963_v8  ;;  %v515_v17 = vld [vmem:[%s3934_s3 + $0x18] sm:$0xf]  ;;  %v518_v18 = vld [vmem:[%s3934_s3 + $0x24] sm:$0xf]  ;;  %v517_v19 = vld [vmem:[%s3934_s3 + $0x20] sm:$0xf] }
  0x1f   : > { %1966 = vmatpush1.bf16.msra.mxu0 %v1965_v11  ;;  %603 = vperm.xlu1 %2031, %v511_v12   ;;  %v520_v20 = vld [vmem:[%s3934_s3 + $0x2c] sm:$0xf]  ;;  %v519_v21 = vld [vmem:[%s3934_s3 + $0x28] sm:$0xf]  ;;  %v522_v22 = vld [vmem:[%s3934_s3 + $0x34] sm:$0xf] }
  0x20   : > { %1992 = vmatprep.subr.bf16.mxu0 %v1963_v8  ;;  %v521_v23 = vld [vmem:[%s3934_s3 + $0x30] sm:$0xf]  ;;  %v524_v24 = vld [vmem:[%s3934_s3 + $0x3c] sm:$0xf]  ;;  %v523_v25 = vld [vmem:[%s3934_s3 + $0x38] sm:$0xf] }
  0x21   : > { %v526_v26 = vld [vmem:[%s3934_s3 + $0x44] sm:$0xf]  ;;  %v525_v27 = vld [vmem:[%s3934_s3 + $0x40] sm:$0xf]  ;;  %v528_v28 = vld [vmem:[%s3934_s3 + $0x4c] sm:$0xf] }
  0x22   : > { %629 = vperm.xlu0 %2030, %v512_v10   ;;  %1939 = vmatmul.mubr.msk.f32.vlgmr.msra.gmra.mrb[0].mxu0 %vm3821_vm0, %v405_v13  ;;  %v527_v29 = vld [vmem:[%s3934_s3 + $0x48] sm:$0xf]  ;;  %v530_v30 = vld [vmem:[%s3934_s3 + $0x54] sm:$0xf]  ;;  %v529_v31 = vld [vmem:[%s3934_s3 + $0x50] sm:$0xf] }
  0x23   : > { %1994 = vmatpush1.bf16.msra.mxu0 %v1965_v11  ;;  %655 = vperm.xlu1 %2031, %v513_v15   ;;  %v532_v32 = vld [vmem:[%s3934_s3 + $0x5c] sm:$0xf]  ;;  %v531_v33 = vld [vmem:[%s3934_s3 + $0x58] sm:$0xf]  ;;  %v533_v34 = vld [vmem:[%s3934_s3 + $0x60] sm:$0xf] }
  0x24   : > { %1838 = vmatprep.mubr.f32.mxu0 %v3825_v1  ;;  %s3810_s24 = smov 14   ;;  %s3792_s25 = smov 113  }
  0x25   : > { %s3794_s26 = smov 1   ;;  %s3796_s27 = smov 111  }
  0x26   : > { %681 = vperm.xlu0 %2030, %v514_v14   ;;  %s3879_s28 = smov 127   ;;  %s3798_s23 = smov 98  }
  0x27   : > { %705 = vperm.xlu1 %2031, %v515_v17   ;;  %s3945_s4 = sld [smem:[#allocation47_spill]]  ;;  %s4147_s5 = sld [smem:[#allocation48_spill]] }
  0x28   : > { %s4164_s0 = smov 114   ;;  %s4165_s1 = smov 112  }
  0x29   : > { %s4166_s2 = smov 110   ;;  %s4167_s3 = smov 97  }
  0x2a   : > { %727 = vperm.xlu0 %2030, %v516_v16  }
  0x2b   : > { %751 = vperm.xlu1 %2031, %v517_v19  }
  0x2d   : > { %v1119_v16 = vld [vmem:[%s3945_s4] sm:$0xf]  ;;  %s4168_s4 = smov 95  }
  0x2e   : > { %775 = vperm.xlu0 %2030, %v518_v18  }
  0x2f   : > { %797 = vperm.xlu1 %2031, %v519_v21  }
  0x32   : > { %819 = vperm.xlu0 %2030, %v520_v20  }
  0x33   : > { %828 = vperm.xlu1 %2031, %v521_v23  }
  0x36   : > { %850 = vperm.xlu0 %2030, %v522_v22  }
  0x37   : > { %872 = vperm.xlu1 %2031, %v523_v25  }
  0x3a   : > { %898 = vperm.xlu0 %2030, %v524_v24  }
  0x3b   : > { %922 = vperm.xlu1 %2031, %v525_v27  }
  0x3e   : > { %944 = vperm.xlu0 %2030, %v526_v26  }
  0x3f   : > { %968 = vperm.xlu1 %2031, %v527_v29  }
  0x42   : > { %992 = vperm.xlu0 %2030, %v528_v28  }
  0x43   : > { %1018 = vperm.xlu1 %2031, %v529_v31   ;;  %v391_v31 = vlaneseq }
  0x46   : > { %1042 = vperm.xlu0 %2030, %v530_v30  }
  0x47   : > { %1064 = vperm.xlu1 %2031, %v531_v33  }
  0x4a   : > { %1088 = vperm.xlu0 %2030, %v532_v32  }
  0x4b   : > { %1112 = vperm.xlu1 %2031, %v533_v34   ;;  %v2459_v34 = vand.u32 127, %v391_v31 }
  0x4d   : > { %vm3820_vm3 = vcmp.lt.s32.totalorder %v2459_v34, 34  ;;  %vm3833_vm10 = vcmp.lt.s32.totalorder %v2459_v34, 33  ;;  %vm3834_vm11 = vcmp.lt.s32.totalorder %v2459_v34, 32 }
  0x99   : > { %v410_v35 = vpop.permute.xlu0 %409 }
  0x9a   : > { %v2333_v61 = vpop.permute.xlu1 %581 }
  0x9d   : > { %v2342_v63 = vpop.permute.xlu0 %555 }
  0x9e   : > { %v2348_v0 = vpop.permute.xlu1 %603 }
  0xa1   : > { %v2354_v2 = vpop.permute.xlu0 %629 }
  0xa2   : > { %v2356_v3 = vpop.permute.xlu1 %655 }
  0xa5   : > { %v2362_v4 = vpop.permute.xlu0 %681 }
  0xa6   : > { %v2368_v5 = vpop.permute.xlu1 %705 }
  0xa9   : > { %v2374_v6 = vpop.permute.xlu0 %727 }
  0xaa   : > { %v2376_v7 = vpop.permute.xlu1 %751 }
  0xad   : > { %v2382_v8 = vpop.permute.xlu0 %775 }
  0xae   : > { %v2388_v9 = vpop.permute.xlu1 %797 }
  0xb1   : > { %v2394_v10 = vpop.permute.xlu0 %819 }
  0xb2   : > { %v2396_v11 = vpop.permute.xlu1 %828 }
  0xb5   : > { %v2402_v12 = vpop.permute.xlu0 %850 }
  0xb6   : > { %v2404_v13 = vpop.permute.xlu1 %872 }
  0xb9   : > { %v2414_v14 = vpop.permute.xlu0 %898 }
  0xba   : > { %v2416_v15 = vpop.permute.xlu1 %922 }
  0xbd   : > { %v2425_v17 = vpop.permute.xlu0 %944 }
  0xbe   : > { %v2427_v18 = vpop.permute.xlu1 %968 }
  0xc1   : > { %v2433_v19 = vpop.permute.xlu0 %992 }
  0xc2   : > { %v2435_v20 = vpop.permute.xlu1 %1018 }
  0xc5   : > { %v2437_v21 = vpop.permute.xlu0 %1042 }
  0xc6   : > { %v2439_v22 = vpop.permute.xlu1 %1064 }
  0xc9   : > { %v2441_v23 = vpop.permute.xlu0 %1088 }
  0xca   : > { %3946 = vst [vmem:[#allocation4_spill] sm:$0xff] %v2441_v23  ;;  %v2443_v24 = vpop.permute.xlu1 %1112 }
  0xcb   : > { %3947 = vst [vmem:[#allocation5_spill] sm:$0xff] %v2443_v24 }
  0xf5   : > { %v482_v36 = vpop.f32.mrb[0].mxu0 }
  0xf6   : > { %v483_v37 = vadd.f32 %v482_v36, %v410_v35  ;;  %v484_v38 = vpop.f32.mrb[1].mxu0 }
  0xf7   : > { %v2287_v44 = vadd.f32 %v484_v38, %v410_v35 }
  0xf8   : > { %v489_v39 = vand.u32 2147483647, %v483_v37  ;;  %v487_v47 = vmax.f32 %v483_v37, 0.0 }
  0xf9   : > { %v490_v45 = vand.u32 2147483647, %v2287_v44  ;;  %v488_v58 = vmax.f32 %v2287_v44, 0.0 }
  0xfa   : > { %v491_v40 = vsub.f32 0.0, %v489_v39 }
  0xfb   : > { %v492_v49 = vsub.f32 0.0, %v490_v45 }
  0xfc   : > { %v493_v41 = vmul.f32 1.442695, %v491_v40  ;;  %v394_v40 = vcvt.s32.f32 %v2459_v34 }
  0xfd   : > { %v495_v51 = vmul.f32 1.442695, %v492_v49 }
  0xfe   : > { %2067 = vpow2.f32 %v493_v41 }
 0x108   : > { %v2068_v42 = vpop.eup %2067 }
 0x109   : > { %v497_v43 = vadd.f32 1.0, %v2068_v42 }
 0x10b   : > { %2069 = vlog2.f32 %v497_v43 }
 0x115   : > { %v2070_v46 = vpop.eup %2069 }
 0x116   : > { %v500_v48 = vmul.f32 0.6931472, %v2070_v46 }
 0x118   : > { %v503_v50 = vadd.f32 %v500_v48, %v487_v47 }
 0x11a   : > { %2071 = vtanh.f32 %v503_v50 }
 0x11b   : > { %2073 = vpow2.f32 %v495_v51 }
 0x124   : > { %v2072_v52 = vpop.eup %2071 }
 0x125   : > { %v2290_v53 = vmul.f32 %v2072_v52, %v483_v37  ;;  %v2074_v54 = vpop.eup %2073  ;;  %v393_v37 = vadd.s32 128, %v2459_v34 }
 0x126   : > { %v498_v55 = vadd.f32 1.0, %v2074_v54 }
 0x127   : > { %3937 = vst [vmem:[#allocation2_spill] sm:$0xff] %v2290_v53  ;;  %588 = vrot.lane.b32.xlu0 %v2290_v53, %s3806_s29  ;;  %534 = vrot.lane.b32.xlu1 %v2290_v53, %s3816_s30  ;;  %v395_v41 = vcvt.s32.f32 %v393_v37  ;;  %v3948_v37 = vmov 0 }
 0x128   : > { %2075 = vlog2.f32 %v498_v55 }
 0x129   : > { %v398_v45 = vmul.f32 0.0625, %v395_v41 }
 0x12b   : > { %636 = vrot.lane.b32.xlu0 %v2290_v53, %s3802_s12  ;;  %562 = vrot.lane.b32.xlu1 %v2290_v53, %s3893_s13  ;;  %v2481_v49 = vfloor.f32 %v398_v45 }
 0x12d   : > { %v402_v54 = vmul.f32 16.0, %v2481_v49  ;;  %vm3840_vm4 = vcmp.ge.f32.partialorder %v2481_v49, 2.0 }
 0x12f   : > { %688 = vrot.lane.b32.xlu0 %v2290_v53, %s3883_s14  ;;  %610 = vrot.lane.b32.xlu1 %v2290_v53, %s3812_s15 }
 0x132   : > { %v2076_v56 = vpop.eup %2075 }
 0x133   : > { %734 = vrot.lane.b32.xlu0 %v2290_v53, %s3877_s16  ;;  %662 = vrot.lane.b32.xlu1 %v2290_v53, %s3804_s19  ;;  %v502_v57 = vmul.f32 0.6931472, %v2076_v56 }
 0x135   : > { %v504_v59 = vadd.f32 %v502_v57, %v488_v58  ;;  %v2495_v58 = vsub.f32 %v395_v41, %v402_v54 }
 0x137   : > { %782 = vrot.lane.b32.xlu0 %v2290_v53, %s3808_s20  ;;  %712 = vrot.lane.b32.xlu1 %v2290_v53, %s3885_s21  ;;  %2077 = vtanh.f32 %v504_v59  ;;  %vm3823_vm5 = vcmp.ge.f32.partialorder %v2495_v58, 2.0  ;;  %vm3827_vm8 = vcmp.ge.f32.partialorder %v2495_v58, 1.0  ;;  %vm3838_vm15 = vcmp.lt.f32.partialorder %v2495_v58, 15.0 }
 0x138   : > { %vm2530_vm9 = vmand %vm3840_vm4, %vm3823_vm5  ;;  %vm3841_vm5 = vcmp.lt.f32.partialorder %v2495_v58, 14.0 }
 0x139   : > { %vm2556_vm0 = vmand %vm3840_vm4, %vm3827_vm8 }
 0x13b   : > { %857 = vrot.lane.b32.xlu0 %v2290_v53, %s3790_s22  ;;  %758 = vrot.lane.b32.xlu1 %v2290_v53, %s3810_s24  ;;  %s3814_s22 = smov 114  }
 0x13f   : > { %905 = vrot.lane.b32.xlu0 %v2290_v53, %s3792_s25  ;;  %804 = vrot.lane.b32.xlu1 %v2290_v53, %s3794_s26  ;;  %s3800_s25 = smov 96   ;;  %s3881_s26 = smov 112  }
 0x141   : > { %v2078_v60 = vpop.eup %2077 }
 0x142   : > { %v2340_v62 = vmul.f32 %v2078_v60, %v2287_v44  ;;  %v397_v44 = vmul.f32 0.0625, %v394_v40 }
 0x143   : > { %951 = vrot.lane.b32.xlu0 %v2290_v53, %s3796_s27  ;;  %835 = vrot.lane.b32.xlu1 %v2290_v53, %s3879_s28  ;;  %s3873_s27 = smov 95  }
 0x144   : > { %3938 = vst [vmem:[#allocation3_spill] sm:$0xff] %v2340_v62  ;;  %v2479_v48 = vfloor.f32 %v397_v44  ;;  %v2513_v31 = vmul.f32 %v2396_v11, %v2340_v62 }
 0x146   : > { %v401_v52 = vmul.f32 16.0, %v2479_v48  ;;  %vm3839_vm1 = vcmp.ge.f32.partialorder %v2479_v48, 2.0  ;;  %vm3845_vm13 = vcmp.ge.f32.partialorder %v2479_v48, 1.0 }
 0x147   : > { %999 = vrot.lane.b32.xlu0 %v2290_v53, %s3798_s23  ;;  %879 = vrot.lane.b32.xlu1 %v2290_v53, %s3814_s22  ;;  %s3818_s23 = smov 110  }
 0x148   : > { %v2493_v57 = vsub.f32 %v394_v40, %v401_v52  ;;  %v3954_v52 = vmov 0 }
 0x14a   : > { %vm3824_vm2 = vcmp.ge.f32.partialorder %v2493_v57, 2.0  ;;  %vm3822_vm6 = vcmp.ge.f32.partialorder %v2493_v57, 1.0  ;;  %vm3837_vm14 = vcmp.lt.f32.partialorder %v2493_v57, 15.0 }
 0x14b   : > { %1049 = vrot.lane.b32.xlu0 %v2290_v53, %s3800_s25  ;;  %929 = vrot.lane.b32.xlu1 %v2290_v53, %s3881_s26  ;;  %s3875_s25 = smov 97   ;;  %vm2519_vm7 = vmand %vm3839_vm1, %vm3824_vm2  ;;  %vm3966_vm2 = vcmp.lt.s32.totalorder %v2459_v34, 31 }
 0x14c   : > { %v3949_v37 = vsel %vm2519_vm7, 4294967295, %v3948_v37  ;;  %vm2544_vm12 = vmand %vm3839_vm1, %vm3822_vm6  ;;  %vm3842_vm6 = vcmp.lt.f32.partialorder %v2493_v57, 14.0 }
 0x14d   : > { %3950 = vst [vmem:[#allocation6_spill] sm:$0xff] %v3949_v37  ;;  %v3955_v52 = vsel %vm2544_vm12, 4294967295, %v3954_v52  ;;  %vm3967_vm8 = vmmov %vm3966_vm2 }
 0x14e   : > { %3956 = vst [vmem:[#allocation8_spill] sm:$0xff] %v3955_v52 }
 0x14f   : > { %1071 = vrot.lane.b32.xlu0 %v2290_v53, %s3873_s27  ;;  %975 = vrot.lane.b32.xlu1 %v2290_v53, %s3818_s23 }
 0x153   : > { %536 = vrot.lane.b32.xlu0 %v2340_v62, %s3816_s30  ;;  %1025 = vrot.lane.b32.xlu1 %v2290_v53, %s3875_s25  ;;  %s4153_s30 = smov 34  }
 0x157   : > { %564 = vrot.lane.b32.xlu0 %v2340_v62, %s3893_s13  ;;  %590 = vrot.lane.b32.xlu1 %v2340_v62, %s3806_s29  ;;  %s3941_s29 = smov 113  }
 0x15b   : > { %612 = vrot.lane.b32.xlu0 %v2340_v62, %s3812_s15  ;;  %638 = vrot.lane.b32.xlu1 %v2340_v62, %s3802_s12  ;;  %s3939_s12 = smov 1   ;;  %s3944_s15 = smov 96  }
 0x15f   : > { %664 = vrot.lane.b32.xlu0 %v2340_v62, %s3804_s19  ;;  %690 = vrot.lane.b32.xlu1 %v2340_v62, %s3883_s14  ;;  %s3940_s19 = smov 126  }
 0x163   : > { %714 = vrot.lane.b32.xlu0 %v2340_v62, %s3885_s21  ;;  %736 = vrot.lane.b32.xlu1 %v2340_v62, %s3877_s16 }
 0x167   : > { %760 = vrot.lane.b32.xlu0 %v2340_v62, %s3810_s24  ;;  %784 = vrot.lane.b32.xlu1 %v2340_v62, %s3808_s20  ;;  %s3942_s20 = smov 111   ;;  %s3943_s24 = smov 98  }
 0x16b   : > { %806 = vrot.lane.b32.xlu0 %v2340_v62, %s3939_s12  ;;  %859 = vrot.lane.b32.xlu1 %v2340_v62, %s3940_s19 }
 0x16f   : > { %837 = vrot.lane.b32.xlu0 %v2340_v62, %s3879_s28  ;;  %907 = vrot.lane.b32.xlu1 %v2340_v62, %s3941_s29 }
 0x173   : > { %881 = vrot.lane.b32.xlu0 %v2340_v62, %s3814_s22  ;;  %953 = vrot.lane.b32.xlu1 %v2340_v62, %s3942_s20  ;;  %s4154_s22 = smov 31  }
 0x177   : > { %931 = vrot.lane.b32.xlu0 %v2340_v62, %s3881_s26  ;;  %1001 = vrot.lane.b32.xlu1 %v2340_v62, %s3943_s24 }
 0x17b   : > { %977 = vrot.lane.b32.xlu0 %v2340_v62, %s3818_s23  ;;  %1051 = vrot.lane.b32.xlu1 %v2340_v62, %s3944_s15  ;;  %s3871_s23 = smov 94  }
 0x17f   : > { %1027 = vrot.lane.b32.xlu0 %v2340_v62, %s3875_s25  ;;  %1073 = vrot.lane.b32.xlu1 %v2340_v62, %s3873_s27  ;;  %s4158_s27 = smov 16   ;;  %s4160_s25 = smov 14  }
 0x183   : > { %1122 = vperm.xlu0 %2030, %v1119_v16   ;;  %1095 = vrot.lane.b32.xlu1 %v2290_v53, %s3871_s23  ;;  %v2509_v16 = vmul.f32 %v2396_v11, %v2290_v53  ;;  %v3951_v11 = vmov 0 }
 0x184   : > { %v3952_v11 = vsel %vm2530_vm9, 4294967295, %v3951_v11 }
 0x185   : > { %3953 = vst [vmem:[#allocation7_spill] sm:$0xff] %v3952_v11 }
 0x187   : > { %1097 = vrot.lane.b32.xlu0 %v2340_v62, %s3871_s23  ;;  %s4157_s23 = smov 30  }
 0x199   : > { %v2445_v25 = vpop.permute.xlu0 %588  ;;  %v535_v26 = vpop.permute.xlu1 %534 }
 0x19d   : > { %v2447_v27 = vpop.permute.xlu0 %636  ;;  %v2449_v28 = vpop.permute.xlu1 %562 }
 0x1a1   : > { %v2451_v29 = vpop.permute.xlu0 %688  ;;  %v2453_v30 = vpop.permute.xlu1 %610 }
 0x1a5   : > { %v2455_v32 = vpop.permute.xlu0 %734  ;;  %v2457_v33 = vpop.permute.xlu1 %662 }
 0x1a9   : > { %v2461_v35 = vpop.permute.xlu0 %782  ;;  %v2463_v36 = vpop.permute.xlu1 %712 }
 0x1ad   : > { %v2466_v38 = vpop.permute.xlu0 %857  ;;  %v2468_v39 = vpop.permute.xlu1 %758 }
 0x1b1   : > { %v2471_v42 = vpop.permute.xlu0 %905  ;;  %v2473_v43 = vpop.permute.xlu1 %804 }
 0x1b5   : > { %v2475_v46 = vpop.permute.xlu0 %951  ;;  %v2477_v47 = vpop.permute.xlu1 %835 }
 0x1b9   : > { %v2483_v50 = vpop.permute.xlu0 %999  ;;  %v2485_v51 = vpop.permute.xlu1 %879 }
 0x1bd   : > { %v2489_v55 = vpop.permute.xlu0 %1049  ;;  %v2491_v56 = vpop.permute.xlu1 %929 }
 0x1c1   : > { %v2497_v59 = vpop.permute.xlu0 %1071  ;;  %v2499_v60 = vpop.permute.xlu1 %975 }
 0x1c5   : > { %v537_v40 = vpop.permute.xlu0 %536  ;;  %v2523_v41 = vpop.permute.xlu1 %1025 }
 0x1c6   : > { %v539_v44 = vsel %vm3820_vm3, %v535_v26, %v537_v40  ;;  %v540_v45 = vsel %vm3820_vm3, %v537_v40, %v535_v26  ;;  %v3957_v26 = vmov 0  ;;  %vm3983_vm3 = vcmp.ge.f32.partialorder %v2495_v58, 1.0 }
 0x1c7   : > { %v3958_v26 = vsel %vm2556_vm0, 4294967295, %v3957_v26  ;;  %v551_v54 = vsel %vm2519_vm7, %v540_v45, 0.0  ;;  %v552_v40 = vsel %vm2530_vm9, %v539_v44, 0.0  ;;  %vm4065_vm7 = vcmp.lt.f32.partialorder %v2481_v49, 15.0 }
 0x1c8   : > { %3959 = vst [vmem:[#allocation9_spill] sm:$0xff] %v3958_v26 }
 0x1c9   : > { %v565_v1 = vpop.permute.xlu0 %564  ;;  %v591_v62 = vpop.permute.xlu1 %590 }
 0x1ca   : > { %v567_v53 = vsel %vm3833_vm10, %v2449_v28, %v565_v1  ;;  %v568_v24 = vsel %vm3833_vm10, %v565_v1, %v2449_v28  ;;  %v593_v45 = vsel %vm3834_vm11, %v2445_v25, %v591_v62  ;;  %v594_v44 = vsel %vm3834_vm11, %v591_v62, %v2445_v25  ;;  %vm2594_vm10 = vmand %vm3839_vm1, %vm3837_vm14 }
 0x1cb   : > { %v577_v11 = vsel %vm2544_vm12, %v568_v24, 0.0  ;;  %v578_v37 = vsel %vm2556_vm0, %v567_v53, 0.0  ;;  %v599_v23 = vsel %vm3839_vm1, %v594_v44, 0.0  ;;  %v600_v1 = vsel %vm3840_vm4, %v593_v45, 0.0  ;;  %vm2606_vm11 = vmand %vm3840_vm4, %vm3838_vm15 }
 0x1cc   : > { %v3960_v28 = vmov 0  ;;  %v558_v62 = vmul.f32 %v2342_v63, %v551_v54  ;;  %v559_v24 = vmul.f32 %v2342_v63, %v552_v40  ;;  %v584_v53 = vmul.f32 %v2333_v61, %v577_v11  ;;  %vm2616_vm14 = vmand %vm3839_vm1, %vm3842_vm6 }
 0x1cd   : > { %v3961_v28 = vsel %vm2594_vm10, 4294967295, %v3960_v28  ;;  %v585_v25 = vmul.f32 %v2333_v61, %v578_v37  ;;  %v3962_v45 = vmov 0  ;;  %v606_v44 = vmul.f32 %v2348_v0, %v599_v23  ;;  %v613_v52 = vpop.permute.xlu0 %612  ;;  %v639_v61 = vpop.permute.xlu1 %638  ;;  %vm2632_vm1 = vmand %vm3840_vm4, %vm3841_vm5 }
 0x1ce   : > { %v3963_v45 = vsel %vm2606_vm11, 4294967295, %v3962_v45  ;;  %v607_v26 = vmul.f32 %v2348_v0, %v600_v1  ;;  %v3964_v63 = vmov 0  ;;  %v586_v37 = vadd.f32 %v584_v53, %v558_v62 }
 0x1cf   : > { %v3965_v63 = vsel %vm2616_vm14, 4294967295, %v3964_v63  ;;  %v587_v11 = vadd.f32 %v585_v25, %v559_v24  ;;  %v615_v0 = vsel %vm3966_vm2, %v2453_v30, %v613_v52  ;;  %v616_v23 = vsel %vm3967_vm8, %v613_v52, %v2453_v30 }
 0x1d0   : > { %v3968_v54 = vmov 0  ;;  %v625_v40 = vsel %vm2594_vm10, %v616_v23, 0.0  ;;  %v626_v1 = vsel %vm2606_vm11, %v615_v0, 0.0  ;;  %vm3971_vm2 = vcmp.lt.s32.totalorder %v2459_v34, 30 }
 0x1d1   : > { %v3969_v54 = vsel %vm2632_vm1, 4294967295, %v3968_v54  ;;  %v641_v62 = vsel %vm3971_vm2, %v2447_v27, %v639_v61  ;;  %vm3972_vm8 = vmmov %vm3971_vm2  ;;  %vm3973_vm15 = vcmp.ge.f32.partialorder %v2493_v57, 2.0  ;;  %v3974_v52 = vmov 0 }
 0x1d2   : > { %3970 = vst [vmem:[#allocation10_spill] sm:$0xff] %v3969_v54  ;;  %v642_v30 = vsel %vm3972_vm8, %v639_v61, %v2447_v27  ;;  %vm2650_vm4 = vmand %vm3845_vm13, %vm3973_vm15  ;;  %v608_v24 = vadd.f32 %v606_v44, %v586_v37  ;;  %v609_v53 = vadd.f32 %v607_v26, %v587_v11  ;;  %v632_v25 = vmul.f32 %v2354_v2, %v625_v40  ;;  %v665_v44 = vpop.permute.xlu0 %664  ;;  %v691_v26 = vpop.permute.xlu1 %690 }
 0x1d3   : > { %v3975_v52 = vsel %vm2650_vm4, 4294967295, %v3974_v52  ;;  %v633_v0 = vmul.f32 %v2354_v2, %v626_v1  ;;  %vm3976_vm2 = vcmp.ge.f32.partialorder %v2495_v58, 2.0  ;;  %vm3977_vm5 = vcmp.ge.f32.partialorder %v2481_v49, 1.0 }
 0x1d4   : > { %vm2660_vm6 = vmand %vm3977_vm5, %vm3976_vm2  ;;  %v3978_v27 = vmov 0  ;;  %v651_v61 = vsel %vm2616_vm14, %v642_v30, 0.0  ;;  %v652_v23 = vsel %vm2632_vm1, %v641_v62, 0.0  ;;  %vm3980_vm15 = vcmp.ge.f32.partialorder %v2493_v57, 1.0 }
 0x1d5   : > { %v3979_v27 = vsel %vm2660_vm6, 4294967295, %v3978_v27  ;;  %vm2672_vm8 = vmand %vm3845_vm13, %vm3980_vm15  ;;  %v634_v37 = vadd.f32 %v632_v25, %v608_v24  ;;  %v635_v11 = vadd.f32 %v633_v0, %v609_v53  ;;  %v658_v40 = vmul.f32 %v2356_v3, %v651_v61 }
 0x1d6   : > { %v659_v1 = vmul.f32 %v2356_v3, %v652_v23  ;;  %vm3984_vm1 = vmmov %vm3977_vm5  ;;  %vm3987_vm15 = vcmp.lt.s32.totalorder %v2459_v34, 18  ;;  %vm3989_vm5 = vcmp.lt.s32.totalorder %v2459_v34, 17 }
 0x1d7   : > { %vm2684_vm14 = vmand %vm3984_vm1, %vm3983_vm3  ;;  %v667_v30 = vsel %vm3987_vm15, %v2457_v33, %v665_v44  ;;  %v693_v3 = vsel %vm3989_vm5, %v2451_v29, %v691_v26  ;;  %v660_v25 = vadd.f32 %v658_v40, %v634_v37  ;;  %vm3991_vm3 = vcmp.lt.f32.partialorder %v2493_v57, 15.0 }
 0x1d8   : > { %vm3988_vm2 = vmmov %vm3987_vm15  ;;  %v661_v0 = vadd.f32 %v659_v1, %v635_v11  ;;  %v678_v23 = vsel %vm2660_vm6, %v667_v30, 0.0  ;;  %v737_v11 = vpop.permute.xlu1 %736  ;;  %vm3995_vm15 = vcmp.lt.s32.totalorder %v2459_v34, 16 }
 0x1d9   : > { %v668_v24 = vsel %vm3988_vm2, %v665_v44, %v2457_v33  ;;  %vm3990_vm13 = vmmov %vm3989_vm5  ;;  %v685_v44 = vmul.f32 %v2362_v4, %v678_v23 }
 0x1da   : > { %v694_v53 = vsel %vm3990_vm13, %v691_v26, %v2451_v29  ;;  %v677_v61 = vsel %vm2650_vm4, %v668_v24, 0.0  ;;  %v702_v29 = vsel %vm2684_vm14, %v693_v3, 0.0  ;;  %v715_v26 = vpop.permute.xlu0 %714  ;;  %vm3992_vm13 = vcmp.ge.f32.partialorder %v2479_v48, 1.0  ;;  %vm3996_vm1 = vmmov %vm3995_vm15 }
 0x1db   : > { %v684_v33 = vmul.f32 %v2362_v4, %v677_v61  ;;  %v701_v54 = vsel %vm2672_vm8, %v694_v53, 0.0  ;;  %vm2715_vm5 = vmand %vm3992_vm13, %vm3991_vm3  ;;  %v709_v40 = vmul.f32 %v2368_v5, %v702_v29  ;;  %v717_v1 = vsel %vm3995_vm15, %v2463_v36, %v715_v26 }
 0x1dc   : > { %v708_v4 = vmul.f32 %v2368_v5, %v701_v54  ;;  %v718_v30 = vsel %vm3996_vm1, %v715_v26, %v2463_v36  ;;  %vm3997_vm3 = vcmp.lt.f32.partialorder %v2495_v58, 15.0  ;;  %vm3998_vm13 = vcmp.ge.f32.partialorder %v2481_v49, 1.0 }
 0x1dd   : > { %vm2732_vm6 = vmand %vm3998_vm13, %vm3997_vm3  ;;  %v686_v54 = vadd.f32 %v684_v33, %v660_v25  ;;  %v687_v5 = vadd.f32 %v685_v44, %v661_v0  ;;  %vm4001_vm4 = vcmp.ge.f32.partialorder %v2479_v48, 1.0  ;;  %vm4003_vm1 = vcmp.lt.f32.partialorder %v2493_v57, 14.0 }
 0x1de   : > { %v723_v3 = vsel %vm4001_vm4, %v718_v30, 0.0  ;;  %vm4002_vm15 = vmmov %vm3998_vm13  ;;  %v4005_v36 = vmov 0  ;;  %v4011_v33 = vmov 0  ;;  %v785_v30 = vpop.permute.xlu1 %784  ;;  %vm4034_vm3 = vcmp.lt.f32.partialorder %v2481_v49, 15.0 }
 0x1df   : > { %v724_v53 = vsel %vm4002_vm15, %v717_v1, 0.0  ;;  %vm4004_vm11 = vmmov %vm4001_vm4  ;;  %v730_v25 = vmul.f32 %v2374_v6, %v723_v3  ;;  %vm4007_vm4 = vcmp.lt.s32.totalorder %v2459_v34, 15  ;;  %v710_v44 = vadd.f32 %v708_v4, %v686_v54  ;;  %v761_v1 = vpop.permute.xlu0 %760 }
 0x1e0   : > { %vm2745_vm10 = vmand %vm4004_vm11, %vm4003_vm1  ;;  %v731_v0 = vmul.f32 %v2374_v6, %v724_v53  ;;  %v739_v61 = vsel %vm4007_vm4, %v2455_v32, %v737_v11  ;;  %vm4009_vm11 = vcmp.lt.f32.partialorder %v2495_v58, 14.0  ;;  %v711_v29 = vadd.f32 %v709_v40, %v687_v5 }
 0x1e1   : > { %v4006_v36 = vsel %vm2745_vm10, 4294967295, %v4005_v36  ;;  %vm4008_vm15 = vmmov %vm4007_vm4  ;;  %v748_v26 = vsel %vm2732_vm6, %v739_v61, 0.0  ;;  %v732_v40 = vadd.f32 %v730_v25, %v710_v44  ;;  %vm4018_vm4 = vcmp.ge.f32.partialorder %v2495_v58, 2.0 }
 0x1e2   : > { %v740_v23 = vsel %vm4008_vm15, %v737_v11, %v2455_v32  ;;  %vm4010_vm1 = vmmov %vm3998_vm13  ;;  %v755_v11 = vmul.f32 %v2376_v7, %v748_v26  ;;  %vm4013_vm15 = vcmp.lt.s32.totalorder %v2459_v34, 14  ;;  %v733_v54 = vadd.f32 %v731_v0, %v711_v29  ;;  %v860_v26 = vpop.permute.xlu1 %859 }
 0x1e3   : > { %vm2763_vm2 = vmand %vm4010_vm1, %vm4009_vm11  ;;  %v747_v6 = vsel %vm2715_vm5, %v740_v23, 0.0  ;;  %v763_v3 = vsel %vm4013_vm15, %v2468_v39, %v761_v1  ;;  %vm4015_vm1 = vcmp.lt.s32.totalorder %v2459_v34, 2  ;;  %vm4023_vm13 = vcmp.lt.s32.totalorder %v2459_v34, 126 }
 0x1e4   : > { %v4012_v33 = vsel %vm2763_vm2, 4294967295, %v4011_v33  ;;  %v754_v32 = vmul.f32 %v2376_v7, %v747_v6  ;;  %vm4014_vm11 = vmmov %vm4013_vm15  ;;  %v772_v53 = vsel %vm2763_vm2, %v763_v3, 0.0  ;;  %v787_v23 = vsel %vm4015_vm1, %v2461_v35, %v785_v30  ;;  %v807_v6 = vpop.permute.xlu0 %806 }
 0x1e5   : > { %v764_v4 = vsel %vm4014_vm11, %v761_v1, %v2468_v39  ;;  %v779_v7 = vmul.f32 %v2382_v8, %v772_v53  ;;  %vm4016_vm15 = vmmov %vm4015_vm1  ;;  %v757_v0 = vadd.f32 %v755_v11, %v733_v54  ;;  %vm4017_vm11 = vcmp.ge.f32.partialorder %v2493_v57, 2.0 }
 0x1e6   : > { %v771_v5 = vsel %vm2745_vm10, %v764_v4, 0.0  ;;  %v788_v39 = vsel %vm4016_vm15, %v785_v30, %v2461_v35  ;;  %v756_v25 = vadd.f32 %v754_v32, %v732_v40  ;;  %v794_v29 = vsel %vm4018_vm4, %v787_v23, 0.0 }
 0x1e7   : > { %v778_v61 = vmul.f32 %v2382_v8, %v771_v5  ;;  %v793_v44 = vsel %vm4017_vm11, %v788_v39, 0.0  ;;  %v801_v1 = vmul.f32 %v2388_v9, %v794_v29  ;;  %vm4019_vm1 = vcmp.lt.s32.totalorder %v2459_v34, 1 }
 0x1e8   : > { %v800_v8 = vmul.f32 %v2388_v9, %v793_v44  ;;  %v809_v3 = vsel %vm4019_vm1, %v2473_v43, %v807_v6  ;;  %vm4020_vm15 = vmmov %vm4019_vm1  ;;  %v781_v32 = vadd.f32 %v779_v7, %v757_v0  ;;  %vm4021_vm11 = vcmp.ge.f32.partialorder %v2493_v57, 1.0 }
 0x1e9   : > { %v810_v35 = vsel %vm4020_vm15, %v807_v6, %v2473_v43  ;;  %v780_v30 = vadd.f32 %v778_v61, %v756_v25  ;;  %vm4022_vm4 = vcmp.ge.f32.partialorder %v2495_v58, 1.0  ;;  %v862_v54 = vsel %vm4023_vm13, %v2466_v38, %v860_v26  ;;  %vm4024_vm1 = vmmov %vm4023_vm13  ;;  %v838_v61 = vpop.permute.xlu0 %837 }
 0x1ea   : > { %v815_v11 = vsel %vm4021_vm11, %v810_v35, 0.0  ;;  %v816_v4 = vsel %vm4022_vm4, %v809_v3, 0.0  ;;  %v863_v43 = vsel %vm4024_vm1, %v860_v26, %v2466_v38  ;;  %v803_v53 = vadd.f32 %v801_v1, %v781_v32  ;;  %vm4025_vm15 = vmmov %vm4021_vm11 }
 0x1eb   : > { %v822_v40 = vmul.f32 %v2394_v10, %v815_v11  ;;  %v823_v9 = vmul.f32 %v2394_v10, %v816_v4  ;;  %v802_v5 = vadd.f32 %v800_v8, %v780_v30  ;;  %vm4026_vm11 = vcmp.lt.f32.partialorder %v2479_v48, 15.0  ;;  %v908_v10 = vpop.permute.xlu1 %907 }
 0x1ec   : > { %vm2820_vm4 = vmand %vm4026_vm11, %vm4025_vm15  ;;  %vm4029_vm2 = vcmp.lt.f32.partialorder %v2493_v57, 14.0  ;;  %vm4030_vm1 = vcmp.lt.f32.partialorder %v2495_v58, 14.0  ;;  %vm4031_vm10 = vcmp.lt.s32.totalorder %v2459_v34, 127  ;;  %vm4033_vm11 = vcmp.ge.f32.partialorder %v2495_v58, 1.0 }
 0x1ed   : > { %v868_v23 = vsel %vm4029_vm2, %v862_v54, 0.0  ;;  %v869_v38 = vsel %vm4030_vm1, %v863_v43, 0.0  ;;  %v840_v39 = vsel %vm4031_vm10, %v2477_v47, %v838_v61  ;;  %vm4032_vm15 = vmmov %vm4031_vm10  ;;  %v824_v44 = vadd.f32 %v822_v40, %v802_v5  ;;  %v882_v40 = vpop.permute.xlu0 %881 }
 0x1ee   : > { %v841_v25 = vsel %vm4032_vm15, %v838_v61, %v2477_v47  ;;  %vm2840_vm9 = vmand %vm4034_vm3, %vm4033_vm11  ;;  %v825_v29 = vadd.f32 %v823_v9, %v803_v53  ;;  %vm4037_vm2 = vcmp.lt.f32.partialorder %v2493_v57, 15.0  ;;  %vm4038_vm1 = vcmp.lt.f32.partialorder %v2495_v58, 15.0 }
 0x1ef   : > { %v846_v6 = vsel %vm4037_vm2, %v840_v39, 0.0  ;;  %v847_v26 = vsel %vm4038_vm1, %v841_v25, 0.0  ;;  %vm4039_vm10 = vcmp.ge.f32.partialorder %v2493_v57, 2.0  ;;  %vm4040_vm15 = vcmp.lt.f32.partialorder %v2479_v48, 15.0 }
 0x1f0   : > { %vm2852_vm13 = vmand %vm4040_vm15, %vm4039_vm10  ;;  %v4041_v47 = vmov 0  ;;  %v853_v8 = vmul.f32 %v2402_v12, %v846_v6  ;;  %v854_v1 = vmul.f32 %v2402_v12, %v847_v26  ;;  %vm4044_vm3 = vcmp.lt.s32.totalorder %v2459_v34, 113 }
 0x1f1   : > { %v4042_v47 = vsel %vm2852_vm13, 4294967295, %v4041_v47  ;;  %v910_v3 = vsel %vm4044_vm3, %v2471_v42, %v908_v10  ;;  %vm4045_vm11 = vmmov %vm4044_vm3  ;;  %vm4046_vm2 = vcmp.ge.f32.partialorder %v2495_v58, 2.0  ;;  %vm4047_vm1 = vcmp.lt.f32.partialorder %v2481_v49, 15.0  ;;  %v932_v39 = vpop.permute.xlu0 %931 }
 0x1f2   : > { %4043 = vst [vmem:[#allocation11_spill] sm:$0xff] %v4042_v47  ;;  %v911_v35 = vsel %vm4045_vm11, %v908_v10, %v2471_v42  ;;  %vm2868_vm10 = vmand %vm4047_vm1, %vm4046_vm2  ;;  %v4048_v30 = vmov 0  ;;  %v875_v32 = vmul.f32 %v2404_v13, %v868_v23  ;;  %v876_v12 = vmul.f32 %v2404_v13, %v869_v38  ;;  %v954_v38 = vpop.permute.xlu1 %953 }
 0x1f3   : > { %v4049_v30 = vsel %vm2868_vm10, 4294967295, %v4048_v30  ;;  %v833_v11 = vadd.f32 %v2509_v16, %v824_v44  ;;  %v834_v4 = vadd.f32 %v2513_v31, %v825_v29  ;;  %v918_v42 = vsel %vm2820_vm4, %v910_v3, 0.0 }
 0x1f4   : > { %4050 = vst [vmem:[#allocation12_spill] sm:$0xff] %v4049_v30  ;;  %v919_v9 = vsel %vm2840_vm9, %v911_v35, 0.0  ;;  %vm4051_vm15 = vcmp.lt.s32.totalorder %v2459_v34, 114  ;;  %vm4053_vm2 = vcmp.lt.s32.totalorder %v2459_v34, 112  ;;  %vm4057_vm11 = vcmp.lt.f32.partialorder %v2493_v57, 15.0 }
 0x1f5   : > { %v884_v54 = vsel %vm4051_vm15, %v2485_v51, %v882_v40  ;;  %vm4052_vm3 = vmmov %vm4051_vm15  ;;  %v855_v13 = vadd.f32 %v853_v8, %v833_v11  ;;  %v856_v5 = vadd.f32 %v854_v1, %v834_v4  ;;  %v926_v25 = vmul.f32 %v2416_v15, %v919_v9  ;;  %v978_v4 = vpop.permute.xlu0 %977 }
 0x1f6   : > { %v885_v43 = vsel %vm4052_vm3, %v882_v40, %v2485_v51  ;;  %v894_v16 = vsel %vm2852_vm13, %v884_v54, 0.0  ;;  %v925_v51 = vmul.f32 %v2416_v15, %v918_v42  ;;  %v934_v44 = vsel %vm4053_vm2, %v2491_v56, %v932_v39  ;;  %vm4054_vm1 = vmmov %vm4053_vm2 }
 0x1f7   : > { %v895_v31 = vsel %vm2868_vm10, %v885_v43, 0.0  ;;  %v901_v53 = vmul.f32 %v2414_v14, %v894_v16  ;;  %v877_v10 = vadd.f32 %v875_v32, %v855_v13  ;;  %v878_v23 = vadd.f32 %v876_v12, %v856_v5  ;;  %v1002_v5 = vpop.permute.xlu1 %1001 }
 0x1f8   : > { %v902_v61 = vmul.f32 %v2414_v14, %v895_v31  ;;  %v935_v29 = vsel %vm4054_vm1, %v932_v39, %v2491_v56  ;;  %vm4055_vm15 = vcmp.lt.f32.partialorder %v2479_v48, 15.0  ;;  %vm4056_vm3 = vcmp.lt.f32.partialorder %v2481_v49, 15.0 }
 0x1f9   : > { %v903_v6 = vadd.f32 %v901_v53, %v877_v10  ;;  %v940_v26 = vsel %vm4055_vm15, %v934_v44, 0.0  ;;  %v941_v8 = vsel %vm4056_vm3, %v935_v29, 0.0  ;;  %vm4058_vm10 = vmmov %vm4055_vm15  ;;  %v4059_v15 = vmov 0 }
 0x1fa   : > { %v904_v14 = vadd.f32 %v902_v61, %v878_v23  ;;  %vm2909_vm13 = vmand %vm4058_vm10, %vm4057_vm11  ;;  %vm4062_vm2 = vcmp.lt.s32.totalorder %v2459_v34, 111  ;;  %vm3858_vm15 = vcmp.lt.s32.totalorder %v2459_v34, 110  ;;  %vm4064_vm3 = vcmp.lt.f32.partialorder %v2495_v58, 15.0 }
 0x1fb   : > { %v4060_v15 = vsel %vm2909_vm13, 4294967295, %v4059_v15  ;;  %v956_v56 = vsel %vm4062_vm2, %v2475_v46, %v954_v38  ;;  %vm4063_vm1 = vmmov %vm4062_vm2  ;;  %v4066_v3 = vmov 0  ;;  %v927_v35 = vadd.f32 %v925_v51, %v903_v6 }
 0x1fc   : > { %4061 = vst [vmem:[#allocation13_spill] sm:$0xff] %v4060_v15  ;;  %v957_v1 = vsel %vm4063_vm1, %v954_v38, %v2475_v46  ;;  %vm2924_vm0 = vmand %vm4065_vm7, %vm4064_vm3  ;;  %v928_v32 = vadd.f32 %v926_v25, %v904_v14  ;;  %v947_v12 = vmul.f32 %v2425_v17, %v940_v26  ;;  %v948_v11 = vmul.f32 %v2425_v17, %v941_v8  ;;  %v1028_v38 = vpop.permute.xlu0 %1027  ;;  %v1052_v8 = vpop.permute.xlu1 %1051 }
 0x1fd   : > { %v4067_v3 = vsel %vm2924_vm0, 4294967295, %v4066_v3  ;;  %vm4069_vm10 = vcmp.lt.f32.partialorder %v2493_v57, 14.0  ;;  %vm4070_vm11 = vcmp.lt.f32.partialorder %v2479_v48, 15.0  ;;  %v4071_v46 = vmov 0 }
 0x1fe   : > { %4068 = vst [vmem:[#allocation14_spill] sm:$0xff] %v4067_v3  ;;  %vm2934_vm2 = vmand %vm4070_vm11, %vm4069_vm10  ;;  %vm4074_vm7 = vcmp.lt.f32.partialorder %v2495_v58, 14.0  ;;  %vm4075_vm1 = vcmp.lt.f32.partialorder %v2481_v49, 15.0  ;;  %v4076_v40 = vmov 0  ;;  %v980_v17 = vsel %vm3858_vm15, %v2499_v60, %v978_v4 }
 0x1ff   : > { %v4072_v46 = vsel %vm2934_vm2, 4294967295, %v4071_v46  ;;  %vm2942_vm3 = vmand %vm4075_vm1, %vm4074_vm7  ;;  %v981_v42 = vsel %vm3858_vm15, %v978_v4, %v2499_v60  ;;  %v964_v9 = vsel %vm2909_vm13, %v956_v56, 0.0  ;;  %v965_v54 = vsel %vm2924_vm0, %v957_v1, 0.0 }
 0x200   : > { %4073 = vst [vmem:[#allocation15_spill] sm:$0xff] %v4072_v46  ;;  %v4077_v40 = vsel %vm2942_vm3, 4294967295, %v4076_v40  ;;  %v949_v43 = vadd.f32 %v947_v12, %v927_v35  ;;  %v950_v13 = vadd.f32 %v948_v11, %v928_v32  ;;  %vm3862_vm10 = vcmp.lt.s32.totalorder %v2459_v34, 98 }
 0x201   : > { %4078 = vst [vmem:[#allocation16_spill] sm:$0xff] %v4077_v40  ;;  %vm3889_vm11 = vcmp.lt.f32.partialorder %v2479_v48, 14.0  ;;  %v988_v16 = vsel %vm2934_vm2, %v980_v17, 0.0  ;;  %v989_v60 = vsel %vm2942_vm3, %v981_v42, 0.0  ;;  %v971_v31 = vmul.f32 %v2427_v18, %v964_v9 }
 0x202   : > { %v972_v53 = vmul.f32 %v2427_v18, %v965_v54  ;;  %vm4079_vm1 = vcmp.ge.f32.partialorder %v2493_v57, 2.0  ;;  %v4080_v61 = vmov 0  ;;  %v1004_v10 = vsel %vm3862_vm10, %v2483_v50, %v1002_v5 }
 0x203   : > { %vm2969_vm15 = vmand %vm3889_vm11, %vm4079_vm1  ;;  %v1005_v23 = vsel %vm3862_vm10, %v1002_v5, %v2483_v50  ;;  %vm4083_vm3 = vcmp.ge.f32.partialorder %v2495_v58, 2.0  ;;  %vm4084_vm2 = vcmp.lt.f32.partialorder %v2481_v49, 14.0  ;;  %v4085_v18 = vmov 0 }
 0x204   : > { %v4081_v61 = vsel %vm2969_vm15, 4294967295, %v4080_v61  ;;  %vm2984_vm12 = vmand %vm4084_vm2, %vm4083_vm3  ;;  %v973_v39 = vadd.f32 %v971_v31, %v949_v43  ;;  %v974_v51 = vadd.f32 %v972_v53, %v950_v13  ;;  %v995_v25 = vmul.f32 %v2433_v19, %v988_v16  ;;  %v1074_v43 = vpop.permute.xlu1 %1073  ;;  %v1123_v53 = vpop.permute.xlu0 %1122 }
 0x205   : > { %4082 = vst [vmem:[#allocation17_spill] sm:$0xff] %v4081_v61  ;;  %v4086_v18 = vsel %vm2984_vm12, 4294967295, %v4085_v18  ;;  %v996_v44 = vmul.f32 %v2433_v19, %v989_v60  ;;  %vm4088_vm1 = vcmp.ge.f32.partialorder %v2493_v57, 1.0  ;;  %v4089_v50 = vmov 0 }
 0x206   : > { %4087 = vst [vmem:[#allocation18_spill] sm:$0xff] %v4086_v18  ;;  %vm2994_vm10 = vmand %vm3889_vm11, %vm4088_vm1  ;;  %vm4092_vm7 = vcmp.ge.f32.partialorder %v2495_v58, 1.0  ;;  %v4093_v29 = vmov 0  ;;  %vm4096_vm13 = vcmp.lt.s32.totalorder %v2459_v34, 97  ;;  %v1014_v14 = vsel %vm2969_vm15, %v1004_v10, 0.0 }
 0x207   : > { %v4090_v50 = vsel %vm2994_vm10, 4294967295, %v4089_v50  ;;  %vm3002_vm3 = vmand %vm4084_vm2, %vm4092_vm7  ;;  %v1030_v19 = vsel %vm4096_vm13, %v2523_v41, %v1028_v38  ;;  %v1015_v26 = vsel %vm2984_vm12, %v1005_v23, 0.0  ;;  %v997_v56 = vadd.f32 %v995_v25, %v973_v39 }
 0x208   : > { %4091 = vst [vmem:[#allocation19_spill] sm:$0xff] %v4090_v50  ;;  %v4094_v29 = vsel %vm3002_vm3, 4294967295, %v4093_v29  ;;  %vm4097_vm0 = vmmov %vm4096_vm13  ;;  %v998_v1 = vadd.f32 %v996_v44, %v974_v51  ;;  %vm3867_vm7 = vcmp.lt.s32.totalorder %v2459_v34, 96  ;;  %v1038_v35 = vsel %vm2994_vm10, %v1030_v19, 0.0  ;;  %v1096_v44 = vpop.permute.xlu1 %1095  ;;  %v1098_v19 = vpop.permute.xlu0 %1097 }
 0x209   : > { %4095 = vst [vmem:[#allocation20_spill] sm:$0xff] %v4094_v29  ;;  %v1031_v6 = vsel %vm4097_vm0, %v1028_v38, %v2523_v41  ;;  %v1021_v12 = vmul.f32 %v2435_v20, %v1014_v14  ;;  %v1022_v41 = vmul.f32 %v2435_v20, %v1015_v26  ;;  %v1054_v11 = vsel %vm3867_vm7, %v2489_v55, %v1052_v8  ;;  %vm4098_vm13 = vmmov %vm4084_vm2 }
 0x20a   : > { %v1039_v32 = vsel %vm3002_vm3, %v1031_v6, 0.0  ;;  %v1055_v4 = vsel %vm3867_vm7, %v1052_v8, %v2489_v55  ;;  %v1045_v9 = vmul.f32 %v2437_v21, %v1038_v35  ;;  %v1060_v20 = vsel %vm3889_vm11, %v1054_v11, 0.0  ;;  %vm4104_vm0 = vmmov %vm4098_vm13  ;;  %v4119_v6 = vld [vmem:[#allocation4_spill] sm:$0xff] }
 0x20b   : > { %v1023_v17 = vadd.f32 %v1021_v12, %v997_v56  ;;  %v1024_v42 = vadd.f32 %v1022_v41, %v998_v1  ;;  %v1046_v54 = vmul.f32 %v2437_v21, %v1039_v32  ;;  %v1061_v13 = vsel %vm4098_vm13, %v1055_v4, 0.0  ;;  %v4120_v41 = vld [vmem:[#allocation5_spill] sm:$0xff] }
 0x20c   : > { %vm4099_vm1 = vcmp.lt.f32.partialorder %v2493_v57, 15.0  ;;  %v4100_v55 = vmov 0  ;;  %vm4103_vm7 = vcmp.lt.f32.partialorder %v2495_v58, 15.0  ;;  %v4105_v21 = vmov 0 }
 0x20d   : > { %vm3040_vm2 = vmand %vm3889_vm11, %vm4099_vm1  ;;  %v1047_v5 = vadd.f32 %v1045_v9, %v1023_v17  ;;  %v1048_v16 = vadd.f32 %v1046_v54, %v1024_v42  ;;  %vm4108_vm13 = vcmp.lt.s32.totalorder %v2459_v34, 95  ;;  %v1067_v10 = vmul.f32 %v2439_v22, %v1060_v20 }
 0x20e   : > { %v4101_v55 = vsel %vm3040_vm2, 4294967295, %v4100_v55  ;;  %vm3048_vm3 = vmand %vm4104_vm0, %vm4103_vm7  ;;  %v1076_v60 = vsel %vm4108_vm13, %v2497_v59, %v1074_v43  ;;  %v1068_v23 = vmul.f32 %v2439_v22, %v1061_v13  ;;  %vm3888_vm7 = vcmp.lt.s32.totalorder %v2459_v34, 94 }
 0x20f   : > { %4102 = vst [vmem:[#allocation21_spill] sm:$0xff] %v4101_v55  ;;  %v4106_v21 = vsel %vm3048_vm3, 4294967295, %v4105_v21  ;;  %vm4109_vm1 = vmmov %vm4108_vm13  ;;  %v1084_v38 = vsel %vm3040_vm2, %v1076_v60, 0.0  ;;  %vm4110_vm0 = vcmp.lt.f32.partialorder %v2493_v57, 14.0  ;;  %v4111_v51 = vmov 0 }
 0x210   : > { %4107 = vst [vmem:[#allocation22_spill] sm:$0xff] %v4106_v21  ;;  %v1077_v31 = vsel %vm4109_vm1, %v1074_v43, %v2497_v59  ;;  %vm3069_vm13 = vmand %vm3889_vm11, %vm4110_vm0  ;;  %v1070_v59 = vadd.f32 %v1068_v23, %v1048_v16  ;;  %v1069_v25 = vadd.f32 %v1067_v10, %v1047_v5  ;;  %vm4114_vm1 = vcmp.lt.f32.partialorder %v2495_v58, 14.0 }
 0x211   : > { %v1085_v39 = vsel %vm3048_vm3, %v1077_v31, 0.0  ;;  %v4112_v51 = vsel %vm3069_vm13, 4294967295, %v4111_v51  ;;  %vm4115_vm10 = vcmp.lt.f32.partialorder %v2481_v49, 14.0  ;;  %v4116_v22 = vmov 0 }
 0x212   : > { %4113 = vst [vmem:[#allocation23_spill] sm:$0xff] %v4112_v51  ;;  %vm3077_vm2 = vmand %vm4115_vm10, %vm4114_vm1  ;;  %v1091_v14 = vmul.f32 %v4119_v6, %v1084_v38  ;;  %v1092_v26 = vmul.f32 %v4119_v6, %v1085_v39  ;;  %v1100_v8 = vsel %vm3888_vm7, %v1096_v44, %v1098_v19  ;;  %v1101_v56 = vsel %vm3888_vm7, %v1098_v19, %v1096_v44 }
 0x213   : > { %v4117_v22 = vsel %vm3077_vm2, 4294967295, %v4116_v22  ;;  %v1108_v1 = vsel %vm3069_vm13, %v1100_v8, 0.0  ;;  %v1109_v35 = vsel %vm3077_vm2, %v1101_v56, 0.0  ;;  %vm3887_vm10 = vcmask 1043456  }
 0x214   : > { %4118 = vst [vmem:[#allocation24_spill] sm:$0xff] %v4117_v22  ;;  %v1093_v32 = vadd.f32 %v1091_v14, %v1069_v25  ;;  %v1094_v12 = vadd.f32 %v1092_v26, %v1070_v59  ;;  %v1115_v11 = vmul.f32 %v4120_v41, %v1108_v1  ;;  %v1116_v4 = vmul.f32 %v4120_v41, %v1109_v35 }
 0x215   : > { %vm4123_vm0 = vcmp.lt.s32.totalorder %v2459_v34, 17  ;;  %vm4124_vm1 = vcmp.lt.s32.totalorder %v2459_v34, 16 }
 0x216   : > { %v1117_v17 = vadd.f32 %v1115_v11, %v1093_v32  ;;  %v1118_v42 = vadd.f32 %v1116_v4, %v1094_v12  ;;  %v4121_v12 = vld [vmem:[#allocation2_spill] sm:$0xff]  ;;  %v4122_v11 = vld [vmem:[#allocation3_spill] sm:$0xff]  ;;  %vm4126_vm11 = vmmov %vm4123_vm0 }
 0x217   : > { %vm4127_vm2 = vmmov %vm4124_vm1 }
 0x218   : > { %v1125_v9 = vadd.f32 %v1123_v53, %v1117_v17  ;;  %v1126_v54 = vadd.f32 %v1123_v53, %v1118_v42  ;;  %v1223_v42 = vld [vmem:[%s3783_s6] sm:$0xff] }
 0x21a   : > { %v1129_v43 = vand.u32 2147483647, %v1125_v9  ;;  %v1130_v20 = vand.u32 2147483647, %v1126_v54  ;;  %v1127_v25 = vmax.f32 %v1125_v9, 0.0  ;;  %v1128_v19 = vmax.f32 %v1126_v54, 0.0 }
 0x21c   : > { %v1131_v13 = vsub.f32 0.0, %v1129_v43  ;;  %v1132_v5 = vsub.f32 0.0, %v1130_v20  ;;  %v1307_v43 = vld [vmem:[%s3784_s7 + $0x18] sm:$0xff]  ;;  %v1306_v20 = vld [vmem:[%s3784_s7 + $0x10] sm:$0xff] }
 0x21e   : > { %v1133_v16 = vmul.f32 1.442695, %v1131_v13  ;;  %v1135_v60 = vmul.f32 1.442695, %v1132_v5  ;;  %v1309_v13 = vld [vmem:[%s3784_s7 + $0x28] sm:$0xff]  ;;  %v1308_v5 = vld [vmem:[%s3784_s7 + $0x20] sm:$0xff] }
 0x220   : > { %2079 = vpow2.f32 %v1133_v16  ;;  %v1311_v16 = vld [vmem:[%s3784_s7 + $0x38] sm:$0xff] }
 0x221   : > { %2081 = vpow2.f32 %v1135_v60  ;;  %v1310_v60 = vld [vmem:[%s3784_s7 + $0x30] sm:$0xff] }
 0x22a   : > { %v2080_v31 = vpop.eup %2079 }
 0x22b   : > { %v2082_v10 = vpop.eup %2081  ;;  %v1137_v23 = vadd.f32 1.0, %v2080_v31  ;;  %v1313_v31 = vld [vmem:[%s3784_s7 + $0x48] sm:$0xff] }
 0x22c   : > { %v1138_v38 = vadd.f32 1.0, %v2082_v10  ;;  %v1312_v10 = vld [vmem:[%s3784_s7 + $0x40] sm:$0xff] }
 0x22d   : > { %2083 = vlog2.f32 %v1137_v23  ;;  %v1315_v23 = vld [vmem:[%s3784_s7 + $0x58] sm:$0xff] }
 0x22e   : > { %2085 = vlog2.f32 %v1138_v38  ;;  %v1314_v38 = vld [vmem:[%s3784_s7 + $0x50] sm:$0xff] }
 0x237   : > { %v2084_v39 = vpop.eup %2083 }
 0x238   : > { %v2086_v59 = vpop.eup %2085  ;;  %v1140_v44 = vmul.f32 0.6931472, %v2084_v39  ;;  %v1317_v39 = vld [vmem:[%s3784_s7 + $0x68] sm:$0xff] }
 0x239   : > { %v1142_v53 = vmul.f32 0.6931472, %v2086_v59  ;;  %v1316_v59 = vld [vmem:[%s3784_s7 + $0x60] sm:$0xff] }
 0x23a   : > { %v1143_v6 = vadd.f32 %v1140_v44, %v1127_v25  ;;  %v1319_v25 = vld [vmem:[%s3784_s7 + $0x78] sm:$0xff]  ;;  %v1318_v44 = vld [vmem:[%s3784_s7 + $0x70] sm:$0xff] }
 0x23b   : > { %v1144_v14 = vadd.f32 %v1142_v53, %v1128_v19  ;;  %v1321_v19 = vld [vmem:[%s3784_s7 + $0x88] sm:$0xff]  ;;  %v1320_v53 = vld [vmem:[%s3784_s7 + $0x80] sm:$0xff] }
 0x23c   : > { %2087 = vtanh.f32 %v1143_v6  ;;  %v1323_v6 = vld [vmem:[%s3784_s7 + $0x98] sm:$0xff] }
 0x23d   : > { %2089 = vtanh.f32 %v1144_v14  ;;  %v1322_v14 = vld [vmem:[%s3784_s7 + $0x90] sm:$0xff] }
 0x246   : > { %v2088_v26 = vpop.eup %2087 }
 0x247   : > { %v2090_v8 = vpop.eup %2089  ;;  %v1147_v56 = vmul.f32 %v2088_v26, %v1125_v9  ;;  %v1305_v9 = vld [vmem:[%s3784_s7 + $0x8] sm:$0xff] }
 0x248   : > { %v1148_v1 = vmul.f32 %v2090_v8, %v1126_v54  ;;  %v1304_v54 = vld [vmem:[%s3784_s7] sm:$0xff]  ;;  %v1325_v26 = vld [vmem:[%s3784_s7 + $0xa8] sm:$0xff] }
 0x249   : > { %v1151_v35 = vrot.slane %v1147_v56, 4  ;;  %v1324_v8 = vld [vmem:[%s3784_s7 + $0xa0] sm:$0xff]  ;;  %v1327_v56 = vld [vmem:[%s3784_s7 + $0xb8] sm:$0xff] }
 0x24a   : > { %v1152_v32 = vrot.slane %v1148_v1, 4  ;;  %v1326_v1 = vld [vmem:[%s3784_s7 + $0xb0] sm:$0xff] }
 0x24b   : > { %v3095_v41 = vsel %vm3887_vm10, %v4121_v12, %v1151_v35  ;;  %v1328_v35 = vld [vmem:[%s3784_s7 + $0xc0] sm:$0xff] }
 0x24c   : > { %v3099_v4 = vsel %vm3887_vm10, %v4122_v11, %v1152_v32  ;;  %vm4125_vm10 = vcmp.ge.f32.partialorder %v2481_v49, 1.0 }
 0x24d   : > { %v2037_v17 = vpack.i.bf16 %v3099_v4, %v3095_v41  ;;  %vm1968_vm7 = vmpackc.low %vm4125_vm10, %vm2684_vm14  ;;  %vm4129_vm10 = vcmp.lt.s32.totalorder %v2459_v34, 1 }
 0x24f   : > { %2038 = vrot.lane.b32.xlu0 %v2037_v17, %s3885_s21  ;;  %2033 = vrot.lane.b32.xlu1 %v2037_v17, %s3883_s14  ;;  %s4155_s14 = smov 32   ;;  %s4156_s21 = smov 18  }
 0x253   : > { %2048 = vrot.lane.b32.xlu0 %v2037_v17, %s3939_s12  ;;  %2043 = vrot.lane.b32.xlu1 %v2037_v17, %s3877_s16  ;;  %s4159_s16 = smov 17  }
 0x257   : > { %2058 = vrot.lane.b32.xlu0 %v2037_v17, %s3941_s29  ;;  %2053 = vrot.lane.b32.xlu1 %v2037_v17, %s3879_s28  ;;  %s4162_s28 = smov 2  }
 0x25b   : > { %1214 = vrot.lane.b32.xlu0 %v3095_v41, %s3942_s20  ;;  %2063 = vrot.lane.b32.xlu1 %v2037_v17, %s3881_s26  ;;  %s4161_s26 = smov 15  }
 0x25f   : > { %1226 = vperm.xlu0 %2030, %v1223_v42   ;;  %1216 = vrot.lane.b32.xlu1 %v3099_v4, %s3942_s20 }
 0x263   : > { %1356 = vperm.xlu0 %2030, %v1305_v9   ;;  %1339 = vperm.xlu1 %2031, %v1304_v54  }
 0x267   : > { %1390 = vperm.xlu0 %2030, %v1307_v43   ;;  %1373 = vperm.xlu1 %2031, %v1306_v20  }
 0x26b   : > { %1424 = vperm.xlu0 %2030, %v1309_v13   ;;  %1407 = vperm.xlu1 %2031, %v1308_v5  }
 0x26f   : > { %1458 = vperm.xlu0 %2030, %v1311_v16   ;;  %1441 = vperm.xlu1 %2031, %v1310_v60  }
 0x273   : > { %1492 = vperm.xlu0 %2030, %v1313_v31   ;;  %1475 = vperm.xlu1 %2031, %v1312_v10  }
 0x277   : > { %1526 = vperm.xlu0 %2030, %v1315_v23   ;;  %1509 = vperm.xlu1 %2031, %v1314_v38  }
 0x27b   : > { %1552 = vperm.xlu0 %2030, %v1317_v39   ;;  %1535 = vperm.xlu1 %2031, %v1316_v59  }
 0x27f   : > { %1586 = vperm.xlu0 %2030, %v1319_v25   ;;  %1569 = vperm.xlu1 %2031, %v1318_v44  }
 0x283   : > { %1620 = vperm.xlu0 %2030, %v1321_v19   ;;  %1603 = vperm.xlu1 %2031, %v1320_v53  }
 0x287   : > { %1654 = vperm.xlu0 %2030, %v1323_v6   ;;  %1637 = vperm.xlu1 %2031, %v1322_v14  }
 0x28b   : > { %1688 = vperm.xlu0 %2030, %v1325_v26   ;;  %1671 = vperm.xlu1 %2031, %v1324_v8  }
 0x28f   : > { %1722 = vperm.xlu0 %2030, %v1327_v56   ;;  %1705 = vperm.xlu1 %2031, %v1326_v1  }
 0x293   : > { %1739 = vperm.xlu1 %2031, %v1328_v35  }
 0x2c1   : > { %v2039_v32 = vpop.permute.xlu0 %2038  ;;  %v2034_v12 = vpop.permute.xlu1 %2033 }
 0x2c2   : > { %v2041_v11 = vunpack.i.h.bf16 %v2039_v32  ;;  %v2040_v17 = vunpack.i.l.bf16 %v2039_v32  ;;  %v2036_v42 = vunpack.i.h.bf16 %v2034_v12  ;;  %v2035_v9 = vunpack.i.l.bf16 %v2034_v12 }
 0x2c4   : > { %v1162_v54 = vsel %vm4123_vm0, %v2035_v9, %v2036_v42  ;;  %v1170_v43 = vsel %vm4124_vm1, %v2040_v17, %v2041_v11  ;;  %v1163_v20 = vsel %vm4126_vm11, %v2036_v42, %v2035_v9  ;;  %v1171_v13 = vsel %vm4127_vm2, %v2041_v11, %v2040_v17  ;;  %vm4130_vm11 = vmmov %vm4129_vm10 }
 0x2c5   : > { %v2049_v5 = vpop.permute.xlu0 %2048  ;;  %v2044_v16 = vpop.permute.xlu1 %2043  ;;  %v1967_v60 = vpack.c.bf16 %v1170_v43, %v1162_v54  ;;  %v1970_v31 = vpack.c.bf16 %v1171_v13, %v1163_v20  ;;  %vm4128_vm0 = vcmp.ge.f32.partialorder %v2479_v48, 1.0  ;;  %vm4131_vm2 = vcmp.lt.s32.totalorder %v2459_v34, 15 }
 0x2c6   : > { %vm1971_vm1 = vmpackc.low %vm4128_vm0, %vm2672_vm8  ;;  %v2051_v10 = vunpack.i.h.bf16 %v2049_v5  ;;  %v2050_v23 = vunpack.i.l.bf16 %v2049_v5  ;;  %v2046_v38 = vunpack.i.h.bf16 %v2044_v16  ;;  %v2045_v39 = vunpack.i.l.bf16 %v2044_v16 }
 0x2c7   : > { %1969 = vmatprep.subr.msk.bf16.mxu1 %vm1968_vm7, %v1967_v60  ;;  %vm4132_vm13 = vmmov %vm4131_vm2  ;;  %vm4133_vm0 = vcmp.ge.f32.partialorder %v2495_v58, 1.0  ;;  %vm4134_vm7 = vcmp.ge.f32.partialorder %v2493_v57, 1.0 }
 0x2c8   : > { %v1186_v59 = vsel %vm4129_vm10, %v2050_v23, %v2051_v10  ;;  %v1187_v25 = vsel %vm4130_vm11, %v2051_v10, %v2050_v23  ;;  %v1178_v44 = vsel %vm4131_vm2, %v2045_v39, %v2046_v38  ;;  %v1179_v19 = vsel %vm4132_vm13, %v2046_v38, %v2045_v39  ;;  %1972 = vmatpush1.bf16.msk.msra.mxu1 %vm1971_vm1, %v1970_v31  ;;  %vm1974_vm3 = vmpackc.low %vm4133_vm0, %vm2732_vm6  ;;  %v1222_v10 = vld [vmem:[%s4147_s5] sm:$0xff]  ;;  %s4169_s5 = smov 33  }
 0x2c9   : > { %v1973_v53 = vpack.c.bf16 %v1186_v59, %v1178_v44  ;;  %v1976_v6 = vpack.c.bf16 %v1187_v25, %v1179_v19  ;;  %v2059_v14 = vpop.permute.xlu0 %2058  ;;  %v2054_v26 = vpop.permute.xlu1 %2053  ;;  %vm1977_vm10 = vmpackc.low %vm4134_vm7, %vm2715_vm5  ;;  %vm4135_vm13 = vcmp.lt.s32.totalorder %v2459_v34, 127  ;;  %vm2125_vm11 = vmmov 1   ;;  %v1754_v38 = vld [vmem:[%s3786_s9] sm:$0xff]  ;;  %v1755_v59 = vld [vmem:[%s3786_s9 + $0x8] sm:$0xff] }
 0x2ca   : > { %v2056_v8 = vunpack.i.h.bf16 %v2054_v26  ;;  %v2055_v56 = vunpack.i.l.bf16 %v2054_v26  ;;  %v2061_v1 = vunpack.i.h.bf16 %v2059_v14  ;;  %v2060_v35 = vunpack.i.l.bf16 %v2059_v14  ;;  %vm4136_vm1 = vmmov %vm4135_vm13 }
 0x2cb   : > { %1975 = vmatprep.subr.msk.bf16.mxu1 %vm1974_vm3, %v1973_v53  ;;  %vm4137_vm2 = vcmp.lt.f32.partialorder %v2495_v58, 15.0  ;;  %vm4138_vm3 = vcmp.lt.f32.partialorder %v2493_v57, 15.0  ;;  %v4151_v39 = vmov 0.0  }
 0x2cc   : > { %v1194_v32 = vsel %vm4135_vm13, %v2055_v56, %v2056_v8  ;;  %v1195_v12 = vsel %vm4136_vm1, %v2056_v8, %v2055_v56  ;;  %1978 = vmatpush1.bf16.msk.msra.mxu1 %vm1977_vm10, %v1976_v6  ;;  %vm1980_vm0 = vmpackc.low %vm4137_vm2, %vm2125_vm11  ;;  %vm4139_vm13 = vcmp.lt.s32.totalorder %v2459_v34, 113  ;;  %vm4141_vm1 = vcmp.lt.s32.totalorder %v2459_v34, 112 }
 0x2cd   : > { %v1979_v11 = vpack.c.bf16 %v1195_v12, %v3099_v4  ;;  %v1982_v17 = vpack.c.bf16 %v1194_v32, %v3095_v41  ;;  %v2064_v42 = vpop.permute.xlu1 %2063  ;;  %vm1983_vm7 = vmpackc.low %vm4138_vm3, %vm2125_vm11  ;;  %v1202_v43 = vsel %vm4139_vm13, %v2060_v35, %v2061_v1  ;;  %vm4143_vm11 = vcmp.lt.f32.partialorder %v2481_v49, 15.0  ;;  %v1215_v60 = vpop.permute.xlu0 %1214 }
 0x2ce   : > { %v2066_v9 = vunpack.i.h.bf16 %v2064_v42  ;;  %v2065_v54 = vunpack.i.l.bf16 %v2064_v42  ;;  %vm4140_vm10 = vmmov %vm4139_vm13 }
 0x2cf   : > { %1981 = vmatprep.subr.msk.bf16.mxu1 %vm1980_vm0, %v1979_v11  ;;  %v1203_v20 = vsel %vm4140_vm10, %v2061_v1, %v2060_v35  ;;  %vm4142_vm2 = vmmov %vm4141_vm1  ;;  %vm4144_vm0 = vcmp.lt.f32.partialorder %v2479_v48, 15.0  ;;  %vm4145_vm10 = vcmp.lt.s32.totalorder %v2459_v34, 111 }
 0x2d0   : > { %v1210_v13 = vsel %vm4141_vm1, %v2065_v54, %v2066_v9  ;;  %v1211_v4 = vsel %vm4142_vm2, %v2066_v9, %v2065_v54  ;;  %1984 = vmatpush1.bf16.msk.msra.mxu1 %vm1983_vm7, %v1982_v17  ;;  %vm1986_vm3 = vmpackc.low %vm4143_vm11, %vm2840_vm9  ;;  %vm4146_vm7 = vnez %v4067_v3  ;;  %vm1229_vm1 = vcmask 588800   ;;  %v1746_v9 = vld [vmem:[%s3785_s8] sm:$0xff] }
 0x2d1   : > { %v1985_v41 = vpack.c.bf16 %v1211_v4, %v1203_v20  ;;  %v1988_v5 = vpack.c.bf16 %v1210_v13, %v1202_v43  ;;  %v1217_v16 = vpop.permute.xlu1 %1216  ;;  %vm1989_vm13 = vmpackc.low %vm4144_vm0, %vm2820_vm4  ;;  %vm4149_vm11 = vnez %v4060_v15 }
 0x2d2   : > { %v1219_v31 = vsel %vm4145_vm10, %v1217_v16, %v1215_v60  ;;  %vm4148_vm2 = vmmov %vm4145_vm10 }
 0x2d3   : > { %1987 = vmatprep.subr.msk.bf16.mxu1 %vm1986_vm3, %v1985_v41  ;;  %v1218_v23 = vsel %vm4148_vm2, %v1215_v60, %v1217_v16  ;;  %vm4150_vm3 = vcmask 130048   ;;  %v1756_v60 = vld [vmem:[%s3787_s10] sm:$0xff] }
 0x2d4   : > { %1990 = vmatpush1.bf16.msk.msra.mxu1 %vm1989_vm13, %v1988_v5  ;;  %1957 = vmatmul.mubr.msk.f32.vlgmr.msra.gmra.mrb[2].mxu0 %vm4150_vm3, %v1754_v38  ;;  %vm4152_vm0 = vmmov %vm4150_vm3  ;;  %vm4193_vm13 = vcmp.lt.s32.totalorder %v2459_v34, 33  ;;  %vm4199_vm3 = vcmp.lt.s32.totalorder %v2459_v34, 34 }
 0x2d5   : > { %1954 = vmatprep.subr.msk.mxu1 %vm4146_vm7, %v1219_v31  ;;  %1844 = vmatprep.mubr.f32.mxu0 %v4151_v39  ;;  %vm4194_vm10 = vmmov %vm4193_vm13 }
 0x2d8   : > { %1955 = vmatpush1.msk.msra.mxu1 %vm4149_vm11, %v1218_v23  ;;  %1958 = vmatmul.mubr.msk.f32.gmra.mrb[4].mxu0 %vm4152_vm0, %v1755_v59  ;;  %vm4200_vm0 = vmmov %vm4199_vm3 }
 0x2d9   : > { %1956 = vmatmul.mubr.msk.f32.vlgmr.msra.gmra.mrb[0].mxu1 %vm1229_vm1, %v1222_v10  ;;  %v1757_v10 = vld [vmem:[%s3787_s10 + $0x8] sm:$0xff] }
 0x2de   : > { %v1227_v25 = vpop.permute.xlu0 %1226 }
 0x2e2   : > { %v3312_v6 = vpop.permute.xlu1 %1339  ;;  %v3320_v26 = vpop.permute.xlu0 %1356 }
 0x2e6   : > { %v3322_v8 = vpop.permute.xlu1 %1373  ;;  %v3332_v56 = vpop.permute.xlu0 %1390 }
 0x2ea   : > { %v3334_v1 = vpop.permute.xlu1 %1407  ;;  %v3340_v35 = vpop.permute.xlu0 %1424 }
 0x2ee   : > { %v3342_v32 = vpop.permute.xlu1 %1441  ;;  %v3352_v12 = vpop.permute.xlu0 %1458 }
 0x2f2   : > { %v3354_v11 = vpop.permute.xlu1 %1475  ;;  %v3360_v17 = vpop.permute.xlu0 %1492 }
 0x2f6   : > { %v3362_v42 = vpop.permute.xlu1 %1509  ;;  %v3373_v54 = vpop.permute.xlu0 %1526 }
 0x2fa   : > { %v3375_v43 = vpop.permute.xlu1 %1535  ;;  %v3381_v20 = vpop.permute.xlu0 %1552 }
 0x2fe   : > { %v3383_v13 = vpop.permute.xlu1 %1569  ;;  %v3393_v4 = vpop.permute.xlu0 %1586 }
 0x2ff   : > { %4171 = vst [vmem:[#allocation4_spill] sm:$0xff] %v3383_v13  ;;  %4172 = vst [vmem:[#allocation5_spill] sm:$0xff] %v3393_v4  ;;  %v4203_v13 = vld [vmem:[#allocation7_spill] sm:$0xff] }
 0x302   : > { %v3395_v41 = vpop.permute.xlu1 %1603  ;;  %v3401_v5 = vpop.permute.xlu0 %1620 }
 0x303   : > { %4173 = vst [vmem:[#allocation2_spill] sm:$0xff] %v3395_v41  ;;  %4174 = vst [vmem:[#allocation3_spill] sm:$0xff] %v3401_v5 }
 0x306   : > { %v3403_v16 = vpop.permute.xlu1 %1637  ;;  %v3421_v38 = vpop.permute.xlu0 %1654  ;;  %v4254_v0 = vld [vmem:[#allocation4_spill] sm:$0xff] }
 0x307   : > { %4175 = vst [vmem:[#allocation25_spill] sm:$0xff] %v3403_v16  ;;  %4178 = vst [vmem:[#allocation28_spill] sm:$0xff] %v3421_v38 }
 0x30a   : > { %v3423_v39 = vpop.permute.xlu1 %1671 }
 0x30b   : > { %4179 = vst [vmem:[#allocation29_spill] sm:$0xff] %v3423_v39 }
 0x3a7   : > { %v3414_v31 = vpop.f32.mrb[2].mxu0 }
 0x3a8   : > { %4176 = vst [vmem:[#allocation26_spill] sm:$0xff] %v3414_v31  ;;  %v3419_v23 = vpop.f32.mrb[3].mxu0 }
 0x3a9   : > { %4177 = vst [vmem:[#allocation27_spill] sm:$0xff] %v3419_v23 }
 0x3ab   : > { %v3425_v59 = vpop.f32.mrb[4].mxu0 }
 0x3ac   : > { %v1299_v44 = vpop.f32.mrb[0].mxu1  ;;  %4180 = vst [vmem:[#allocation30_spill] sm:$0xff] %v3425_v59 }
 0x3ad   : > { %v3270_v19 = vadd.f32 %v1299_v44, %v1227_v25  ;;  %v1301_v53 = vpop.f32.mrb[1].mxu1  ;;  %v3429_v44 = vpop.permute.xlu0 %1688 }
 0x3ae   : > { %v3318_v14 = vadd.f32 %v1301_v53, %v1227_v25  ;;  %v3427_v25 = vpop.f32.mrb[5].mxu0  ;;  %4182 = vst [vmem:[#allocation32_spill] sm:$0xff] %v3429_v44  ;;  %v3431_v53 = vpop.permute.xlu1 %1705 }
 0x3af   : > { %1346 = vrot.lane.b32.xlu0 %v3270_v19, %s3893_s13  ;;  %1329 = vrot.lane.b32.xlu1 %v3270_v19, %s4153_s30  ;;  %s4163_s13 = smov 127   ;;  %4181 = vst [vmem:[#allocation31_spill] sm:$0xff] %v3427_v25  ;;  %4183 = vst [vmem:[#allocation33_spill] sm:$0xff] %v3431_v53 }
 0x3b3   : > { %1380 = vrot.lane.b32.xlu0 %v3270_v19, %s4154_s22  ;;  %1363 = vrot.lane.b32.xlu1 %v3270_v19, %s4155_s14 }
 0x3b7   : > { %1414 = vrot.lane.b32.xlu0 %v3270_v19, %s4156_s21  ;;  %1397 = vrot.lane.b32.xlu1 %v3270_v19, %s4157_s23 }
 0x3bb   : > { %1448 = vrot.lane.b32.xlu0 %v3270_v19, %s4158_s27  ;;  %1431 = vrot.lane.b32.xlu1 %v3270_v19, %s4159_s16 }
 0x3bf   : > { %1482 = vrot.lane.b32.xlu0 %v3270_v19, %s4160_s25  ;;  %1465 = vrot.lane.b32.xlu1 %v3270_v19, %s4161_s26 }
 0x3c3   : > { %1516 = vrot.lane.b32.xlu0 %v3270_v19, %s3939_s12  ;;  %1499 = vrot.lane.b32.xlu1 %v3270_v19, %s4162_s28 }
 0x3c7   : > { %1542 = vrot.lane.b32.xlu0 %v3270_v19, %s4163_s13  ;;  %1559 = vrot.lane.b32.xlu1 %v3270_v19, %s3940_s19 }
 0x3cb   : > { %1593 = vrot.lane.b32.xlu0 %v3270_v19, %s3941_s29  ;;  %1576 = vrot.lane.b32.xlu1 %v3270_v19, %s4164_s0 }
 0x3cf   : > { %1627 = vrot.lane.b32.xlu0 %v3270_v19, %s3942_s20  ;;  %1610 = vrot.lane.b32.xlu1 %v3270_v19, %s4165_s1 }
 0x3d3   : > { %1661 = vrot.lane.b32.xlu0 %v3270_v19, %s3943_s24  ;;  %1644 = vrot.lane.b32.xlu1 %v3270_v19, %s4166_s2 }
 0x3d7   : > { %1695 = vrot.lane.b32.xlu0 %v3270_v19, %s3944_s15  ;;  %1678 = vrot.lane.b32.xlu1 %v3270_v19, %s4167_s3 }
 0x3db   : > { %1712 = vrot.lane.b32.xlu0 %v3270_v19, %s4168_s4  ;;  %1348 = vrot.lane.b32.xlu1 %v3318_v14, %s4169_s5  ;;  %s4170_s5 = smov 94  }
 0x3df   : > { %1331 = vrot.lane.b32.xlu0 %v3318_v14, %s4153_s30  ;;  %1382 = vrot.lane.b32.xlu1 %v3318_v14, %s4154_s22 }
 0x3e3   : > { %1365 = vrot.lane.b32.xlu0 %v3318_v14, %s4155_s14  ;;  %1416 = vrot.lane.b32.xlu1 %v3318_v14, %s4156_s21 }
 0x3e7   : > { %1399 = vrot.lane.b32.xlu0 %v3318_v14, %s4157_s23  ;;  %1450 = vrot.lane.b32.xlu1 %v3318_v14, %s4158_s27 }
 0x3eb   : > { %1433 = vrot.lane.b32.xlu0 %v3318_v14, %s4159_s16  ;;  %1484 = vrot.lane.b32.xlu1 %v3318_v14, %s4160_s25 }
 0x3ef   : > { %1467 = vrot.lane.b32.xlu0 %v3318_v14, %s4161_s26  ;;  %1729 = vrot.lane.b32.xlu1 %v3270_v19, %s4170_s5 }
 0x3f3   : > { %1501 = vrot.lane.b32.xlu0 %v3318_v14, %s4162_s28  ;;  %1518 = vrot.lane.b32.xlu1 %v3318_v14, %s3939_s12 }
 0x3f7   : > { %1749 = vperm.xlu0 %2030, %v1746_v9   ;;  %1544 = vrot.lane.b32.xlu1 %v3318_v14, %s4163_s13  ;;  %v3433_v9 = vpop.permute.xlu0 %1722 }
 0x3f8   : > { %4184 = vst [vmem:[#allocation34_spill] sm:$0xff] %v3433_v9 }
 0x3fb   : > { %1561 = vrot.lane.b32.xlu0 %v3318_v14, %s3940_s19  ;;  %1595 = vrot.lane.b32.xlu1 %v3318_v14, %s3941_s29 }
 0x3ff   : > { %1578 = vrot.lane.b32.xlu0 %v3318_v14, %s4164_s0  ;;  %1629 = vrot.lane.b32.xlu1 %v3318_v14, %s3942_s20 }
 0x403   : > { %1612 = vrot.lane.b32.xlu0 %v3318_v14, %s4165_s1  ;;  %1663 = vrot.lane.b32.xlu1 %v3318_v14, %s3943_s24 }
 0x407   : > { %1646 = vrot.lane.b32.xlu0 %v3318_v14, %s4166_s2  ;;  %1697 = vrot.lane.b32.xlu1 %v3318_v14, %s3944_s15 }
 0x40b   : > { %1680 = vrot.lane.b32.xlu0 %v3318_v14, %s4167_s3  ;;  %1714 = vrot.lane.b32.xlu1 %v3318_v14, %s4168_s4  ;;  %s4319_s3 = sshll.u32 %s4327_s18, 5 }
 0x40c   : > { %s386_s13 = scalar_lea.vmem %s3788_s11, %s4319_s3 }
 0x40f   : > { %1731 = vrot.lane.b32.xlu0 %v3318_v14, %s4170_s5  ;;  %1760 = vperm.xlu1 %2031, %v1756_v60   ;;  %v3435_v60 = vpop.permute.xlu1 %1739 }
 0x410   : > { %4185 = vst [vmem:[#allocation35_spill] sm:$0xff] %v3435_v60 }
 0x413   : > { %1765 = vperm.xlu0 %2030, %v1757_v10  }
 0x421   : > { %v1347_v31 = vpop.permute.xlu0 %1346  ;;  %v1330_v22 = vpop.permute.xlu1 %1329 }
 0x425   : > { %v1381_v23 = vpop.permute.xlu0 %1380  ;;  %v1364_v51 = vpop.permute.xlu1 %1363 }
 0x429   : > { %v1415_v21 = vpop.permute.xlu0 %1414  ;;  %v1398_v55 = vpop.permute.xlu1 %1397 }
 0x42d   : > { %v3437_v29 = vpop.permute.xlu0 %1448  ;;  %v3439_v10 = vpop.permute.xlu1 %1431 }
 0x431   : > { %v3441_v59 = vpop.permute.xlu0 %1482  ;;  %v3443_v25 = vpop.permute.xlu1 %1465 }
 0x435   : > { %v3445_v44 = vpop.permute.xlu0 %1516  ;;  %v3447_v53 = vpop.permute.xlu1 %1499 }
 0x439   : > { %v3449_v9 = vpop.permute.xlu0 %1542  ;;  %v3451_v60 = vpop.permute.xlu1 %1559 }
 0x43d   : > { %v3453_v50 = vpop.permute.xlu0 %1593  ;;  %v3455_v38 = vpop.permute.xlu1 %1576 }
 0x43e   : > { %4186 = vst [vmem:[#allocation36_spill] sm:$0xff] %v3455_v38  ;;  %v4197_v38 = vld [vmem:[#allocation9_spill] sm:$0xff] }
 0x43f   : > { %vm4198_vm2 = vnez %v4197_v38 }
 0x441   : > { %v3457_v39 = vpop.permute.xlu0 %1627  ;;  %v3459_v40 = vpop.permute.xlu1 %1610 }
 0x442   : > { %4187 = vst [vmem:[#allocation37_spill] sm:$0xff] %v3459_v40  ;;  %v4195_v40 = vld [vmem:[#allocation8_spill] sm:$0xff] }
 0x443   : > { %vm4196_vm1 = vnez %v4195_v40 }
 0x445   : > { %v3461_v46 = vpop.permute.xlu0 %1661  ;;  %v3463_v16 = vpop.permute.xlu1 %1644 }
 0x446   : > { %4188 = vst [vmem:[#allocation38_spill] sm:$0xff] %v3461_v46  ;;  %4189 = vst [vmem:[#allocation39_spill] sm:$0xff] %v3463_v16 }
 0x449   : > { %v3465_v18 = vpop.permute.xlu0 %1695  ;;  %v3467_v61 = vpop.permute.xlu1 %1678 }
 0x44a   : > { %4190 = vst [vmem:[#allocation40_spill] sm:$0xff] %v3465_v18  ;;  %4191 = vst [vmem:[#allocation41_spill] sm:$0xff] %v3467_v61  ;;  %v4201_v18 = vld [vmem:[#allocation6_spill] sm:$0xff] }
 0x44b   : > { %vm4202_vm12 = vnez %v4201_v18 }
 0x44d   : > { %v3469_v5 = vpop.permute.xlu0 %1712  ;;  %v1349_v4 = vpop.permute.xlu1 %1348 }
 0x44e   : > { %4192 = vst [vmem:[#allocation42_spill] sm:$0xff] %v3469_v5  ;;  %v1350_v30 = vsel %vm4193_vm13, %v1347_v31, %v1349_v4  ;;  %v1351_v47 = vsel %vm4194_vm10, %v1349_v4, %v1347_v31  ;;  %vm4204_vm13 = vnez %v4203_v13  ;;  %vm4205_vm10 = vcmp.lt.s32.totalorder %v2459_v34, 31 }
 0x44f   : > { %v1352_v46 = vsel %vm4196_vm1, %v1351_v47, 0.0  ;;  %v1353_v16 = vsel %vm4198_vm2, %v1350_v30, 0.0  ;;  %vm4206_vm1 = vmmov %vm4205_vm10  ;;  %vm4208_vm2 = vnez %v3963_v45 }
 0x450   : > { %v1359_v38 = vmul.f32 %v3320_v26, %v1352_v46 }
 0x451   : > { %v1332_v3 = vpop.permute.xlu0 %1331  ;;  %v1383_v15 = vpop.permute.xlu1 %1382 }
 0x452   : > { %v1333_v61 = vsel %vm4199_vm3, %v1330_v22, %v1332_v3  ;;  %v1334_v5 = vsel %vm4200_vm0, %v1332_v3, %v1330_v22  ;;  %v1384_v31 = vsel %vm4205_vm10, %v1381_v23, %v1383_v15  ;;  %v1385_v47 = vsel %vm4206_vm1, %v1383_v15, %v1381_v23 }
 0x453   : > { %v1335_v41 = vsel %vm4202_vm12, %v1334_v5, 0.0  ;;  %v1336_v4 = vsel %vm4204_vm13, %v1333_v61, 0.0  ;;  %v1360_v3 = vmul.f32 %v3320_v26, %v1353_v16  ;;  %vm4207_vm12 = vnez %v3961_v28 }
 0x454   : > { %v1342_v30 = vmul.f32 %v3312_v6, %v1335_v41  ;;  %v1343_v40 = vmul.f32 %v3312_v6, %v1336_v4  ;;  %v1386_v13 = vsel %vm4207_vm12, %v1385_v47, 0.0  ;;  %v1387_v61 = vsel %vm4208_vm2, %v1384_v31, 0.0 }
 0x455   : > { %v1366_v22 = vpop.permute.xlu0 %1365  ;;  %v1417_v18 = vpop.permute.xlu1 %1416  ;;  %vm4209_vm3 = vcmp.lt.s32.totalorder %v2459_v34, 32  ;;  %vm4211_vm13 = vcmp.ge.f32.partialorder %v2479_v48, 2.0  ;;  %vm4212_vm10 = vcmp.ge.f32.partialorder %v2481_v49, 2.0  ;;  %vm4213_vm1 = vcmp.lt.s32.totalorder %v2459_v34, 18 }
 0x456   : > { %v1367_v5 = vsel %vm4209_vm3, %v1364_v51, %v1366_v22  ;;  %vm4210_vm0 = vmmov %vm4209_vm3  ;;  %v1361_v41 = vadd.f32 %v1359_v38, %v1342_v30  ;;  %v1362_v6 = vadd.f32 %v1360_v3, %v1343_v40  ;;  %v1418_v45 = vsel %vm4213_vm1, %v1415_v21, %v1417_v18 }
 0x457   : > { %v1368_v15 = vsel %vm4210_vm0, %v1366_v22, %v1364_v51  ;;  %v1370_v26 = vsel %vm4212_vm10, %v1367_v5, 0.0  ;;  %vm4214_vm12 = vmmov %vm4213_vm1  ;;  %v1393_v51 = vmul.f32 %v3332_v56, %v1386_v13  ;;  %v1394_v4 = vmul.f32 %v3332_v56, %v1387_v61  ;;  %v4220_v56 = vld [vmem:[#allocation10_spill] sm:$0xff] }
 0x458   : > { %v1369_v46 = vsel %vm4211_vm13, %v1368_v15, 0.0  ;;  %v1377_v16 = vmul.f32 %v3322_v8, %v1370_v26  ;;  %v1419_v23 = vsel %vm4214_vm12, %v1417_v18, %v1415_v21  ;;  %vm4215_vm2 = vcmp.lt.s32.totalorder %v2459_v34, 30 }
 0x459   : > { %v1376_v28 = vmul.f32 %v3322_v8, %v1369_v46  ;;  %v1400_v31 = vpop.permute.xlu0 %1399  ;;  %v1451_v47 = vpop.permute.xlu1 %1450  ;;  %vm4216_vm3 = vmmov %vm4215_vm2  ;;  %vm4217_vm0 = vnez %v3975_v52  ;;  %vm4218_vm13 = vnez %v3979_v27  ;;  %vm4219_vm10 = vnez %v3965_v63 }
 0x45a   : > { %v1379_v40 = vadd.f32 %v1377_v16, %v1362_v6  ;;  %v1401_v38 = vsel %vm4215_vm2, %v1398_v55, %v1400_v31  ;;  %v1402_v8 = vsel %vm4216_vm3, %v1400_v31, %v1398_v55  ;;  %v1420_v3 = vsel %vm4217_vm0, %v1419_v23, 0.0 }
 0x45b   : > { %v1378_v30 = vadd.f32 %v1376_v28, %v1361_v41  ;;  %v1421_v21 = vsel %vm4218_vm13, %v1418_v45, 0.0  ;;  %v1403_v22 = vsel %vm4219_vm10, %v1402_v8, 0.0  ;;  %vm4221_vm1 = vnez %v4220_v56 }
 0x45c   : > { %v1404_v18 = vsel %vm4221_vm1, %v1401_v38, 0.0  ;;  %v1396_v61 = vadd.f32 %v1394_v4, %v1379_v40  ;;  %v1410_v5 = vmul.f32 %v3334_v1, %v1403_v22  ;;  %v1427_v52 = vmul.f32 %v3340_v35, %v1420_v3 }
 0x45d   : > { %v1395_v13 = vadd.f32 %v1393_v51, %v1378_v30  ;;  %v1411_v15 = vmul.f32 %v3334_v1, %v1404_v18  ;;  %v1434_v41 = vpop.permute.xlu0 %1433  ;;  %v1485_v55 = vpop.permute.xlu1 %1484  ;;  %v1428_v6 = vmul.f32 %v3340_v35, %v1421_v21  ;;  %vm4222_vm12 = vcmp.lt.s32.totalorder %v2459_v34, 16 }
 0x45e   : > { %v1452_v63 = vsel %vm4222_vm12, %v3437_v29, %v1451_v47  ;;  %vm4223_vm2 = vmmov %vm4222_vm12  ;;  %vm4224_vm3 = vcmp.lt.s32.totalorder %v2459_v34, 17  ;;  %vm4226_vm13 = vcmp.ge.f32.partialorder %v2479_v48, 1.0  ;;  %vm4227_vm10 = vcmp.ge.f32.partialorder %v2481_v49, 1.0 }
 0x45f   : > { %v1412_v27 = vadd.f32 %v1410_v5, %v1395_v13  ;;  %v1413_v46 = vadd.f32 %v1411_v15, %v1396_v61  ;;  %v1453_v26 = vsel %vm4223_vm2, %v1451_v47, %v3437_v29  ;;  %v1435_v1 = vsel %vm4224_vm3, %v3439_v10, %v1434_v41  ;;  %vm4225_vm0 = vmmov %vm4224_vm3 }
 0x460   : > { %v1436_v28 = vsel %vm4225_vm0, %v1434_v41, %v3439_v10  ;;  %v1438_v23 = vsel %vm2684_vm14, %v1435_v1, 0.0  ;;  %v1454_v47 = vsel %vm4226_vm13, %v1453_v26, 0.0  ;;  %v1455_v10 = vsel %vm4227_vm10, %v1452_v63, 0.0 }
 0x461   : > { %v1429_v16 = vadd.f32 %v1427_v52, %v1412_v27  ;;  %v1430_v35 = vadd.f32 %v1428_v6, %v1413_v46  ;;  %v1437_v45 = vsel %vm2672_vm8, %v1436_v28, 0.0  ;;  %v1445_v29 = vmul.f32 %v3342_v32, %v1438_v23  ;;  %v1468_v4 = vpop.permute.xlu0 %1467  ;;  %v3549_v31 = vpop.permute.xlu1 %1729 }
 0x462   : > { %v1444_v51 = vmul.f32 %v3342_v32, %v1437_v45  ;;  %vm4228_vm1 = vcmp.lt.s32.totalorder %v2459_v34, 15  ;;  %v1461_v8 = vmul.f32 %v3352_v12, %v1454_v47  ;;  %v1462_v3 = vmul.f32 %v3352_v12, %v1455_v10 }
 0x463   : > { %v1469_v2 = vsel %vm4228_vm1, %v3443_v25, %v1468_v4  ;;  %vm4229_vm14 = vmmov %vm4228_vm1  ;;  %v1447_v40 = vadd.f32 %v1445_v29, %v1430_v35  ;;  %vm4230_vm8 = vcmp.lt.s32.totalorder %v2459_v34, 14  ;;  %vm4234_vm2 = vnez %v4006_v36 }
 0x464   : > { %v1470_v62 = vsel %vm4229_vm14, %v1468_v4, %v3443_v25  ;;  %v1446_v30 = vadd.f32 %v1444_v51, %v1429_v16  ;;  %v1472_v38 = vsel %vm2732_vm6, %v1469_v2, 0.0  ;;  %v1486_v22 = vsel %vm4230_vm8, %v3441_v59, %v1485_v55  ;;  %vm4231_vm12 = vmmov %vm4230_vm8 }
 0x465   : > { %v1471_v32 = vsel %vm2715_vm5, %v1470_v62, 0.0  ;;  %v1519_v21 = vpop.permute.xlu1 %1518  ;;  %v1487_v25 = vsel %vm4231_vm12, %v1485_v55, %v3441_v59  ;;  %v1502_v56 = vpop.permute.xlu0 %1501  ;;  %v1464_v37 = vadd.f32 %v1462_v3, %v1447_v40  ;;  %v1479_v24 = vmul.f32 %v3354_v11, %v1472_v38 }
 0x466   : > { %v1463_v18 = vadd.f32 %v1461_v8, %v1446_v30  ;;  %v1478_v13 = vmul.f32 %v3354_v11, %v1471_v32  ;;  %vm4232_vm6 = vcmp.lt.s32.totalorder %v2459_v34, 2  ;;  %v1488_v5 = vsel %vm4234_vm2, %v1487_v25, 0.0 }
 0x467   : > { %v1503_v12 = vsel %vm4232_vm6, %v3447_v53, %v1502_v56  ;;  %vm4233_vm5 = vmmov %vm4232_vm6  ;;  %vm4235_vm3 = vnez %v4012_v33  ;;  %v1481_v55 = vadd.f32 %v1479_v24, %v1464_v37  ;;  %vm4236_vm0 = vcmp.ge.f32.partialorder %v2493_v57, 2.0  ;;  %v4255_v24 = vld [vmem:[#allocation2_spill] sm:$0xff] }
 0x468   : > { %v1504_v61 = vsel %vm4233_vm5, %v1502_v56, %v3447_v53  ;;  %v1489_v59 = vsel %vm4235_vm3, %v1486_v22, 0.0  ;;  %v1480_v41 = vadd.f32 %v1478_v13, %v1463_v18  ;;  %vm4237_vm13 = vcmp.ge.f32.partialorder %v2495_v58, 2.0 }
 0x469   : > { %v1545_v15 = vpop.permute.xlu1 %1544  ;;  %v1505_v11 = vsel %vm4236_vm0, %v1504_v61, 0.0  ;;  %v1506_v52 = vsel %vm4237_vm13, %v1503_v12, 0.0  ;;  %v1495_v6 = vmul.f32 %v3360_v17, %v1488_v5  ;;  %v1496_v27 = vmul.f32 %v3360_v17, %v1489_v59 }
 0x46a   : > { %vm4238_vm10 = vcmp.lt.s32.totalorder %v2459_v34, 1  ;;  %v1512_v63 = vmul.f32 %v3362_v42, %v1505_v11  ;;  %v1513_v26 = vmul.f32 %v3362_v42, %v1506_v52  ;;  %vm4240_vm14 = vcmp.ge.f32.partialorder %v2493_v57, 1.0  ;;  %v4261_v52 = vld [vmem:[#allocation11_spill] sm:$0xff] }
 0x46b   : > { %v1520_v36 = vsel %vm4238_vm10, %v3445_v44, %v1519_v21  ;;  %vm4239_vm1 = vmmov %vm4238_vm10  ;;  %v1497_v53 = vadd.f32 %v1495_v6, %v1480_v41  ;;  %v1498_v46 = vadd.f32 %v1496_v27, %v1481_v55  ;;  %vm4241_vm8 = vcmp.ge.f32.partialorder %v2495_v58, 1.0  ;;  %v4263_v27 = vld [vmem:[#allocation12_spill] sm:$0xff] }
 0x46c   : > { %v1521_v33 = vsel %vm4239_vm1, %v1519_v21, %v3445_v44  ;;  %v1523_v17 = vsel %vm4241_vm8, %v1520_v36, 0.0  ;;  %vm4242_vm12 = vcmp.lt.s32.totalorder %v2459_v34, 127  ;;  %v1539_v10 = vmul.f32 %v3375_v43, %v3318_v14 }
 0x46d   : > { %v1596_v1 = vpop.permute.xlu1 %1595  ;;  %v1522_v28 = vsel %vm4240_vm14, %v1521_v33, 0.0  ;;  %v1514_v16 = vadd.f32 %v1512_v63, %v1497_v53  ;;  %v1515_v35 = vadd.f32 %v1513_v26, %v1498_v46  ;;  %v1530_v23 = vmul.f32 %v3373_v54, %v1523_v17  ;;  %vm4243_vm6 = vmmov %vm4242_vm12  ;;  %v4265_v63 = vld [vmem:[#allocation5_spill] sm:$0xff]  ;;  %v4266_v17 = vld [vmem:[#allocation38_spill] sm:$0xff] }
 0x46e   : > { %v1529_v45 = vmul.f32 %v3373_v54, %v1522_v28  ;;  %v1546_v42 = vsel %vm4242_vm12, %v3449_v9, %v1545_v15  ;;  %v1547_v47 = vsel %vm4243_vm6, %v1545_v15, %v3449_v9  ;;  %v1538_v2 = vmul.f32 %v3375_v43, %v3270_v19 }
 0x46f   : > { %v1532_v4 = vadd.f32 %v1530_v23, %v1515_v35  ;;  %vm4244_vm5 = vcmp.lt.s32.totalorder %v2459_v34, 113  ;;  %vm4246_vm3 = vcmp.lt.f32.partialorder %v2493_v57, 15.0  ;;  %vm4247_vm0 = vcmp.lt.f32.partialorder %v2495_v58, 15.0 }
 0x470   : > { %v1531_v29 = vadd.f32 %v1529_v45, %v1514_v16  ;;  %v1597_v54 = vsel %vm4244_vm5, %v3453_v50, %v1596_v1  ;;  %vm4245_vm2 = vmmov %vm4244_vm5  ;;  %v1548_v30 = vsel %vm4246_vm3, %v1546_v42, 0.0  ;;  %v1549_v9 = vsel %vm4247_vm0, %v1547_v47, 0.0  ;;  %v4269_v45 = vld [vmem:[#allocation37_spill] sm:$0xff] }
 0x471   : > { %v1630_v44 = vpop.permute.xlu1 %1629  ;;  %v1598_v62 = vsel %vm4245_vm2, %v1596_v1, %v3453_v50  ;;  %v1541_v32 = vadd.f32 %v1539_v10, %v1532_v4  ;;  %vm4248_vm13 = vcmp.lt.s32.totalorder %v2459_v34, 126  ;;  %v1599_v50 = vsel %vm2820_vm4, %v1597_v54, 0.0  ;;  %v4274_v10 = vld [vmem:[#allocation3_spill] sm:$0xff] }
 0x472   : > { %v1540_v38 = vadd.f32 %v1538_v2, %v1531_v29  ;;  %vm4249_vm10 = vmmov %vm4248_vm13  ;;  %v1600_v3 = vsel %vm2840_vm9, %v1598_v62, 0.0  ;;  %vm4250_vm1 = vcmp.lt.f32.partialorder %v2493_v57, 14.0  ;;  %vm4251_vm14 = vcmp.lt.f32.partialorder %v2495_v58, 14.0 }
 0x473   : > { %v1555_v56 = vmul.f32 %v3381_v20, %v1548_v30  ;;  %v1556_v18 = vmul.f32 %v3381_v20, %v1549_v9  ;;  %vm4252_vm8 = vcmp.lt.s32.totalorder %v2459_v34, 111  ;;  %v1606_v58 = vmul.f32 %v4255_v24, %v1599_v50  ;;  %v4256_v20 = vld [vmem:[#allocation36_spill] sm:$0xff]  ;;  %v4276_v9 = vld [vmem:[#allocation18_spill] sm:$0xff] }
 0x474   : > { %vm4253_vm4 = vmmov %vm4252_vm8  ;;  %v1607_v12 = vmul.f32 %v4255_v24, %v1600_v3  ;;  %vm4257_vm9 = vcmp.lt.s32.totalorder %v2459_v34, 114  ;;  %vm4262_vm6 = vnez %v4261_v52  ;;  %vm4264_vm5 = vnez %v4263_v27  ;;  %v4294_v27 = vld [vmem:[#allocation41_spill] sm:$0xff] }
 0x475   : > { %v1664_v21 = vpop.permute.xlu1 %1663  ;;  %v1632_v7 = vsel %vm4253_vm4, %v1630_v44, %v3457_v39  ;;  %v1557_v61 = vadd.f32 %v1555_v56, %v1540_v38  ;;  %v1558_v5 = vadd.f32 %v1556_v18, %v1541_v32  ;;  %vm4258_vm12 = vmmov %vm4257_vm9  ;;  %vm4270_vm2 = vcmp.lt.s32.totalorder %v2459_v34, 112 }
 0x476   : > { %v3605_v51 = vpop.permute.xlu0 %1749  ;;  %v1634_v11 = vsel %vm4146_vm7, %v1632_v7, 0.0  ;;  %vm4271_vm3 = vmmov %vm4270_vm2  ;;  %vm4272_vm0 = vcmp.lt.f32.partialorder %v2479_v48, 15.0  ;;  %v4282_v7 = vld [vmem:[#allocation15_spill] sm:$0xff]  ;;  %vm4289_vm4 = vcmp.lt.s32.totalorder %v2459_v34, 96 }
 0x479   : > { %v1698_v33 = vpop.permute.xlu1 %1697 }
 0x47a   : > { %v1562_v40 = vpop.permute.xlu0 %1561 }
 0x47b   : > { %v1563_v43 = vsel %vm4248_vm13, %v3451_v60, %v1562_v40  ;;  %v1564_v8 = vsel %vm4249_vm10, %v1562_v40, %v3451_v60  ;;  %v1631_v60 = vsel %vm4252_vm8, %v3457_v39, %v1630_v44  ;;  %vm4273_vm13 = vcmp.lt.f32.partialorder %v2481_v49, 15.0 }
 0x47c   : > { %v1565_v22 = vsel %vm4250_vm1, %v1563_v43, 0.0  ;;  %v1566_v25 = vsel %vm4251_vm14, %v1564_v8, 0.0  ;;  %v1633_v41 = vsel %vm4149_vm11, %v1631_v60, 0.0  ;;  %vm4267_vm11 = vcmp.lt.s32.totalorder %v2459_v34, 98  ;;  %v4278_v8 = vld [vmem:[#allocation25_spill] sm:$0xff] }
 0x47d   : > { %v1572_v37 = vmul.f32 %v4254_v0, %v1565_v22  ;;  %v1573_v57 = vmul.f32 %v4254_v0, %v1566_v25  ;;  %v1665_v16 = vsel %vm4267_vm11, %v4266_v17, %v1664_v21  ;;  %vm4268_vm7 = vmmov %vm4267_vm11  ;;  %vm4277_vm10 = vnez %v4276_v9  ;;  %v1715_v56 = vpop.permute.xlu1 %1714 }
 0x47e   : > { %v1579_v13 = vpop.permute.xlu0 %1578  ;;  %v1666_v35 = vsel %vm4268_vm7, %v1664_v21, %v4266_v17  ;;  %v1667_v30 = vsel %vm2969_vm15, %v1665_v16, 0.0  ;;  %v1640_v50 = vmul.f32 %v4278_v8, %v1633_v41  ;;  %v1641_v3 = vmul.f32 %v4278_v8, %v1634_v11  ;;  %v4279_v21 = vld [vmem:[#allocation39_spill] sm:$0xff]  ;;  %v4291_v11 = vld [vmem:[#allocation42_spill] sm:$0xff] }
 0x47f   : > { %v1580_v59 = vsel %vm4257_vm9, %v4256_v20, %v1579_v13  ;;  %v1581_v15 = vsel %vm4258_vm12, %v1579_v13, %v4256_v20  ;;  %v1574_v53 = vadd.f32 %v1572_v37, %v1557_v61  ;;  %v1575_v46 = vadd.f32 %v1573_v57, %v1558_v5  ;;  %v4284_v37 = vld [vmem:[#allocation16_spill] sm:$0xff]  ;;  %v4286_v13 = vld [vmem:[#allocation29_spill] sm:$0xff]  ;;  %vm4290_vm9 = vmmov %vm4289_vm4 }
 0x480   : > { %v1582_v6 = vsel %vm4262_vm6, %v1580_v59, 0.0  ;;  %v1583_v36 = vsel %vm4264_vm5, %v1581_v15, 0.0  ;;  %v1668_v40 = vsel %vm4277_vm10, %v1666_v35, 0.0  ;;  %vm4280_vm1 = vcmp.lt.s32.totalorder %v2459_v34, 110  ;;  %v4288_v20 = vld [vmem:[#allocation40_spill] sm:$0xff] }
 0x481   : > { %v1589_v26 = vmul.f32 %v4265_v63, %v1582_v6  ;;  %v1590_v1 = vmul.f32 %v4265_v63, %v1583_v36  ;;  %vm4281_vm14 = vmmov %vm4280_vm1  ;;  %vm4283_vm15 = vnez %v4282_v7  ;;  %vm4285_vm8 = vnez %v4284_v37  ;;  %v4297_v63 = vld [vmem:[#allocation19_spill] sm:$0xff]  ;;  %v4303_v35 = vld [vmem:[#allocation32_spill] sm:$0xff] }
 0x482   : > { %v1613_v28 = vpop.permute.xlu0 %1612  ;;  %v1674_v24 = vmul.f32 %v4286_v13, %v1667_v30  ;;  %v1699_v59 = vsel %vm4289_vm4, %v4288_v20, %v1698_v33  ;;  %v1700_v15 = vsel %vm4290_vm9, %v1698_v33, %v4288_v20  ;;  %vm4292_vm12 = vcmp.lt.s32.totalorder %v2459_v34, 95  ;;  %v4318_v20 = vld [vmem:[#allocation31_spill] sm:$0xff] }
 0x483   : > { %v1614_v23 = vsel %vm4270_vm2, %v4269_v45, %v1613_v28  ;;  %v1615_v44 = vsel %vm4271_vm3, %v1613_v28, %v4269_v45  ;;  %v1591_v29 = vadd.f32 %v1589_v26, %v1574_v53  ;;  %v1592_v4 = vadd.f32 %v1590_v1, %v1575_v46  ;;  %vm4293_vm6 = vmmov %vm4292_vm12  ;;  %v4299_v1 = vld [vmem:[#allocation20_spill] sm:$0xff] }
 0x484   : > { %v1616_v42 = vsel %vm4272_vm0, %v1614_v23, 0.0  ;;  %v1617_v47 = vsel %vm4273_vm13, %v1615_v44, 0.0  ;;  %v1716_v52 = vsel %vm4292_vm12, %v4291_v11, %v1715_v56  ;;  %v1717_v6 = vsel %vm4293_vm6, %v1715_v56, %v4291_v11  ;;  %v4316_v56 = vld [vmem:[#allocation35_spill] sm:$0xff] }
 0x485   : > { %v1623_v2 = vmul.f32 %v4274_v10, %v1616_v42  ;;  %v1624_v54 = vmul.f32 %v4274_v10, %v1617_v47  ;;  %v1608_v32 = vadd.f32 %v1606_v58, %v1591_v29  ;;  %v1609_v38 = vadd.f32 %v1607_v12, %v1592_v4  ;;  %v4287_v12 = vld [vmem:[#allocation28_spill] sm:$0xff]  ;;  %v4304_v42 = vld [vmem:[#allocation21_spill] sm:$0xff]  ;;  %v4306_v10 = vld [vmem:[#allocation22_spill] sm:$0xff] }
 0x486   : > { %v1647_v43 = vpop.permute.xlu0 %1646  ;;  %v1675_v58 = vmul.f32 %v4286_v13, %v1668_v40  ;;  %vm4295_vm5 = vcmp.lt.s32.totalorder %v2459_v34, 97  ;;  %vm4298_vm7 = vnez %v4297_v63  ;;  %vm4300_vm2 = vnez %v4299_v1 }
 0x487   : > { %v1648_v22 = vsel %vm4280_vm1, %v4279_v21, %v1647_v43  ;;  %v1649_v25 = vsel %vm4281_vm14, %v1647_v43, %v4279_v21  ;;  %v1625_v18 = vadd.f32 %v1623_v2, %v1608_v32  ;;  %v1626_v60 = vadd.f32 %v1624_v54, %v1609_v38  ;;  %vm4296_vm11 = vmmov %vm4295_vm5  ;;  %v4310_v54 = vld [vmem:[#allocation33_spill] sm:$0xff]  ;;  %v4311_v32 = vld [vmem:[#allocation23_spill] sm:$0xff] }
 0x488   : > { %v1650_v0 = vsel %vm4283_vm15, %v1648_v22, 0.0  ;;  %v1651_v57 = vsel %vm4285_vm8, %v1649_v25, 0.0  ;;  %vm4301_vm3 = vcmp.lt.f32.partialorder %v2479_v48, 14.0  ;;  %vm4302_vm0 = vcmp.lt.f32.partialorder %v2481_v49, 14.0  ;;  %v4313_v43 = vld [vmem:[#allocation24_spill] sm:$0xff] }
 0x489   : > { %v1657_v61 = vmul.f32 %v4287_v12, %v1650_v0  ;;  %v1658_v5 = vmul.f32 %v4287_v12, %v1651_v57  ;;  %v1642_v39 = vadd.f32 %v1640_v50, %v1625_v18  ;;  %v1643_v41 = vadd.f32 %v1641_v3, %v1626_v60  ;;  %v4315_v50 = vld [vmem:[#allocation34_spill] sm:$0xff] }
 0x48a   : > { %v1681_v55 = vpop.permute.xlu0 %1680  ;;  %v1701_v17 = vsel %vm4301_vm3, %v1699_v59, 0.0  ;;  %v1702_v16 = vsel %vm4302_vm0, %v1700_v15, 0.0  ;;  %vm4305_vm13 = vnez %v4304_v42  ;;  %vm4307_vm10 = vnez %v4306_v10 }
 0x48b   : > { %v1682_v36 = vsel %vm4295_vm5, %v4294_v27, %v1681_v55  ;;  %v1683_v53 = vsel %vm4296_vm11, %v1681_v55, %v4294_v27  ;;  %v1659_v33 = vadd.f32 %v1657_v61, %v1642_v39  ;;  %v1660_v46 = vadd.f32 %v1658_v5, %v1643_v41  ;;  %v4317_v61 = vld [vmem:[#allocation30_spill] sm:$0xff] }
 0x48c   : > { %v1684_v26 = vsel %vm4298_vm7, %v1682_v36, 0.0  ;;  %v1685_v28 = vsel %vm4300_vm2, %v1683_v53, 0.0  ;;  %v1718_v47 = vsel %vm4305_vm13, %v1716_v52, 0.0  ;;  %v1719_v2 = vsel %vm4307_vm10, %v1717_v6, 0.0  ;;  %v4322_v55 = vld [vmem:[#allocation26_spill] sm:$0xff]  ;;  %v4323_v52 = vld [vmem:[#allocation27_spill] sm:$0xff] }
 0x48d   : > { %v1691_v45 = vmul.f32 %v4303_v35, %v1684_v26  ;;  %v1692_v23 = vmul.f32 %v4303_v35, %v1685_v28  ;;  %v1676_v44 = vadd.f32 %v1674_v24, %v1659_v33  ;;  %v1677_v29 = vadd.f32 %v1675_v58, %v1660_v46 }
 0x48e   : > { %v1732_v4 = vpop.permute.xlu0 %1731  ;;  %vm4308_vm1 = vcmp.lt.s32.totalorder %v2459_v34, 94  ;;  %v1708_v62 = vmul.f32 %v4310_v54, %v1701_v17  ;;  %v1709_v30 = vmul.f32 %v4310_v54, %v1702_v16  ;;  %vm4312_vm15 = vnez %v4311_v32  ;;  %v1761_v24 = vpop.permute.xlu1 %1760 }
 0x48f   : > { %v1733_v48 = vsel %vm4308_vm1, %v3549_v31, %v1732_v4  ;;  %vm4309_vm14 = vmmov %vm4308_vm1  ;;  %v1693_v9 = vadd.f32 %v1691_v45, %v1676_v44  ;;  %v1694_v40 = vadd.f32 %v1692_v23, %v1677_v29  ;;  %vm4314_vm8 = vnez %v4313_v43 }
 0x490   : > { %v1734_v49 = vsel %vm4309_vm14, %v1732_v4, %v3549_v31  ;;  %v1735_v38 = vsel %vm4312_vm15, %v1733_v48, 0.0  ;;  %v1725_v3 = vmul.f32 %v4315_v50, %v1718_v47  ;;  %v1726_v21 = vmul.f32 %v4315_v50, %v1719_v2 }
 0x491   : > { %v1736_v8 = vsel %vm4314_vm8, %v1734_v49, 0.0  ;;  %v1710_v22 = vadd.f32 %v1708_v62, %v1693_v9  ;;  %v1711_v34 = vadd.f32 %v1709_v30, %v1694_v40  ;;  %v1742_v18 = vmul.f32 %v4316_v56, %v1735_v38 }
 0x492   : > { %v1743_v60 = vmul.f32 %v4316_v56, %v1736_v8  ;;  %v1766_v37 = vpop.permute.xlu0 %1765  ;;  %v1860_v58 = vrot.slane %v3318_v14, 4  ;;  %v1859_v12 = vrot.slane %v3270_v19, 4  ;;  %vm4320_vm4 = vcmask 1043456  }
 0x493   : > { %v1727_v31 = vadd.f32 %v1725_v3, %v1710_v22  ;;  %v1728_v25 = vadd.f32 %v1726_v21, %v1711_v34  ;;  %v1847_v5 = vadd.f32 %v4317_v61, %v1766_v37  ;;  %v1849_v59 = vadd.f32 %v4318_v20, %v1766_v37  ;;  %vm4321_vm9 = vmmov %vm4320_vm4 }
 0x494   : > { %v1841_v11 = vadd.f32 %v4322_v55, %v1761_v24  ;;  %v1843_v6 = vadd.f32 %v4323_v52, %v1761_v24  ;;  %vm4324_vm12 = vmmov %vm4320_vm4 }
 0x495   : > { %v1744_v7 = vadd.f32 %v1742_v18, %v1727_v31  ;;  %v1745_v0 = vadd.f32 %v1743_v60, %v1728_v25  ;;  %vm4325_vm6 = vmmov %vm4320_vm4 }
 0x497   : > { %v1752_v57 = vadd.f32 %v3605_v51, %v1744_v7  ;;  %v1753_v13 = vadd.f32 %v3605_v51, %v1745_v0 }
 0x499   : > { %v1854_v15 = vrot.slane %v1753_v13, 4  ;;  %v1853_v39 = vrot.slane %v1752_v57, 4  ;;  %v1865_v41 = vsel %vm4320_vm4, %v1859_v12, %v1752_v57  ;;  %v1866_v51 = vsel %vm4321_vm9, %v1860_v58, %v1753_v13 }
 0x49a   : > { %v1869_v27 = vadd.f32 %v1865_v41, %v1847_v5  ;;  %v1870_v36 = vadd.f32 %v1866_v51, %v1849_v59 }
 0x49b   : > { %v1864_v53 = vsel %vm4324_vm12, %v3318_v14, %v1854_v15  ;;  %v1863_v33 = vsel %vm4325_vm6, %v3270_v19, %v1853_v39 }
 0x49c   : > { %v1867_v46 = vadd.f32 %v1863_v33, %v1841_v11  ;;  %v1868_v63 = vadd.f32 %v1864_v53, %v1843_v6  ;;  %1873 = vst [vmem:[%s386_s13 + $0x10] sm:$0xff] %v1869_v27  ;;  %1874 = vst [vmem:[%s386_s13 + $0x18] sm:$0xff] %v1870_v36 }
 0x49e   : > { %1871 = vst [vmem:[%s386_s13] sm:$0xff] %v1867_v46  ;;  %1872 = vst [vmem:[%s386_s13 + $0x8] sm:$0xff] %v1868_v63 }
 0x49f PF: > { %s21_s17 = sadd.s32 1, %s2097_s17  }
 0x4a0   : > { %p18_p4 = scmp.ge.s32.totalorder %s21_s17, 4  }
 0x4a2   :  { %20 = sbr.rel (!%p18_p4) target bundleno = 7 (0x7), region = 94 }

</bundles_post_ra>
